<compile_context>
chip_gen: v5e
topology: v5e:2x2
jax: 0.10.0
libtpu: 0.0.40
codegen_flags: <defaults>
</compile_context>

<pallas_src>
import functools
import numpy as np
import jax
import jax.numpy as jnp
from jax.experimental import pallas as pl
from jax.experimental.pallas import tpu as pltpu

NEG_SLOPE = 0.1
DEFORM_GROUPS = 8
# Conservative scoped-VMEM budget that fits every generation (v7x: 64 MiB physical,
# v6e: 32 MiB scoped default / 128 MiB physical, v5e: 16 MiB scoped default).
_VMEM_LIMIT_BYTES = 48 * 1024 * 1024


def _row_tile(H, target=64):
    """Largest divisor of H that is <= target (row-tile height for the spatial grid)."""
    if H <= target:
        return H
    for th in range(target, 0, -1):
        if H % th == 0:
            return th
    return H


# ----------------------------- 3x3 conv + LeakyReLU -----------------------------
def _conv3x3_kernel(x_ref, w_ref, b_ref, o_ref, *, H, TH, W, Cin, Cout, apply_act):
    # x_ref: (1, H+2, W+2, Cin) padded input (one batch element, full image)
    # w_ref: (9*Cin, Cout) bf16, b_ref: (1, Cout) f32, o_ref: (1, TH, W*Cout)
    if TH == H:
        xs = x_ref[0]                                   # (H+2, W+2, Cin)
    else:
        r = pl.program_id(1)
        xs = x_ref[0, pl.ds(r * TH, TH + 2)]            # (TH+2, W+2, Cin) row tile + halo
    # im2col once -> single deep-K matmul (K = 9*Cin) on the MXU.
    patches = jnp.concatenate(
        [xs[dh:dh + TH, dw:dw + W, :].reshape(TH * W, Cin)
         for dh in range(3) for dw in range(3)],
        axis=-1)                                        # (TH*W, 9*Cin)
    acc = jnp.dot(patches.astype(jnp.bfloat16), w_ref[...],
                  preferred_element_type=jnp.float32)   # (TH*W, Cout) f32 acc
    acc = acc + b_ref[...]
    if apply_act:
        acc = jnp.where(acc >= 0, acc, NEG_SLOPE * acc)
    o_ref[0] = acc.reshape(TH, W * Cout)                # lane-dense store


def conv3x3(x, w, b, *, act=True):
    N, H, W, Cin = x.shape
    Cout = w.shape[-1]
    TH = _row_tile(H)
    xp = jnp.pad(x, ((0, 0), (1, 1), (1, 1), (0, 0)))
    wf = w.reshape(9 * Cin, Cout).astype(jnp.bfloat16)
    bf = b.reshape(1, Cout).astype(jnp.float32)
    kernel = functools.partial(_conv3x3_kernel, H=H, TH=TH, W=W, Cin=Cin, Cout=Cout,
                               apply_act=act)
    out = pl.pallas_call(
        kernel,
        out_shape=jax.ShapeDtypeStruct((N, H, W * Cout), jnp.float32),
        grid=(N, H // TH),
        in_specs=[
            pl.BlockSpec((1, H + 2, W + 2, Cin), lambda n, r: (n, 0, 0, 0)),
            pl.BlockSpec((9 * Cin, Cout), lambda n, r: (0, 0)),
            pl.BlockSpec((1, Cout), lambda n, r: (0, 0)),
        ],
        out_specs=pl.BlockSpec((1, TH, W * Cout), lambda n, r: (n, r, 0)),
        compiler_params=pltpu.CompilerParams(
            dimension_semantics=("parallel", "parallel"),
            vmem_limit_bytes=_VMEM_LIMIT_BYTES),
    )(xp, wf, bf)
    return out.reshape(N, H, W, Cout)


# ------------------------ modulated deformable conv (DCNv2) ----------------------
def _dcn_kernel(xg_ref, offy_ref, offx_ref, mask_ref, w_ref, b_ref, o_ref,
                *, H, W, Cin, Cout, dg, TH, apply_act):
    # xg_ref  : (1, dg, H, W*cg) bf16 (per-deform-group channel planes)
    # off*/mask_ref : (1, TH*W, 9*dg) f32, channel index = k*dg + g
    # w_ref   : (9*Cin, Cout) bf16, b_ref : (1, Cout) f32, o_ref : (1, TH, W*Cout)
    cg = Cin // dg
    THW = TH * W
    r = pl.program_id(1)

    # --- vectorized offset / mask arithmetic for ALL 9*dg channels at once ---
    q = jax.lax.broadcasted_iota(jnp.int32, (THW, 1), 0) + r * THW
    ph = (q // W).astype(jnp.float32)                      # (THW, 1)
    pw = (q % W).astype(jnp.float32)
    kk = jax.lax.broadcasted_iota(jnp.int32, (1, 9 * dg), 1) // dg   # tap id per column
    dh = (kk // 3 - 1).astype(jnp.float32)                 # (1, 9*dg)
    dw = (kk % 3 - 1).astype(jnp.float32)
    m = jax.nn.sigmoid(mask_ref[0])                        # (THW, 9*dg) modulation
    sy = ph + dh + offy_ref[0]                             # (THW, 9*dg)
    sx = pw + dw + offx_ref[0]
    y0 = jnp.floor(sy)
    x0 = jnp.floor(sx)
    ly = sy - y0                                           # fractional parts (f32)
    lx = sx - x0
    y0i = y0.astype(jnp.int32)
    x0i = x0.astype(jnp.int32)

    yi = jax.lax.broadcasted_iota(jnp.int32, (THW, H), 1)  # reused across all (k, g)
    xi = jax.lax.broadcasted_iota(jnp.int32, (THW, W), 1)

    acc = jnp.zeros((THW, Cout), jnp.float32) + b_ref[...]
    for k in range(9):
        parts = []
        for g in range(dg):
            c = k * dg + g
            y0c, x0c = y0i[:, c:c + 1], x0i[:, c:c + 1]
            lyc, lxc = ly[:, c:c + 1], lx[:, c:c + 1]
            # Separable bilinear sampling: out-of-range corners never match the iota,
            # so zero-padding falls out for free (weights stay exact f32 zeros).
            A = ((yi == y0c).astype(jnp.float32) * (1.0 - lyc)
                 + (yi == y0c + 1).astype(jnp.float32) * lyc) * m[:, c:c + 1]  # (THW, H)
            B = ((xi == x0c).astype(jnp.float32) * (1.0 - lxc)
                 + (xi == x0c + 1).astype(jnp.float32) * lxc)                  # (THW, W)
            T = jnp.dot(A.astype(jnp.bfloat16), xg_ref[0, g],
                        preferred_element_type=jnp.float32)                    # (THW, W*cg)
            parts.append(jnp.sum(T.reshape(THW, W, cg) * B[:, :, None], axis=1))
        sampled = jnp.concatenate(parts, axis=-1)          # (THW, Cin) — all groups fused
        acc += jnp.dot(sampled.astype(jnp.bfloat16),
                       w_ref[k * Cin:(k + 1) * Cin, :],
                       preferred_element_type=jnp.float32)  # one wide K=Cin matmul / tap
    if apply_act:
        acc = jnp.where(acc >= 0, acc, NEG_SLOPE * acc)
    o_ref[0] = acc.reshape(TH, W * Cout)                   # lane-dense store


def dcn_call(x, off_y, off_x, mask_logits, w, b, *, dg, apply_act):
    N, H, W, Cin = x.shape
    Cout = w.shape[-1]
    cg = Cin // dg
    TH = _row_tile(H)
    # Per-group channel planes (relayout done once in XLA, halves DMA bytes via bf16).
    xg = (x.reshape(N, H, W, dg, cg).transpose(0, 3, 1, 2, 4)
            .reshape(N, dg, H, W * cg).astype(jnp.bfloat16))
    wf = w.reshape(9 * Cin, Cout).astype(jnp.bfloat16)
    bf = b.reshape(1, Cout).astype(jnp.float32)
    kernel = functools.partial(_dcn_kernel, H=H, W=W, Cin=Cin, Cout=Cout,
                               dg=dg, TH=TH, apply_act=apply_act)
    out = pl.pallas_call(
        kernel,
        out_shape=jax.ShapeDtypeStruct((N, H, W * Cout), jnp.float32),
        grid=(N, H // TH),
        in_specs=[
            pl.BlockSpec((1, dg, H, W * cg), lambda n, r: (n, 0, 0, 0)),
            pl.BlockSpec((1, TH * W, 9 * dg), lambda n, r: (n, r, 0)),
            pl.BlockSpec((1, TH * W, 9 * dg), lambda n, r: (n, r, 0)),
            pl.BlockSpec((1, TH * W, 9 * dg), lambda n, r: (n, r, 0)),
            pl.BlockSpec((9 * Cin, Cout), lambda n, r: (0, 0)),
            pl.BlockSpec((1, Cout), lambda n, r: (0, 0)),
        ],
        out_specs=pl.BlockSpec((1, TH, W * Cout), lambda n, r: (n, r, 0)),
        compiler_params=pltpu.CompilerParams(
            dimension_semantics=("parallel", "parallel"),
            vmem_limit_bytes=_VMEM_LIMIT_BYTES),
    )(xg, off_y, off_x, mask_logits, wf, bf)
    return out.reshape(N, H, W, Cout)


def modulated_dcn_pack(p, x, offset_feat, *, dg, apply_act):
    # conv_offset: plain 3x3 conv (no act) producing 3*dg*9 channels (offsets, mask).
    co = conv3x3(offset_feat, p['off_w'], p['off_b'], act=False)    # (N,H,W,3*dg*9)
    N, H, W, _ = co.shape
    HW = H * W
    co = co.reshape(N, HW, 3 * dg * 9)
    # mmcv/CUDA layout: offset channel g*18 + 2k = dy, +1 = dx; mask channel g*9 + k.
    # Reorder to k-major (index = k*dg + g) so each tap's channels are lane-contiguous.
    off = co[..., :2 * dg * 9].reshape(N, HW, dg, 9, 2)
    off_y = off[..., 0].transpose(0, 1, 3, 2).reshape(N, HW, 9 * dg)
    off_x = off[..., 1].transpose(0, 1, 3, 2).reshape(N, HW, 9 * dg)
    mlog = (co[..., 2 * dg * 9:].reshape(N, HW, dg, 9)
            .transpose(0, 1, 3, 2).reshape(N, HW, 9 * dg))
    return dcn_call(x, off_y, off_x, mlog, p['w'], p['b'], dg=dg, apply_act=apply_act)


# --------------------- 2x bilinear upsample (align_corners=False) ----------------
def _up_matrix(size):
    out = 2 * size
    U = np.zeros((out, size), np.float32)
    for o in range(out):
        src = max((o + 0.5) * 0.5 - 0.5, 0.0)
        lo = min(int(np.floor(src)), size - 1)
        hi = min(lo + 1, size - 1)
        frac = src - lo
        U[o, lo] += 1.0 - frac
        U[o, hi] += frac
    return jnp.asarray(U)


def _upsample_kernel(x_ref, uh_ref, o_ref, *, H, W, C, scale):
    # Height pass: small (2H, H) matmul. Width pass: closed-form scale-2 bilinear
    # blend (0.75/0.25 with edge replication) — no kron(Uw, I_C) matrix needed.
    # Kept in f32: K=H is tiny, the op is bandwidth-bound, and it feeds DCN offsets.
    x2 = x_ref[0].reshape(H, W * C)                               # (H, W*C)
    t = jnp.dot(uh_ref[...], x2, preferred_element_type=jnp.float32)  # (2H, W*C)
    left = jnp.concatenate([t[:, :C], t[:, :-C]], axis=1)         # x[j-1] (edge pad)
    right = jnp.concatenate([t[:, C:], t[:, -C:]], axis=1)        # x[j+1] (edge pad)
    even = 0.75 * t + 0.25 * left                                 # output cols 2j
    odd = 0.75 * t + 0.25 * right                                 # output cols 2j+1
    out = jnp.concatenate([even.reshape(2 * H, W, C),
                           odd.reshape(2 * H, W, C)], axis=2)     # (2H, W, 2C)
    o_ref[0] = out.reshape(2 * H, 2 * W * C) * scale              # lane-dense store


def upsample2x(x, *, scale=1.0):
    N, H, W, C = x.shape
    Uh = _up_matrix(H)                                            # (2H, H)
    kernel = functools.partial(_upsample_kernel, H=H, W=W, C=C, scale=scale)
    out = pl.pallas_call(
        kernel,
        out_shape=jax.ShapeDtypeStruct((N, 2 * H, 2 * W * C), jnp.float32),
        grid=(N,),
        in_specs=[
            pl.BlockSpec((1, H, W, C), lambda n: (n, 0, 0, 0)),
            pl.BlockSpec((2 * H, H), lambda n: (0, 0)),
        ],
        out_specs=pl.BlockSpec((1, 2 * H, 2 * W * C), lambda n: (n, 0, 0)),
        compiler_params=pltpu.CompilerParams(
            dimension_semantics=("parallel",),
            vmem_limit_bytes=_VMEM_LIMIT_BYTES),
    )(x, Uh)
    return out.reshape(N, 2 * H, 2 * W, C)


# ------------------------------- parameters & forward ----------------------------
def _conv_params(key, cin, cout, scale=0.05):
    kw, kb = jax.random.split(key)
    return {'w': scale * jax.random.normal(kw, (3, 3, cin, cout), jnp.float32),
            'b': scale * jax.random.normal(kb, (cout,), jnp.float32)}


def init_pcd_params(key, dg=DEFORM_GROUPS):
    keys = iter(jax.random.split(key, 32))
    p = {}
    p['offset_conv1'] = {'l3': _conv_params(next(keys), 512, 256),
                         'l2': _conv_params(next(keys), 256, 128),
                         'l1': _conv_params(next(keys), 128, 64)}
    p['offset_conv2'] = {'l3': _conv_params(next(keys), 256, 256),
                         'l2': _conv_params(next(keys), 256, 128),
                         'l1': _conv_params(next(keys), 128, 64)}
    p['offset_conv3'] = {'l2': _conv_params(next(keys), 128, 128),
                         'l1': _conv_params(next(keys), 64, 64)}

    def _dcn(key, c):
        k1, k2 = jax.random.split(key)
        cp = _conv_params(k1, c, 3 * dg * 9, scale=0.02)   # conv_offset (synthetic init)
        wp = _conv_params(k2, c, c)                        # deform conv weight/bias
        return {'off_w': cp['w'], 'off_b': cp['b'], 'w': wp['w'], 'b': wp['b']}

    p['dcn_pack'] = {'l3': _dcn(next(keys), 256),
                     'l2': _dcn(next(keys), 128),
                     'l1': _dcn(next(keys), 64)}
    p['feat_conv'] = {'l2': _conv_params(next(keys), 256, 128),
                      'l1': _conv_params(next(keys), 128, 64)}
    p['bottleneck'] = {'l3': _conv_params(next(keys), 256, 128),
                       'l2': _conv_params(next(keys), 128, 64)}
    return p


def pcd_forward(params, refsr, lrsr, ref, dg=DEFORM_GROUPS):
    aligned_feat = []
    upsampled_offset, upsampled_feat = None, None
    for i in range(3, 0, -1):
        level = f'l{i}'
        offset = jnp.concatenate([refsr[i - 1], lrsr[i - 1]], axis=-1)
        p1 = params['offset_conv1'][level]
        offset = conv3x3(offset, p1['w'], p1['b'], act=True)
        p2 = params['offset_conv2'][level]
        if i == 3:
            offset = conv3x3(offset, p2['w'], p2['b'], act=True)
        else:
            offset = conv3x3(jnp.concatenate([offset, upsampled_offset], axis=-1),
                             p2['w'], p2['b'], act=True)
            p3 = params['offset_conv3'][level]
            offset = conv3x3(offset, p3['w'], p3['b'], act=True)
        feat = modulated_dcn_pack(params['dcn_pack'][level], ref[i - 1], offset,
                                  dg=dg, apply_act=(i == 3))   # lrelu fused for l3
        if i == 3:
            aligned_feat.append(feat)
        else:
            pf = params['feat_conv'][level]
            feat = conv3x3(jnp.concatenate([feat, upsampled_feat], axis=-1),
                           pf['w'], pf['b'], act=True)
            aligned_feat.append(feat)
        if i > 1:
            pb = params['bottleneck'][level]
            upsampled_offset = upsample2x(offset, scale=2.0)
            upsampled_offset = conv3x3(upsampled_offset, pb['w'], pb['b'], act=True)
            upsampled_feat = upsample2x(feat, scale=1.0)
            upsampled_feat = conv3x3(upsampled_feat, pb['w'], pb['b'], act=True)
    return aligned_feat


if __name__ == "__main__":
    key = jax.random.PRNGKey(0)
    kp, kd = jax.random.split(key)
    params = init_pcd_params(kp)

    N = 2
    # pyramid levels l1, l2, l3 (NHWC): channels 64 / 128 / 256 as implied by the module
    shapes = [(N, 8, 8, 64), (N, 4, 4, 128), (N, 2, 2, 256)]
    dkeys = jax.random.split(kd, 9)
    refsr = [jax.random.normal(dkeys[j], shapes[j], jnp.float32) for j in range(3)]
    lrsr = [jax.random.normal(dkeys[3 + j], shapes[j], jnp.float32) for j in range(3)]
    ref = [jax.random.normal(dkeys[6 + j], shapes[j], jnp.float32) for j in range(3)]

    outs = pcd_forward(params, refsr, lrsr, ref)
    outs = jax.block_until_ready(outs)
    assert outs[0].shape == (N, 2, 2, 256)   # aligned l3
    assert outs[1].shape == (N, 4, 4, 128)   # aligned l2
    assert outs[2].shape == (N, 8, 8, 64)    # aligned l1
    assert all(bool(jnp.all(jnp.isfinite(o))) for o in outs)
    print("KERNEL_OK")
</pallas_src>

<mosaic_0001>
module attributes {stable_mosaic.version = 11 : i64} {
  func.func @_conv3x3_kernel(%arg0: i32, %arg1: i32, %arg2: memref<1x4x4x512xf32, #tpu.memory_space<vmem>>, %arg3: memref<4608x256xbf16, #tpu.memory_space<vmem>>, %arg4: memref<1x256xf32, #tpu.memory_space<vmem>>, %arg5: memref<1x2x512xf32, #tpu.memory_space<vmem>>) attributes {dimension_semantics = [#tpu.dimension_semantics<parallel>, #tpu.dimension_semantics<parallel>], iteration_bounds = array<i64: 2, 1>, scalar_prefetch = 0 : i64, scratch_operands = 0 : i64, tpu.core_type = #tpu.core_type<tc>, window_params = [{transform_indices = @transform_0, window_bounds = array<i64: 1, 4, 4, 512>}, {pipeline_mode = #tpu.pipeline_mode<synchronous>, transform_indices = @transform_1, window_bounds = array<i64: 4608, 256>}, {pipeline_mode = #tpu.pipeline_mode<synchronous>, transform_indices = @transform_2, window_bounds = array<i64: 1, 256>}, {transform_indices = @transform_3, window_bounds = array<i64: 1, 2, 512>}]} {
    %c0 = arith.constant 0 : index
    %c0_0 = arith.constant 0 : index
    %c0_1 = arith.constant 0 : index
    %c0_2 = arith.constant 0 : index
    %0 = vector.load %arg2[%c0, %c0_0, %c0_1, %c0_2] : memref<1x4x4x512xf32, #tpu.memory_space<vmem>>, vector<1x4x4x512xf32>
    %1 = vector.shape_cast %0 : vector<1x4x4x512xf32> to vector<4x4x512xf32>
    %2 = vector.extract_strided_slice %1 {offsets = [0, 0, 0], sizes = [2, 2, 512], strides = [1, 1, 1]} : vector<4x4x512xf32> to vector<2x2x512xf32>
    %3 = vector.shape_cast %2 : vector<2x2x512xf32> to vector<4x512xf32>
    %4 = vector.extract_strided_slice %1 {offsets = [0, 1, 0], sizes = [2, 2, 512], strides = [1, 1, 1]} : vector<4x4x512xf32> to vector<2x2x512xf32>
    %5 = vector.shape_cast %4 : vector<2x2x512xf32> to vector<4x512xf32>
    %6 = vector.extract_strided_slice %1 {offsets = [0, 2, 0], sizes = [2, 2, 512], strides = [1, 1, 1]} : vector<4x4x512xf32> to vector<2x2x512xf32>
    %7 = vector.shape_cast %6 : vector<2x2x512xf32> to vector<4x512xf32>
    %8 = vector.extract_strided_slice %1 {offsets = [1, 0, 0], sizes = [2, 2, 512], strides = [1, 1, 1]} : vector<4x4x512xf32> to vector<2x2x512xf32>
    %9 = vector.shape_cast %8 : vector<2x2x512xf32> to vector<4x512xf32>
    %10 = vector.extract_strided_slice %1 {offsets = [1, 1, 0], sizes = [2, 2, 512], strides = [1, 1, 1]} : vector<4x4x512xf32> to vector<2x2x512xf32>
    %11 = vector.shape_cast %10 : vector<2x2x512xf32> to vector<4x512xf32>
    %12 = vector.extract_strided_slice %1 {offsets = [1, 2, 0], sizes = [2, 2, 512], strides = [1, 1, 1]} : vector<4x4x512xf32> to vector<2x2x512xf32>
    %13 = vector.shape_cast %12 : vector<2x2x512xf32> to vector<4x512xf32>
    %14 = vector.extract_strided_slice %1 {offsets = [2, 0, 0], sizes = [2, 2, 512], strides = [1, 1, 1]} : vector<4x4x512xf32> to vector<2x2x512xf32>
    %15 = vector.shape_cast %14 : vector<2x2x512xf32> to vector<4x512xf32>
    %16 = vector.extract_strided_slice %1 {offsets = [2, 1, 0], sizes = [2, 2, 512], strides = [1, 1, 1]} : vector<4x4x512xf32> to vector<2x2x512xf32>
    %17 = vector.shape_cast %16 : vector<2x2x512xf32> to vector<4x512xf32>
    %18 = vector.extract_strided_slice %1 {offsets = [2, 2, 0], sizes = [2, 2, 512], strides = [1, 1, 1]} : vector<4x4x512xf32> to vector<2x2x512xf32>
    %19 = vector.shape_cast %18 : vector<2x2x512xf32> to vector<4x512xf32>
    %20 = tpu.concatenate %3, %5, %7, %9, %11, %13, %15, %17, %19 in 1 : vector<4x512xf32>, vector<4x512xf32>, vector<4x512xf32>, vector<4x512xf32>, vector<4x512xf32>, vector<4x512xf32>, vector<4x512xf32>, vector<4x512xf32>, vector<4x512xf32> -> vector<4x4608xf32>
    %21 = arith.truncf %20 : vector<4x4608xf32> to vector<4x4608xbf16>
    %c0_3 = arith.constant 0 : index
    %c0_4 = arith.constant 0 : index
    %22 = vector.load %arg3[%c0_3, %c0_4] : memref<4608x256xbf16, #tpu.memory_space<vmem>>, vector<4608x256xbf16>
    %cst = arith.constant dense<0.000000e+00> : vector<4x256xf32>
    %23 = tpu.matmul %21, %22, %cst {dimension_numbers = #tpu.dot_dimension_numbers<[1], [0], [0], [1], [0, 0, 1, 1], [], []>} : vector<4x4608xbf16>, vector<4608x256xbf16>, vector<4x256xf32> -> vector<4x256xf32>
    %c0_5 = arith.constant 0 : index
    %c0_6 = arith.constant 0 : index
    %24 = vector.load %arg4[%c0_5, %c0_6] : memref<1x256xf32, #tpu.memory_space<vmem>>, vector<1x256xf32>
    %25 = vector.broadcast %24 : vector<1x256xf32> to vector<4x256xf32>
    %26 = arith.addf %23, %25 : vector<4x256xf32>
    %cst_7 = arith.constant 0.000000e+00 : f32
    %27 = vector.broadcast %cst_7 : f32 to vector<4x256xf32>
    %28 = arith.cmpf oge, %26, %27 : vector<4x256xf32>
    %cst_8 = arith.constant 1.000000e-01 : f32
    %29 = vector.broadcast %cst_8 : f32 to vector<4x256xf32>
    %30 = arith.mulf %29, %26 : vector<4x256xf32>
    %31 = arith.select %28, %26, %30 : vector<4x256xi1>, vector<4x256xf32>
    %32 = vector.shape_cast %31 : vector<4x256xf32> to vector<2x512xf32>
    %c0_9 = arith.constant 0 : index
    %c0_10 = arith.constant 0 : index
    %c0_11 = arith.constant 0 : index
    %33 = vector.load %arg5[%c0_9, %c0_10, %c0_11] : memref<1x2x512xf32, #tpu.memory_space<vmem>>, vector<1x2x512xf32>
    %34 = vector.shape_cast %33 : vector<1x2x512xf32> to vector<2x512xf32>
    %35 = vector.shape_cast %32 : vector<2x512xf32> to vector<1x2x512xf32>
    tpu.vector_store %arg5[%c0_9, %c0_10, %c0_11], %35 {strides = array<i32>} : memref<1x2x512xf32, #tpu.memory_space<vmem>>, vector<1x2x512xf32>,
    return
  }
  func.func @transform_0(%arg0: i32, %arg1: i32) -> (i32, i32, i32, i32) {
    %c0_i32 = arith.constant 0 : i32
    %c0_i32_0 = arith.constant 0 : i32
    %c0_i32_1 = arith.constant 0 : i32
    %c0_i32_2 = arith.constant 0 : i32
    return %arg0, %c0_i32, %c0_i32_0, %c0_i32_1 : i32, i32, i32, i32
  }
  func.func @transform_1(%arg0: i32, %arg1: i32) -> (i32, i32) {
    %c0_i32 = arith.constant 0 : i32
    %c0_i32_0 = arith.constant 0 : i32
    %c0_i32_1 = arith.constant 0 : i32
    return %c0_i32, %c0_i32_0 : i32, i32
  }
  func.func @transform_2(%arg0: i32, %arg1: i32) -> (i32, i32) {
    %c0_i32 = arith.constant 0 : i32
    %c0_i32_0 = arith.constant 0 : i32
    %c0_i32_1 = arith.constant 0 : i32
    return %c0_i32, %c0_i32_0 : i32, i32
  }
  func.func @transform_3(%arg0: i32, %arg1: i32) -> (i32, i32, i32) {
    %c0_i32 = arith.constant 0 : i32
    %c0_i32_0 = arith.constant 0 : i32
    return %arg0, %arg1, %c0_i32 : i32, i32, i32
  }
}

</mosaic_0001>

<bundles_post_ra>
// kernel: tpu_custom_call.1
= control target key start
LH: loop header
LB: loop body
LE: loop exit
PB: predicated region body
PF: predicated region fallthrough
CT: control target
= control target key end

     0   :  { %s8798_s0 = inlined_call_operand.hbm [shape: f32[2,4,4,512], index: 0, kind: input, shape index: {}]   ;;  %s8799_s1 = inlined_call_operand.hbm [shape: bf16[4608,256], index: 1, kind: input, shape index: {}]   ;;  %s8800_s2 = inlined_call_operand.hbm [shape: f32[1,256], index: 2, kind: input, shape index: {}]   ;;  %s8801_s3 = inlined_call_operand.hbm [shape: f32[2,2,512], index: 3, kind: output, shape index: {}]  }
   0x1   :  { %8808 = sst [smem:[#allocation18_spill]] %s8799_s1 }
   0x2   :  { %8 = vsyncpa [#allocation3], 0 }
   0x3   :  { %10 = vsyncpa [#allocation3 + $0x1], 0 }
   0x4   :  { %11 = vsyncpa [#allocation6], 0 }
   0x5   :  { %12 = vsyncpa [#allocation4], 0 }
   0x6   :  { %14 = vsyncpa [#allocation4 + $0x1], 0  ;;  %s8215_s12 = smov 0   ;;  %s8217_s13 = smov 0  }
   0x7   :  { %s8219_s14 = smov 0   ;;  %s8221_s15 = smov 0  }
   0x8   :  { %s8223_s16 = smov 0   ;;  %s8225_s17 = smov 0  }
   0x9 LB: > { %s5013_s18 = sadd.s32 4294967295, %s8187_s17   ;;  %s5014_s19 = sadd.s32 4294967294, %s8187_s17   ;;  %s8187_s17 = sphi %s8225_s17, %s20_s17   ;;  %s8183_s16 = sphi %s8223_s16, %s8835_s16   ;;  %s8179_s15 = sphi %s8221_s15, %s8834_s15   ;;  %s8175_s14 = sphi %s8219_s14, %s8833_s14   ;;  %s8171_s13 = sphi %s8217_s13, %s8832_s13   ;;  %s8167_s12 = sphi %s8215_s12, %s8831_s12  }
   0xa   : > { %p52_p0 = scmp.ne.s32.totalorder %s8171_s13, %s8167_s12  ;;  %p8249_p1 = scmp.eq.s32.totalorder %s5013_s18, 0 }
   0xb   : > { %p8253_p2 = scmp.eq.s32.totalorder %s5013_s18, 1  ;;  %p126_p3 = scmp.eq.s32.totalorder %s5014_s19, 1 }
   0xc   : > { %p8259_p4 = por %p8249_p1, %p52_p0  ;;  %p5015_p5 = scmp.ge.s32.totalorder %s8187_s17, 1 }
   0xd   : > { %p8264_p6 = por %p126_p3, %p52_p0  ;;  %p133_p7 = scmp.lt.s32.totalorder %s8187_s17, 3 }
   0xe   : > { %s8813_s1 = sld [smem:[#allocation18_spill]]  ;;  %s8189_s28 = smov [#allocation5]  }
   0xf   : > { %p8272_p8 = pnand %p5015_p5, %p133_p7  ;;  %s146_s29 = sshll.u32 %s8189_s28, 4  ;;  %s147_s29 = int_to_ptr.vmem [resolvable:$true] %s146_s29 }
  0x10   : > { %p5018_p11 = scmp.ge.s32.totalorder %s8187_s17, 2  ;;  %s159_s5 = sshll.u32 %s8800_s2, 4  ;;  %s160_s5 = int_to_ptr.hbm [resolvable:$true] %s159_s5 }
  0x11   : > { %p7935_p9 = pneg %p8272_p8  ;;  %s8190_s6 = smov 128  }
  0x12   : > { %s8191_s7 = smov 8   ;;  %s8192_s8 = smov [#allocation7]  }
  0x13   : > { %p7936_p10 = pnand %p7935_p9, %p8249_p1  ;;  %s161_s9 = sshll.u32 %s8192_s8, 4  ;;  %s162_s9 = int_to_ptr.vmem [resolvable:$true] %s161_s9 }
  0x14   : > { %s144_s26 = sshll.u32 %s8813_s1, 4  ;;  %s32_s10 = sadd.s32 1, %s8183_s16  ;;  %s145_s26 = int_to_ptr.hbm [resolvable:$true] %s144_s26 }
  0x15   : > { %7938 = dma.hbm_to_vmem [thread:$0]  (!%p7936_p10), %s145_s26, 73728, %s147_s29, [#allocation6], %s8190_s6, %s8190_s6, %s8191_s7  }
  0x16   : > { %7941 = dma.hbm_to_vmem [thread:$0]  (!%p7936_p10), %s160_s5, 32, %s162_s9, [#allocation6]  }
  0x17   : > { %s39_s11 = sadd.s32 1, %s8175_s14  ;;  %p34_p12 = scmp.ge.s32.totalorder %s32_s10, 2 }
  0x18   : > { %p46_p13 = scmp.ne.s32.totalorder %s8175_s14, %s8171_s13  ;;  %p47_p0 = scmp.eq.s32.totalorder %s8187_s17, 0 }
  0x19   : > { %p7952_p3 = scmp.lt.s32.totalorder %s8187_s17, 2  ;;  %s8837_s10 = smov (%p34_p12, %s32_s10), 0 }
  0x1a   : > { %p8292_p5 = por %p47_p0, %p46_p13  ;;  %p8298_p7 = por %p8253_p2, %p46_p13 }
  0x1b   : > { %s36_s24 = ssub.s32 %s8183_s16, %s8837_s10  ;;  %s172_s25 = sand.u32 1, %s8175_s14  }
  0x1c   : > { %p37_p9 = scmp.eq.s32.totalorder %s36_s24, 0  ;;  %s5019_s26 = sshll.u32 %s172_s25, 6 }
  0x1d   : > { %s7345_s28 = sshll.u32 %s8183_s16, 6  ;;  %s176_s7 = scalar_lea.vmem [#allocation2], %s5019_s26 }
  0x1e   : > { %s8307_s29 = scalar_select %p37_p9, %s8175_s14, %s39_s11  }
  0x1f   : > { %s181_s5 = scalar_lea.hbm %s8798_s0, %s7345_s28  ;;  %s184_s8 = sshll.u32 %s176_s7, 4  ;;  %s185_s8 = int_to_ptr.vmem [resolvable:$true] %s184_s8 }
  0x20   : > { %s182_s6 = sshll.u32 %s181_s5, 4  ;;  %p7943_p2 = pnand %p7952_p3, %p8292_p5  ;;  %s183_s6 = int_to_ptr.hbm [resolvable:$true] %s182_s6 }
  0x21   : > { %s173_s21 = scalar_lea.sflag [#allocation3], %s172_s25  ;;  %s8193_s9 = smov 256  }
  0x22   : > { %s8194_s1 = smov 16   ;;  %196 = sbr.rel (%p8272_p8) target bundleno = 778 (0x30a), region = 32 }
  0x23   : > { %7945 = dma.hbm_to_vmem [thread:$0]  (!%p7943_p2), %s183_s6, 1024, %s185_s8, %s173_s21, %s8193_s9, %s8193_s9, %s8194_s1  }
  0x27   : > { %s8319_s11 = sand.u32 1, %s8171_s13  }
  0x28   : > { %s5023_s24 = sshll.u32 %s8319_s11, 6  ;;  %s199_s26 = scalar_lea.sflag [#allocation3], %s8319_s11 }
  0x29   : > { %s8323_s28 = scalar_lea.vmem [#allocation2], %s5023_s24 }
  0x2a   : > { %8154 = dma.done.wait (%p8259_p4), %s199_s26, 1024  }
  0x2b   : > { %8156 = vsyncadd (%p8259_p4), %s199_s26, 4294966272 }
  0x2c   : > { %8158 = dma.done.wait (%p8249_p1), [#allocation6], 73760  }
  0x2d   : > { %8160 = vsyncadd (%p8249_p1), [#allocation6], 4294893536  ;;  %v5093_v0 = vld [vmem:[#allocation5 + $0x70] sm:$0xf]  ;;  %v7361_v1 = vld [vmem:[#allocation5 + $0x74] sm:$0xf0] }
  0x2e   : > { %v5157_v2 = vld [vmem:[#allocation5 + $0xf0] sm:$0xf]  ;;  %v5094_v3 = vor.u32 %v7361_v1, %v5093_v0  ;;  %v7377_v4 = vld [vmem:[#allocation5 + $0xf4] sm:$0xf0]  ;;  %v5085_v11 = vld [vmem:[#allocation5 + $0x60] sm:$0xf] }
  0x2f   : > { %v5221_v5 = vld [vmem:[#allocation5 + $0x170] sm:$0xf]  ;;  %v7393_v6 = vld [vmem:[#allocation5 + $0x174] sm:$0xf0]  ;;  %v5158_v7 = vor.u32 %v7377_v4, %v5157_v2  ;;  %v7359_v13 = vld [vmem:[#allocation5 + $0x64] sm:$0xf0] }
  0x30   : > { %v5222_v8 = vor.u32 %v7393_v6, %v5221_v5  ;;  %v5285_v9 = vld [vmem:[#allocation5 + $0x1f0] sm:$0xf]  ;;  %v7409_v10 = vld [vmem:[#allocation5 + $0x1f4] sm:$0xf0]  ;;  %3942 = vmatpush.bf16.msra.mxu0 %v5094_v3  ;;  %v5149_v14 = vld [vmem:[#allocation5 + $0xe0] sm:$0xf]  ;;  %v5086_v16 = vor.u32 %v7359_v13, %v5085_v11 }
  0x31   : > { %v5286_v12 = vor.u32 %v7409_v10, %v5285_v9  ;;  %v7375_v15 = vld [vmem:[#allocation5 + $0xe4] sm:$0xf0]  ;;  %3955 = vmatpush.bf16.msra.mxu1 %v5158_v7  ;;  %v5213_v18 = vld [vmem:[#allocation5 + $0x160] sm:$0xf]  ;;  %v5077_v23 = vld [vmem:[#allocation5 + $0x50] sm:$0xf] }
  0x32   : > { %3968 = vmatpush.bf16.msra.mxu2 %v5222_v8  ;;  %v5150_v17 = vor.u32 %v7375_v15, %v5149_v14  ;;  %v7391_v19 = vld [vmem:[#allocation5 + $0x164] sm:$0xf0]  ;;  %v5277_v20 = vld [vmem:[#allocation5 + $0x1e0] sm:$0xf]  ;;  %v7357_v24 = vld [vmem:[#allocation5 + $0x54] sm:$0xf0] }
  0x33   : > { %3981 = vmatpush.bf16.msra.mxu3 %v5286_v12  ;;  %v5214_v21 = vor.u32 %v7391_v19, %v5213_v18  ;;  %v7407_v22 = vld [vmem:[#allocation5 + $0x1e4] sm:$0xf0]  ;;  %v5141_v26 = vld [vmem:[#allocation5 + $0xd0] sm:$0xf]  ;;  %v7373_v27 = vld [vmem:[#allocation5 + $0xd4] sm:$0xf0]  ;;  %v5078_v29 = vor.u32 %v7357_v24, %v5077_v23 }
  0x34   : > { %v5278_v25 = vor.u32 %v7407_v22, %v5277_v20  ;;  %v5205_v28 = vld [vmem:[#allocation5 + $0x150] sm:$0xf]  ;;  %3943 = vmatpush.bf16.msra.mxu0 %v5086_v16  ;;  %v7389_v30 = vld [vmem:[#allocation5 + $0x154] sm:$0xf0]  ;;  %v5142_v33 = vor.u32 %v7373_v27, %v5141_v26  ;;  %v5069_v35 = vld [vmem:[#allocation5 + $0x40] sm:$0xf] }
  0x35   : > { %v5269_v31 = vld [vmem:[#allocation5 + $0x1d0] sm:$0xf]  ;;  %v7405_v32 = vld [vmem:[#allocation5 + $0x1d4] sm:$0xf0]  ;;  %3956 = vmatpush.bf16.msra.mxu1 %v5150_v17  ;;  %v5206_v34 = vor.u32 %v7389_v30, %v5205_v28  ;;  %v7355_v36 = vld [vmem:[#allocation5 + $0x44] sm:$0xf0] }
  0x36   : > { %3969 = vmatpush.bf16.msra.mxu2 %v5214_v21  ;;  %v5133_v37 = vld [vmem:[#allocation5 + $0xc0] sm:$0xf]  ;;  %v5270_v38 = vor.u32 %v7405_v32, %v5269_v31  ;;  %v7371_v39 = vld [vmem:[#allocation5 + $0xc4] sm:$0xf0]  ;;  %v5070_v44 = vor.u32 %v7355_v36, %v5069_v35  ;;  %v5061_v47 = vld [vmem:[#allocation5 + $0x30] sm:$0xf] }
  0x37   : > { %3982 = vmatpush.bf16.msra.mxu3 %v5278_v25  ;;  %v5197_v40 = vld [vmem:[#allocation5 + $0x140] sm:$0xf]  ;;  %v7387_v41 = vld [vmem:[#allocation5 + $0x144] sm:$0xf0]  ;;  %v5134_v45 = vor.u32 %v7371_v39, %v5133_v37  ;;  %v7353_v48 = vld [vmem:[#allocation5 + $0x34] sm:$0xf0] }
  0x38   : > { %v5261_v42 = vld [vmem:[#allocation5 + $0x1c0] sm:$0xf]  ;;  %v7403_v43 = vld [vmem:[#allocation5 + $0x1c4] sm:$0xf0]  ;;  %3944 = vmatpush.bf16.msra.mxu0 %v5078_v29  ;;  %v5198_v46 = vor.u32 %v7387_v41, %v5197_v40  ;;  %v5125_v49 = vld [vmem:[#allocation5 + $0xb0] sm:$0xf]  ;;  %v5062_v56 = vor.u32 %v7353_v48, %v5061_v47 }
  0x39   : > { %3957 = vmatpush.bf16.msra.mxu1 %v5142_v33  ;;  %v5262_v50 = vor.u32 %v7403_v43, %v5261_v42  ;;  %v7369_v51 = vld [vmem:[#allocation5 + $0xb4] sm:$0xf0]  ;;  %v5189_v52 = vld [vmem:[#allocation5 + $0x130] sm:$0xf]  ;;  %v5053_v59 = vld [vmem:[#allocation5 + $0x20] sm:$0xf] }
  0x3a   : > { %3970 = vmatpush.bf16.msra.mxu2 %v5206_v34  ;;  %v7385_v53 = vld [vmem:[#allocation5 + $0x134] sm:$0xf0]  ;;  %v5253_v54 = vld [vmem:[#allocation5 + $0x1b0] sm:$0xf]  ;;  %v5126_v57 = vor.u32 %v7369_v51, %v5125_v49  ;;  %v7351_v60 = vld [vmem:[#allocation5 + $0x24] sm:$0xf0] }
  0x3b   : > { %3983 = vmatpush.bf16.msra.mxu3 %v5270_v38  ;;  %v7401_v55 = vld [vmem:[#allocation5 + $0x1b4] sm:$0xf0]  ;;  %v5190_v58 = vor.u32 %v7385_v53, %v5189_v52  ;;  %v5117_v61 = vld [vmem:[#allocation5 + $0xa0] sm:$0xf]  ;;  %v7367_v63 = vld [vmem:[#allocation5 + $0xa4] sm:$0xf0]  ;;  %v5054_v4 = vor.u32 %v7351_v60, %v5053_v59 }
  0x3c   : > { %3945 = vmatpush.bf16.msra.mxu0 %v5070_v44  ;;  %v5254_v62 = vor.u32 %v7401_v55, %v5253_v54  ;;  %v5181_v0 = vld [vmem:[#allocation5 + $0x120] sm:$0xf]  ;;  %v7383_v1 = vld [vmem:[#allocation5 + $0x124] sm:$0xf0]  ;;  %v5118_v5 = vor.u32 %v7367_v63, %v5117_v61  ;;  %v5045_v7 = vld [vmem:[#allocation5 + $0x10] sm:$0xf] }
  0x3d   : > { %3958 = vmatpush.bf16.msra.mxu1 %v5134_v45  ;;  %v5245_v2 = vld [vmem:[#allocation5 + $0x1a0] sm:$0xf]  ;;  %v7399_v3 = vld [vmem:[#allocation5 + $0x1a4] sm:$0xf0]  ;;  %v5182_v6 = vor.u32 %v7383_v1, %v5181_v0  ;;  %v7349_v8 = vld [vmem:[#allocation5 + $0x14] sm:$0xf0] }
  0x3e   : > { %3971 = vmatpush.bf16.msra.mxu2 %v5198_v46  ;;  %v5109_v9 = vld [vmem:[#allocation5 + $0x90] sm:$0xf]  ;;  %v5246_v10 = vor.u32 %v7399_v3, %v5245_v2  ;;  %v7365_v11 = vld [vmem:[#allocation5 + $0x94] sm:$0xf0]  ;;  %v5046_v16 = vor.u32 %v7349_v8, %v5045_v7  ;;  %v5037_v17 = vld [vmem:[#allocation5] sm:$0xf] }
  0x3f   : > { %3984 = vmatpush.bf16.msra.mxu3 %v5262_v50  ;;  %v5173_v12 = vld [vmem:[#allocation5 + $0x110] sm:$0xf]  ;;  %v7381_v13 = vld [vmem:[#allocation5 + $0x114] sm:$0xf0]  ;;  %v7347_v18 = vld [vmem:[#allocation5 + $0x4] sm:$0xf0]  ;;  %v5110_v19 = vor.u32 %v7365_v11, %v5109_v9 }
  0x40   : > { %3946 = vmatpush.bf16.msra.mxu0 %v5062_v56  ;;  %v5237_v14 = vld [vmem:[#allocation5 + $0x190] sm:$0xf]  ;;  %v7397_v15 = vld [vmem:[#allocation5 + $0x194] sm:$0xf0]  ;;  %v5174_v20 = vor.u32 %v7381_v13, %v5173_v12  ;;  %v5101_v21 = vld [vmem:[#allocation5 + $0x80] sm:$0xf]  ;;  %v5038_v31 = vor.u32 %v7347_v18, %v5037_v17 }
  0x41   : > { %3959 = vmatpush.bf16.msra.mxu1 %v5126_v57  ;;  %v7363_v22 = vld [vmem:[#allocation5 + $0x84] sm:$0xf0]  ;;  %v5165_v23 = vld [vmem:[#allocation5 + $0x100] sm:$0xf]  ;;  %v5238_v24 = vor.u32 %v7397_v15, %v5237_v14  ;;  %v5349_v28 = vld [vmem:[#allocation5 + $0x270] sm:$0xf] }
  0x42   : > { %3972 = vmatpush.bf16.msra.mxu2 %v5190_v58  ;;  %v7379_v25 = vld [vmem:[#allocation5 + $0x104] sm:$0xf0]  ;;  %v5229_v26 = vld [vmem:[#allocation5 + $0x180] sm:$0xf]  ;;  %v7425_v29 = vld [vmem:[#allocation5 + $0x274] sm:$0xf0]  ;;  %v5102_v35 = vor.u32 %v7363_v22, %v5101_v21 }
  0x43   : > { %3985 = vmatpush.bf16.msra.mxu3 %v5254_v62  ;;  %v7395_v27 = vld [vmem:[#allocation5 + $0x184] sm:$0xf0]  ;;  %v5413_v30 = vld [vmem:[#allocation5 + $0x2f0] sm:$0xf]  ;;  %v7441_v32 = vld [vmem:[#allocation5 + $0x2f4] sm:$0xf0]  ;;  %v5166_v36 = vor.u32 %v7379_v25, %v5165_v23  ;;  %v5350_v40 = vor.u32 %v7425_v29, %v5349_v28 }
  0x44   : > { %3947 = vmatpush.bf16.msra.mxu0 %v5054_v4  ;;  %v5477_v33 = vld [vmem:[#allocation5 + $0x370] sm:$0xf]  ;;  %v7457_v34 = vld [vmem:[#allocation5 + $0x374] sm:$0xf0]  ;;  %v5230_v39 = vor.u32 %v7395_v27, %v5229_v26  ;;  %v5414_v41 = vor.u32 %v7441_v32, %v5413_v30  ;;  %v5341_v43 = vld [vmem:[#allocation5 + $0x260] sm:$0xf] }
  0x45   : > { %3960 = vmatpush.bf16.msra.mxu1 %v5118_v5  ;;  %v5541_v37 = vld [vmem:[#allocation5 + $0x3f0] sm:$0xf]  ;;  %v7473_v38 = vld [vmem:[#allocation5 + $0x3f4] sm:$0xf0]  ;;  %v5478_v42 = vor.u32 %v7457_v34, %v5477_v33  ;;  %v7423_v44 = vld [vmem:[#allocation5 + $0x264] sm:$0xf0] }
  0x46   : > { %3973 = vmatpush.bf16.msra.mxu2 %v5182_v6  ;;  %v5405_v45 = vld [vmem:[#allocation5 + $0x2e0] sm:$0xf]  ;;  %v5542_v46 = vor.u32 %v7473_v38, %v5541_v37  ;;  %v7439_v47 = vld [vmem:[#allocation5 + $0x2e4] sm:$0xf0]  ;;  %v5342_v52 = vor.u32 %v7423_v44, %v5341_v43  ;;  %v5333_v53 = vld [vmem:[#allocation5 + $0x250] sm:$0xf] }
  0x47   : > { %3986 = vmatpush.bf16.msra.mxu3 %v5246_v10  ;;  %v5469_v48 = vld [vmem:[#allocation5 + $0x360] sm:$0xf]  ;;  %v7455_v49 = vld [vmem:[#allocation5 + $0x364] sm:$0xf0]  ;;  %v5406_v54 = vor.u32 %v7439_v47, %v5405_v45  ;;  %v7421_v56 = vld [vmem:[#allocation5 + $0x254] sm:$0xf0] }
  0x48   : > { %3948 = vmatpush.bf16.msra.mxu0 %v5046_v16  ;;  %v5533_v50 = vld [vmem:[#allocation5 + $0x3e0] sm:$0xf]  ;;  %v7471_v51 = vld [vmem:[#allocation5 + $0x3e4] sm:$0xf0]  ;;  %v5470_v55 = vor.u32 %v7455_v49, %v5469_v48  ;;  %v5397_v57 = vld [vmem:[#allocation5 + $0x2d0] sm:$0xf]  ;;  %v5334_v2 = vor.u32 %v7421_v56, %v5333_v53 }
  0x49   : > { %3961 = vmatpush.bf16.msra.mxu1 %v5110_v19  ;;  %v7437_v58 = vld [vmem:[#allocation5 + $0x2d4] sm:$0xf0]  ;;  %v5534_v59 = vor.u32 %v7471_v51, %v5533_v50  ;;  %v5461_v60 = vld [vmem:[#allocation5 + $0x350] sm:$0xf]  ;;  %v5325_v0 = vld [vmem:[#allocation5 + $0x240] sm:$0xf] }
  0x4a   : > { %3974 = vmatpush.bf16.msra.mxu2 %v5174_v20  ;;  %v7453_v61 = vld [vmem:[#allocation5 + $0x354] sm:$0xf0]  ;;  %v5525_v62 = vld [vmem:[#allocation5 + $0x3d0] sm:$0xf]  ;;  %v7419_v1 = vld [vmem:[#allocation5 + $0x244] sm:$0xf0]  ;;  %v5398_v7 = vor.u32 %v7437_v58, %v5397_v57 }
  0x4b   : > { %3987 = vmatpush.bf16.msra.mxu3 %v5238_v24  ;;  %v7469_v63 = vld [vmem:[#allocation5 + $0x3d4] sm:$0xf0]  ;;  %v5389_v3 = vld [vmem:[#allocation5 + $0x2c0] sm:$0xf]  ;;  %v7435_v4 = vld [vmem:[#allocation5 + $0x2c4] sm:$0xf0]  ;;  %v5462_v8 = vor.u32 %v7453_v61, %v5461_v60  ;;  %v5326_v20 = vor.u32 %v7419_v1, %v5325_v0 }
  0x4c   : > { %3949 = vmatpush.bf16.msra.mxu0 %v5038_v31  ;;  %v5453_v5 = vld [vmem:[#allocation5 + $0x340] sm:$0xf]  ;;  %v7451_v9 = vld [vmem:[#allocation5 + $0x344] sm:$0xf0]  ;;  %v5526_v12 = vor.u32 %v7469_v63, %v5525_v62  ;;  %v8340_v14 = vld [vmem:[%s8323_s28 + $0x10] sm:$0xff]  ;;  %vm254_vm0 = vcmask 1041408   ;;  %v5390_v23 = vor.u32 %v7435_v4, %v5389_v3 }
  0x4d   : > { %3962 = vmatpush.bf16.msra.mxu1 %v5102_v35  ;;  %v8334_v6 = vld [vmem:[%s8323_s28] sm:$0xff]  ;;  %v8337_v11 = vld [vmem:[%s8323_s28 + $0x8] sm:$0xff]  ;;  %v8343_v15 = vld [vmem:[%s8323_s28 + $0x30] sm:$0xff]  ;;  %v5454_v24 = vor.u32 %v7451_v9, %v5453_v5  ;;  %293 = vst.sshfl [vmem:[#allocation1 + $0x10] sm:$0xff pattern:$0x75643120] %v8340_v14 }
  0x4e   : > { %3975 = vmatpush.bf16.msra.mxu2 %v5166_v36  ;;  %v5517_v10 = vld [vmem:[#allocation5 + $0x3c0] sm:$0xf]  ;;  %v7467_v13 = vld [vmem:[#allocation5 + $0x3c4] sm:$0xf0]  ;;  %v5317_v16 = vld [vmem:[#allocation5 + $0x230] sm:$0xf] }
  0x4f   : > { %3988 = vmatpush.bf16.msra.mxu3 %v5230_v39  ;;  %v7417_v17 = vld [vmem:[#allocation5 + $0x234] sm:$0xf0]  ;;  %289 = vst.sshfl [vmem:[#allocation1] sm:$0xff pattern:$0x75643120] %v8334_v6  ;;  %v323_v19 = vrot.slane %v8343_v15, 2  ;;  %v5518_v27 = vor.u32 %v7467_v13, %v5517_v10 }
  0x50   : > { %3994 = vmatpush.bf16.msrb.mxu0 %v5350_v40  ;;  %v8346_v18 = vld [vmem:[%s8323_s28 + $0x18] sm:$0xff]  ;;  %v5381_v21 = vld [vmem:[#allocation5 + $0x2b0] sm:$0xf]  ;;  %290 = vst.sshfl [vmem:[#allocation1 + $0x8] sm:$0xff pattern:$0x75643120] %v8337_v11  ;;  %v5318_v31 = vor.u32 %v7417_v17, %v5317_v16 }
  0x51   : > { %4007 = vmatpush.bf16.msrb.mxu1 %v5414_v41  ;;  %v7433_v22 = vld [vmem:[#allocation5 + $0x2b4] sm:$0xf0]  ;;  %v5445_v25 = vld [vmem:[#allocation5 + $0x330] sm:$0xf]  ;;  %v8356_v26 = vsel %vm254_vm0, %v8343_v15, %v323_v19  ;;  %v5309_v32 = vld [vmem:[#allocation5 + $0x220] sm:$0xf] }
  0x52   : > { %4020 = vmatpush.bf16.msrb.mxu2 %v5478_v42  ;;  %v7449_v28 = vld [vmem:[#allocation5 + $0x334] sm:$0xf0]  ;;  %294 = vst.sshfl [vmem:[#allocation1 + $0x18] sm:$0xff pattern:$0x75643120] %v8346_v18  ;;  %v5382_v35 = vor.u32 %v7433_v22, %v5381_v21  ;;  %v8360_v43 = vld [vmem:[%s8323_s28 + $0x20] sm:$0xff] }
  0x53   : > { %4033 = vmatpush.bf16.msrb.mxu3 %v5542_v46  ;;  %v5509_v29 = vld [vmem:[#allocation5 + $0x3b0] sm:$0xf]  ;;  %v7465_v30 = vld [vmem:[#allocation5 + $0x3b4] sm:$0xf0]  ;;  %v7415_v33 = vld [vmem:[#allocation5 + $0x224] sm:$0xf0]  ;;  %v5446_v36 = vor.u32 %v7449_v28, %v5445_v25 }
  0x54   : > { %3995 = vmatpush.bf16.msrb.mxu0 %v5342_v52  ;;  %v5373_v34 = vld [vmem:[#allocation5 + $0x2a0] sm:$0xf]  ;;  %v7431_v37 = vld [vmem:[#allocation5 + $0x2a4] sm:$0xf0]  ;;  %v5510_v40 = vor.u32 %v7465_v30, %v5509_v29  ;;  %v5301_v45 = vld [vmem:[#allocation5 + $0x210] sm:$0xf]  ;;  %v5310_v47 = vor.u32 %v7415_v33, %v5309_v32 }
  0x55   : > { %4008 = vmatpush.bf16.msrb.mxu1 %v5406_v54  ;;  %v5437_v38 = vld [vmem:[#allocation5 + $0x320] sm:$0xf]  ;;  %v7447_v39 = vld [vmem:[#allocation5 + $0x324] sm:$0xf0]  ;;  %v7413_v46 = vld [vmem:[#allocation5 + $0x214] sm:$0xf0]  ;;  %v5374_v53 = vor.u32 %v7431_v37, %v5373_v34 }
  0x56   : > { %4021 = vmatpush.bf16.msrb.mxu2 %v5470_v55  ;;  %v5501_v41 = vld [vmem:[#allocation5 + $0x3a0] sm:$0xf]  ;;  %v7463_v42 = vld [vmem:[#allocation5 + $0x3a4] sm:$0xf0]  ;;  %v5365_v49 = vld [vmem:[#allocation5 + $0x290] sm:$0xf]  ;;  %v5438_v54 = vor.u32 %v7447_v39, %v5437_v38  ;;  %v5302_v62 = vor.u32 %v7413_v46, %v5301_v45 }
  0x57   : > { %4034 = vmatpush.bf16.msrb.mxu3 %v5534_v59  ;;  %v8362_v44 = vld [vmem:[#allocation1 + $0x1] ss:$2 sm:$0xff]  ;;  %v8365_v48 = vld [vmem:[%s8323_s28 + $0x28] sm:$0xff]  ;;  %v5429_v51 = vld [vmem:[#allocation5 + $0x310] sm:$0xf]  ;;  %v248_v55 = vrot.slane %v8334_v6, 2  ;;  %v5502_v57 = vor.u32 %v7463_v42, %v5501_v41 }
  0x58   : > { %3996 = vmatpush.bf16.msrb.mxu0 %v5334_v2  ;;  %313 = vst.sshfl [vmem:[#allocation1] sm:$0xff pattern:$0x75643120] %v8340_v14  ;;  %v7429_v50 = vld [vmem:[#allocation5 + $0x294] sm:$0xf0]  ;;  %v249_v58 = vrot.slane %v8337_v11, 4 }
  0x59   : > { %4009 = vmatpush.bf16.msrb.mxu1 %v5398_v7  ;;  %v7445_v52 = vld [vmem:[#allocation5 + $0x314] sm:$0xf0]  ;;  %v8369_v56 = vld [vmem:[#allocation1 + $0x11] ss:$2 sm:$0xff]  ;;  %v250_v60 = vrot.slane %v8337_v11, 6  ;;  %vm256_vm1 = vcmask 1045508   ;;  %v5366_v63 = vor.u32 %v7429_v50, %v5365_v49  ;;  %v255_v10 = vsel %vm254_vm0, %v8334_v6, %v248_v55 }
  0x5a   : > { %4022 = vmatpush.bf16.msrb.mxu2 %v5462_v8  ;;  %314 = vst.sshfl [vmem:[#allocation1 + $0x8] sm:$0xff pattern:$0x75643120] %v8346_v18  ;;  %v5493_v59 = vld [vmem:[#allocation5 + $0x390] sm:$0xf]  ;;  %vm263_vm2 = vcmask 1043458   ;;  %v5430_v0 = vor.u32 %v7445_v52, %v5429_v51 }
  0x5b   : > { %4035 = vmatpush.bf16.msrb.mxu3 %v5526_v12  ;;  %317 = vst.sshfl [vmem:[#allocation1 + $0x10] sm:$0xff pattern:$0x75643120] %v8360_v43  ;;  %v7461_v61 = vld [vmem:[#allocation5 + $0x394] sm:$0xf0]  ;;  %v329_v4 = vsel %vm263_vm2, %v8343_v15, %v323_v19  ;;  %v257_v11 = vsel %vm256_vm1, %v249_v58, %v250_v60  ;;  %vm258_vm3 = vcmask 1043456  }
  0x5c   : > { %3997 = vmatpush.bf16.msrb.mxu0 %v5326_v20  ;;  %318 = vst.sshfl [vmem:[#allocation1 + $0x18] sm:$0xff pattern:$0x75643120] %v8365_v48  ;;  %v5293_v1 = vld [vmem:[#allocation5 + $0x200] sm:$0xf]  ;;  %v5494_v5 = vor.u32 %v7461_v61, %v5493_v59  ;;  %v251_v16 = vrot.slane %v8340_v14, 2  ;;  %v259_v25 = vsel %vm258_vm3, %v255_v10, %v257_v11 }
  0x5d   : > { %4010 = vmatpush.bf16.msrb.mxu1 %v5390_v23  ;;  %v7411_v2 = vld [vmem:[#allocation5 + $0x204] sm:$0xf0]  ;;  %v5357_v3 = vld [vmem:[#allocation5 + $0x280] sm:$0xf]  ;;  %v252_v17 = vrot.slane %v8346_v18, 4  ;;  %v253_v19 = vrot.slane %v8346_v18, 6 }
  0x5e   : > { %4023 = vmatpush.bf16.msrb.mxu2 %v5454_v24  ;;  %v7427_v7 = vld [vmem:[#allocation5 + $0x284] sm:$0xf0]  ;;  %v5421_v8 = vld [vmem:[#allocation5 + $0x300] sm:$0xf]  ;;  %v5294_v21 = vor.u32 %v7411_v2, %v5293_v1  ;;  %v243_v22 = vld [vmem:[%s8323_s28 + $0x38] sm:$0xff]  ;;  %v260_v18 = vsel %vm254_vm0, %v8340_v14, %v251_v16  ;;  %vm265_vm4 = vcmask 1045504   ;;  %v270_v33 = vsel %vm263_vm2, %v8340_v14, %v251_v16 }
  0x5f   : > { %4036 = vmatpush.bf16.msrb.mxu3 %v5518_v27  ;;  %v7443_v9 = vld [vmem:[#allocation5 + $0x304] sm:$0xf0]  ;;  %v5485_v12 = vld [vmem:[#allocation5 + $0x380] sm:$0xf]  ;;  %v5358_v23 = vor.u32 %v7427_v7, %v5357_v3  ;;  %v261_v29 = vsel %vm256_vm1, %v252_v17, %v253_v19  ;;  %vm274_vm5 = vcmask 1040384   ;;  %vm275_vm6 = vcmask 1042434  }
  0x60   : > { %3998 = vmatpush.bf16.msrb.mxu0 %v5318_v31  ;;  %v7459_v13 = vld [vmem:[#allocation5 + $0x384] sm:$0xf0]  ;;  %v5422_v24 = vor.u32 %v7443_v9, %v5421_v8  ;;  %v8401_v30 = vsel %vm258_vm3, %v260_v18, %v261_v29  ;;  %v266_v31 = vsel %vm265_vm4, %v250_v60, %v249_v58  ;;  %vm267_vm7 = vcmask 1045506   ;;  %vm276_vm8 = vmor %vm274_vm5, %vm275_vm6  ;;  %v7521_v58 = vld [vmem:[#allocation5 + $0x574] sm:$0xf0]  ;;  %s5026_s1 = sshll.u32 %s8319_s11, 3 }
  0x61   : > { %4011 = vmatpush.bf16.msrb.mxu1 %v5382_v35  ;;  %v8388_v20 = vld [vmem:[#allocation1 + $0x1] ss:$2 sm:$0xff]  ;;  %v5486_v28 = vor.u32 %v7459_v13, %v5485_v12  ;;  %vm277_vm9 = vcmask 1044484   ;;  %v271_v34 = vsel %vm265_vm4, %v253_v19, %v252_v17  ;;  %v324_v35 = vrot.slane %v243_v22, 4  ;;  %v5797_v59 = vld [vmem:[#allocation5 + $0x5f0] sm:$0xf] }
  0x62   : > { %4024 = vmatpush.bf16.msrb.mxu2 %v5446_v36  ;;  %337 = vst.sshfl [vmem:[#allocation1] sm:$0xff pattern:$0x75643120] %v8360_v43  ;;  %v325_v36 = vrot.slane %v243_v22, 6  ;;  %vm278_vm10 = vmor %vm276_vm8, %vm277_vm9  ;;  %vm279_vm11 = vcmask 1046534   ;;  %v5029_v50 = vrot.slane %v8401_v30, 9 }
  0x63   : > { %4037 = vmatpush.bf16.msrb.mxu3 %v5510_v40  ;;  %v8393_v27 = vld [vmem:[#allocation1 + $0x11] ss:$2 sm:$0xff]  ;;  %338 = vst.sshfl [vmem:[#allocation1 + $0x8] sm:$0xff pattern:$0x75643120] %v8365_v48  ;;  %v272_v40 = vsel %vm267_vm7, %v270_v33, %v271_v34  ;;  %vm8426_vm12 = vmor %vm278_vm10, %vm279_vm11  ;;  %s7922_s20 = sshll.u32 %s8179_s15, 3 }
  0x64   : > { %3999 = vmatpush.bf16.msrb.mxu0 %v5310_v47  ;;  %341 = vst.sshfl [vmem:[#allocation1 + $0x10] sm:$0xff pattern:$0x75643120] %v8343_v15  ;;  %v264_v15 = vsel %vm263_vm2, %v8334_v6, %v248_v55  ;;  %v327_v6 = vsel %vm256_vm1, %v324_v35, %v325_v36  ;;  %v330_v39 = vsel %vm265_vm4, %v325_v36, %v324_v35  ;;  %v5027_v47 = vrot.slane %v259_v25, 9  ;;  %v7505_v55 = vld [vmem:[#allocation5 + $0x4f4] sm:$0xf0]  ;;  %s4908_s18 = scalar_lea.hbm %s8801_s3, %s7922_s20 }
  0x65   : > { %4012 = vmatpush.bf16.msrb.mxu1 %v5374_v53  ;;  %342 = vst.sshfl [vmem:[#allocation1 + $0x18] sm:$0xff pattern:$0x75643120] %v243_v22  ;;  %v268_v38 = vsel %vm267_vm7, %v264_v15, %v266_v31  ;;  %v8422_v14 = vsel %vm258_vm3, %v8356_v26, %v327_v6  ;;  %v331_v41 = vsel %vm267_vm7, %v329_v4, %v330_v39  ;;  %v5030_v51 = vrot.slane %v272_v40, 9  ;;  %v5605_v26 = vld [vmem:[#allocation5 + $0x470] sm:$0xf] }
  0x66   : > { %4025 = vmatpush.bf16.msrb.mxu2 %v5438_v54  ;;  %345 = vst [vmem:[#allocation1] ss:$4 sm:$0xff] %v259_v25  ;;  %v5033_v42 = vrot.slane %v8422_v14, 9  ;;  %v5034_v45 = vrot.slane %v331_v41, 9  ;;  %v5028_v49 = vrot.slane %v268_v38, 9  ;;  %s235_s25 = scalar_lea.vmem [#allocation8], %s5026_s1 }
  0x67   : > { %4038 = vmatpush.bf16.msrb.mxu3 %v5502_v57  ;;  %v7489_v53 = vld [vmem:[#allocation5 + $0x474] sm:$0xf0]  ;;  %v5669_v54 = vld [vmem:[#allocation5 + $0x4f0] sm:$0xf]  ;;  %v7487_v1 = vld [vmem:[#allocation5 + $0x464] sm:$0xf0]  ;;  %v8439_v4 = vsel %vm8426_vm12, %v5029_v50, %v5030_v51 }
  0x68   : > { %4000 = vmatpush.bf16.msrb.mxu0 %v5302_v62  ;;  %v8433_v52 = vsel %vm8426_vm12, %v5033_v42, %v5034_v45  ;;  %v5733_v57 = vld [vmem:[#allocation5 + $0x570] sm:$0xf]  ;;  %v7537_v60 = vld [vmem:[#allocation5 + $0x5f4] sm:$0xf0]  ;;  %v284_v61 = vsel %vm8426_vm12, %v5027_v47, %v5028_v49  ;;  %v5661_v2 = vld [vmem:[#allocation5 + $0x4e0] sm:$0xf]  ;;  %v5606_v10 = vor.u32 %v7489_v53, %v5605_v26  ;;  %v5670_v11 = vor.u32 %v7505_v55, %v5669_v54 }
  0x69   : > { %4013 = vmatpush.bf16.msrb.mxu1 %v5366_v63  ;;  %v7503_v3 = vld [vmem:[#allocation5 + $0x4e4] sm:$0xf0]  ;;  %v5734_v16 = vor.u32 %v7521_v58, %v5733_v57  ;;  %v5798_v17 = vor.u32 %v7537_v60, %v5797_v59  ;;  %v5725_v19 = vld [vmem:[#allocation5 + $0x560] sm:$0xf]  ;;  %v7485_v18 = vld [vmem:[#allocation5 + $0x454] sm:$0xf0] }
  0x6a   : > { %4026 = vmatpush.bf16.msrb.mxu2 %v5430_v0  ;;  %v8408_v32 = vld [vmem:[#allocation1 + $0x1] ss:$2 sm:$0xff]  ;;  %v5662_v25 = vor.u32 %v7503_v3, %v5661_v2  ;;  %v5653_v31 = vld [vmem:[#allocation5 + $0x4d0] sm:$0xf]  ;;  %v7483_v39 = vld [vmem:[#allocation5 + $0x444] sm:$0xf0] }
  0x6b   : > { %4039 = vmatpush.bf16.msrb.mxu3 %v5494_v5  ;;  %v5597_v0 = vld [vmem:[#allocation5 + $0x460] sm:$0xf]  ;;  %v7501_v33 = vld [vmem:[#allocation5 + $0x4d4] sm:$0xf0]  ;;  %v5717_v34 = vld [vmem:[#allocation5 + $0x550] sm:$0xf] }
  0x6c   : > { %4001 = vmatpush.bf16.msrb.mxu0 %v5294_v21  ;;  %v8413_v37 = vld [vmem:[#allocation1 + $0x11] ss:$2 sm:$0xff]  ;;  %v5789_v22 = vld [vmem:[#allocation5 + $0x5e0] sm:$0xf]  ;;  %v7517_v35 = vld [vmem:[#allocation5 + $0x554] sm:$0xf0]  ;;  %v5654_v45 = vor.u32 %v7501_v33, %v5653_v31 }
  0x6d   : > { %4014 = vmatpush.bf16.msrb.mxu1 %v5358_v23  ;;  %347 = vst [vmem:[#allocation1 + $0x1] ss:$4 sm:$0xff] %v8401_v30  ;;  %v7519_v21 = vld [vmem:[#allocation5 + $0x564] sm:$0xf0]  ;;  %v5781_v36 = vld [vmem:[#allocation5 + $0x5d0] sm:$0xf]  ;;  %v5718_v53 = vor.u32 %v7517_v35, %v5717_v34 }
  0x6e   : > { %4027 = vmatpush.bf16.msrb.mxu2 %v5422_v24  ;;  %v7535_v23 = vld [vmem:[#allocation5 + $0x5e4] sm:$0xf0]  ;;  %v5598_v24 = vor.u32 %v7487_v1, %v5597_v0  ;;  %v5726_v29 = vor.u32 %v7519_v21, %v5725_v19  ;;  %v7533_v38 = vld [vmem:[#allocation5 + $0x5d4] sm:$0xf0]  ;;  %v5581_v6 = vld [vmem:[#allocation5 + $0x440] sm:$0xf] }
  0x6f   : > { %4040 = vmatpush.bf16.msrb.mxu3 %v5486_v28  ;;  %v5589_v28 = vld [vmem:[#allocation5 + $0x450] sm:$0xf]  ;;  %v5790_v15 = vor.u32 %v7535_v23, %v5789_v22  ;;  %v5645_v40 = vld [vmem:[#allocation5 + $0x4c0] sm:$0xf]  ;;  %v7499_v41 = vld [vmem:[#allocation5 + $0x4c4] sm:$0xf0]  ;;  %v5782_v54 = vor.u32 %v7533_v38, %v5781_v36 }
  0x70   : > { %v5590_v42 = vor.u32 %v7485_v18, %v5589_v28  ;;  %v5709_v47 = vld [vmem:[#allocation5 + $0x540] sm:$0xf]  ;;  %v7515_v49 = vld [vmem:[#allocation5 + $0x544] sm:$0xf0]  ;;  %v299_v59 = vrot.slane %v8360_v43, 2  ;;  %v300_v60 = vrot.slane %v8365_v48, 4 }
  0x71   : > { %v5773_v50 = vld [vmem:[#allocation5 + $0x5c0] sm:$0xf]  ;;  %v7531_v51 = vld [vmem:[#allocation5 + $0x5c4] sm:$0xf0]  ;;  %v5573_v0 = vld [vmem:[#allocation5 + $0x430] sm:$0xf]  ;;  %v5710_v2 = vor.u32 %v7515_v49, %v5709_v47 }
  0x72   : > { %v7481_v1 = vld [vmem:[#allocation5 + $0x434] sm:$0xf0]  ;;  %v5774_v3 = vor.u32 %v7531_v51, %v5773_v50  ;;  %v5565_v28 = vld [vmem:[#allocation5 + $0x420] sm:$0xf]  ;;  %v7479_v18 = vld [vmem:[#allocation5 + $0x424] sm:$0xf0] }
  0x73   : > { %v7529_v19 = vld [vmem:[#allocation5 + $0x5b4] sm:$0xf0]  ;;  %v5629_v31 = vld [vmem:[#allocation5 + $0x4a0] sm:$0xf]  ;;  %v7495_v33 = vld [vmem:[#allocation5 + $0x4a4] sm:$0xf0]  ;;  %v5566_v49 = vor.u32 %v7479_v18, %v5565_v28 }
  0x74   : > { %v350_v62 = vld.sshfl [vmem:[#allocation1 + $0x10] sm:$0xff pattern:$0x73625140]  ;;  %v348_v63 = vld.sshfl [vmem:[#allocation1] sm:$0xff pattern:$0x73625140]  ;;  %v5630_v50 = vor.u32 %v7495_v33, %v5629_v31 }
  0x75   : > { %v8441_v5 = vpack.c.bf16 %v350_v62, %v350_v62  ;;  %v8443_v7 = vpack.c.bf16 %v348_v63, %v348_v63  ;;  %v351_v8 = vld.sshfl [vmem:[#allocation1 + $0x18] sm:$0xff pattern:$0x73625140]  ;;  %v349_v9 = vld.sshfl [vmem:[#allocation1 + $0x8] sm:$0xff pattern:$0x73625140]  ;;  %v5582_v62 = vor.u32 %v7483_v39, %v5581_v6  ;;  %v5646_v63 = vor.u32 %v7499_v41, %v5645_v40 }
  0x76   : > { %v8445_v12 = vpack.c.bf16 %v351_v8, %v351_v8  ;;  %v8447_v13 = vpack.c.bf16 %v349_v9, %v349_v9  ;;  %356 = vst [vmem:[#allocation1] ss:$4 sm:$0xff] %v284_v61  ;;  %v301_v61 = vrot.slane %v8365_v48, 6  ;;  %v5637_v8 = vld [vmem:[#allocation5 + $0x4b0] sm:$0xf]  ;;  %s4910_s30 = sshll.u32 %s235_s25, 4  ;;  %s4911_s30 = int_to_ptr.vmem [resolvable:$true] %s4910_s30 }
  0x77   : > { %3976 = vmatmul.bf16.vlgmr.msra.gmra.mxu2 %v8441_v5  ;;  %3950 = vmatmul.bf16.vlgmr.msra.gmra.mxu0 %v8443_v7  ;;  %358 = vst [vmem:[#allocation1 + $0x1] ss:$4 sm:$0xff] %v8439_v4  ;;  %v7497_v9 = vld [vmem:[#allocation5 + $0x4b4] sm:$0xf0]  ;;  %v5693_v34 = vld [vmem:[#allocation5 + $0x520] sm:$0xf] }
  0x78   : > { %3989 = vmatmul.bf16.vlgmr.msra.gmra.mxu3 %v8445_v12  ;;  %3963 = vmatmul.bf16.vlgmr.msra.gmra.mxu1 %v8447_v13  ;;  %v303_v23 = vsel %vm256_vm1, %v300_v60, %v301_v61  ;;  %v7511_v35 = vld [vmem:[#allocation5 + $0x524] sm:$0xf0]  ;;  %v5757_v36 = vld [vmem:[#allocation5 + $0x5a0] sm:$0xf]  ;;  %v5557_v39 = vld [vmem:[#allocation5 + $0x410] sm:$0xf] }
  0x79   : > { %4046 = vmatpush.bf16.msra.mxu0 %v5606_v10  ;;  %4059 = vmatpush.bf16.msra.mxu1 %v5670_v11  ;;  %v5701_v10 = vld [vmem:[#allocation5 + $0x530] sm:$0xf]  ;;  %v7527_v38 = vld [vmem:[#allocation5 + $0x5a4] sm:$0xf0]  ;;  %v7477_v40 = vld [vmem:[#allocation5 + $0x414] sm:$0xf0] }
  0x7a   : > { %4072 = vmatpush.bf16.msra.mxu2 %v5734_v16  ;;  %4085 = vmatpush.bf16.msra.mxu3 %v5798_v17  ;;  %v5765_v17 = vld [vmem:[#allocation5 + $0x5b0] sm:$0xf]  ;;  %v7569_v28 = vld [vmem:[#allocation5 + $0x6f4] sm:$0xf0]  ;;  %s4912_s4 = sshll.u32 %s4908_s18, 4  ;;  %s4895_s15 = scalar_lea.sflag [#allocation4], %s8319_s11  ;;  %s4913_s4 = int_to_ptr.hbm [resolvable:$true] %s4912_s4 }
  0x7b   : > { %v5621_v41 = vld [vmem:[#allocation5 + $0x490] sm:$0xf]  ;;  %v7585_v33 = vld [vmem:[#allocation5 + $0x774] sm:$0xf0]  ;;  %s8115_s5 = sshra.s32 %s4913_s4, 4  ;;  %s8121_s21 = scalar_lea.hbm %s8801_s3, 16  ;;  %s8116_s5 = int_to_ptr.hbm [resolvable:$true] %s8115_s5 }
  0x7c   : > { %v5989_v18 = vld [vmem:[#allocation5 + $0x770] sm:$0xf]  ;;  %s8117_s6 = scalar_lea.hbm %s8116_s5, 8  ;;  %p8122_p10 = scmp.lt.s32.totalorder %s8116_s5, %s8801_s3 }
  0x7d   : > { %4047 = vmatpush.bf16.msra.mxu0 %v5598_v24  ;;  %4060 = vmatpush.bf16.msra.mxu1 %v5662_v25  ;;  %v5574_v24 = vor.u32 %v7481_v1, %v5573_v0  ;;  %v5638_v25 = vor.u32 %v7497_v9, %v5637_v8  ;;  %v5558_v0 = vor.u32 %v7477_v40, %v5557_v39  ;;  %v7491_v8 = vld [vmem:[#allocation5 + $0x484] sm:$0xf0]  ;;  %v5853_v39 = vld [vmem:[#allocation5 + $0x660] sm:$0xf]  ;;  %p8118_p1 = scmp.ne.s32.totalorder %s8116_s5, %s8117_s6  ;;  %p8123_p12 = scmp.lt.s32.totalorder %s8121_s21, %s8117_s6 }
  0x7e   : > { %4073 = vmatpush.bf16.msra.mxu2 %v5726_v29  ;;  %4086 = vmatpush.bf16.msra.mxu3 %v5790_v15  ;;  %v361_v26 = vld.sshfl [vmem:[#allocation1 + $0x10] sm:$0xff pattern:$0x73625140]  ;;  %v359_v55 = vld.sshfl [vmem:[#allocation1] sm:$0xff pattern:$0x73625140]  ;;  %v5766_v15 = vor.u32 %v7529_v19, %v5765_v17  ;;  %v5990_v48 = vor.u32 %v7585_v33, %v5989_v18 }
  0x7f   : > { %v362_v57 = vld.sshfl [vmem:[#allocation1 + $0x18] sm:$0xff pattern:$0x73625140]  ;;  %v360_v58 = vld.sshfl [vmem:[#allocation1 + $0x8] sm:$0xff pattern:$0x73625140]  ;;  %v8459_v11 = vpack.c.bf16 %v361_v26, %v361_v26  ;;  %v8461_v16 = vpack.c.bf16 %v359_v55, %v359_v55  ;;  %p8119_p4 = pnand %p8118_p1, %p8298_p7  ;;  %p8124_p13 = por %p8123_p12, %p8122_p10 }
  0x80   : > { %367 = vst [vmem:[#allocation1] ss:$4 sm:$0xff] %v8362_v44  ;;  %v7513_v44 = vld [vmem:[#allocation5 + $0x534] sm:$0xf0]  ;;  %v8467_v21 = vpack.c.bf16 %v362_v57, %v362_v57  ;;  %v8469_v22 = vpack.c.bf16 %v360_v58, %v360_v58  ;;  %v5685_v55 = vld [vmem:[#allocation5 + $0x510] sm:$0xf] }
  0x81   : > { %4048 = vmatpush.bf16.msra.mxu0 %v5590_v42  ;;  %4061 = vmatpush.bf16.msra.mxu1 %v5654_v45  ;;  %369 = vst [vmem:[#allocation1 + $0x1] ss:$4 sm:$0xff] %v8369_v56  ;;  %v302_v56 = vsel %vm254_vm0, %v8360_v43, %v299_v59  ;;  %v5702_v29 = vor.u32 %v7513_v44, %v5701_v10  ;;  %v7493_v42 = vld [vmem:[#allocation5 + $0x494] sm:$0xf0]  ;;  %v5749_v58 = vld [vmem:[#allocation5 + $0x590] sm:$0xf]  ;;  %p8120_p8 = pneg %p8119_p4 }
  0x82   : > { %4074 = vmatpush.bf16.msra.mxu2 %v5718_v53  ;;  %4087 = vmatpush.bf16.msra.mxu3 %v5782_v54  ;;  %v8479_v6 = vsel %vm258_vm3, %v302_v56, %v303_v23  ;;  %v5694_v53 = vor.u32 %v7511_v35, %v5693_v34  ;;  %v5758_v54 = vor.u32 %v7527_v38, %v5757_v36  ;;  %v7509_v57 = vld [vmem:[#allocation5 + $0x514] sm:$0xf0]  ;;  %v5677_v44 = vld [vmem:[#allocation5 + $0x500] sm:$0xf]  ;;  %v7507_v17 = vld [vmem:[#allocation5 + $0x504] sm:$0xf0] }
  0x83   : > { %v5622_v1 = vor.u32 %v7493_v42, %v5621_v41  ;;  %v5686_v9 = vor.u32 %v7509_v57, %v5685_v55  ;;  %v5741_v19 = vld [vmem:[#allocation5 + $0x580] sm:$0xf]  ;;  %v5861_v56 = vld [vmem:[#allocation5 + $0x670] sm:$0xf]  ;;  %v7553_v23 = vld [vmem:[#allocation5 + $0x674] sm:$0xf0]  ;;  %v5678_v36 = vor.u32 %v7507_v17, %v5677_v44  ;;  %p8125_p0 = pnand %p8124_p13, %p8120_p8 }
  0x84   : > { %v6053_v34 = vld [vmem:[#allocation5 + $0x7f0] sm:$0xf]  ;;  %v7601_v35 = vld [vmem:[#allocation5 + $0x7f4] sm:$0xf0]  ;;  %v7551_v40 = vld [vmem:[#allocation5 + $0x664] sm:$0xf0] }
  0x85   : > { %4049 = vmatpush.bf16.msra.mxu0 %v5582_v62  ;;  %4062 = vmatpush.bf16.msra.mxu1 %v5646_v63  ;;  %v7525_v62 = vld [vmem:[#allocation5 + $0x594] sm:$0xf0]  ;;  %v5549_v63 = vld [vmem:[#allocation5 + $0x400] sm:$0xf]  ;;  %v6054_v42 = vor.u32 %v7601_v35, %v6053_v34  ;;  %v7599_v57 = vld [vmem:[#allocation5 + $0x7e4] sm:$0xf0] }
  0x86   : > { %4075 = vmatpush.bf16.msra.mxu2 %v5710_v2  ;;  %4088 = vmatpush.bf16.msra.mxu3 %v5774_v3  ;;  %v7475_v2 = vld [vmem:[#allocation5 + $0x404] sm:$0xf0]  ;;  %v5613_v3 = vld [vmem:[#allocation5 + $0x480] sm:$0xf]  ;;  %v5750_v10 = vor.u32 %v7525_v62, %v5749_v58  ;;  %v6037_v44 = vld [vmem:[#allocation5 + $0x7d0] sm:$0xf] }
  0x87   : > { %4028 = vmatmul.bf16.vlgmr.msrb.gmra.mxu2 %v8459_v11  ;;  %4002 = vmatmul.bf16.vlgmr.msrb.gmra.mxu0 %v8461_v16  ;;  %v5614_v31 = vor.u32 %v7491_v8, %v5613_v3  ;;  %v6045_v55 = vld [vmem:[#allocation5 + $0x7e0] sm:$0xf]  ;;  %v7597_v17 = vld [vmem:[#allocation5 + $0x7d4] sm:$0xf0]  ;;  %v7579_v18 = vld [vmem:[#allocation5 + $0x744] sm:$0xf0] }
  0x88   : > { %4041 = vmatmul.bf16.vlgmr.msrb.gmra.mxu3 %v8467_v21  ;;  %4015 = vmatmul.bf16.vlgmr.msrb.gmra.mxu1 %v8469_v22  ;;  %v8483_v45 = vld.sshfl [vmem:[#allocation1] sm:$0xff pattern:$0x73625140]  ;;  %v8485_v47 = vld.sshfl [vmem:[#allocation1 + $0x10] sm:$0xff pattern:$0x73625140]  ;;  %v6046_v8 = vor.u32 %v7599_v57, %v6045_v55  ;;  %v6038_v34 = vor.u32 %v7597_v17, %v6037_v44 }
  0x89   : > { %4050 = vmatpush.bf16.msra.mxu0 %v5574_v24  ;;  %4063 = vmatpush.bf16.msra.mxu1 %v5638_v25  ;;  %v8487_v51 = vld.sshfl [vmem:[#allocation1 + $0x8] sm:$0xff pattern:$0x73625140]  ;;  %v8489_v26 = vld.sshfl [vmem:[#allocation1 + $0x18] sm:$0xff pattern:$0x73625140]  ;;  %v305_v24 = vsel %vm263_vm2, %v8360_v43, %v299_v59  ;;  %v5862_v59 = vor.u32 %v7553_v23, %v5861_v56 }
  0x8a   : > { %4076 = vmatpush.bf16.msra.mxu2 %v5702_v29  ;;  %4089 = vmatpush.bf16.msra.mxu3 %v5766_v15  ;;  %378 = vst [vmem:[#allocation1] ss:$4 sm:$0xff] %v8401_v30  ;;  %v7523_v30 = vld [vmem:[#allocation5 + $0x584] sm:$0xf0]  ;;  %v5925_v25 = vld [vmem:[#allocation5 + $0x6f0] sm:$0xf]  ;;  %v306_v29 = vsel %vm265_vm4, %v301_v61, %v300_v60  ;;  %v5550_v15 = vor.u32 %v7475_v2, %v5549_v63 }
  0x8b   : > { %380 = vst [vmem:[#allocation1 + $0x1] ss:$4 sm:$0xff] %v8479_v6  ;;  %v5742_v43 = vor.u32 %v7523_v30, %v5741_v19  ;;  %v5926_v38 = vor.u32 %v7569_v28, %v5925_v25  ;;  %v307_v41 = vsel %vm267_vm7, %v305_v24, %v306_v29  ;;  %v5917_v60 = vld [vmem:[#allocation5 + $0x6e0] sm:$0xf]  ;;  %v7567_v61 = vld [vmem:[#allocation5 + $0x6e4] sm:$0xf0]  ;;  %v8513_v58 = vpack.c.bf16 %v8487_v51, %v8487_v51 }
  0x8c   : > { %v8517_v62 = vpack.c.bf16 %v8489_v26, %v8489_v26  ;;  %v5032_v63 = vrot.slane %v307_v41, 9  ;;  %v7549_v2 = vld [vmem:[#allocation5 + $0x654] sm:$0xf0]  ;;  %v5837_v19 = vld [vmem:[#allocation5 + $0x640] sm:$0xf] }
  0x8d   : > { %4051 = vmatpush.bf16.msra.mxu0 %v5566_v49  ;;  %4064 = vmatpush.bf16.msra.mxu1 %v5630_v50  ;;  %v5981_v49 = vld [vmem:[#allocation5 + $0x760] sm:$0xf]  ;;  %v8505_v50 = vpack.c.bf16 %v8483_v45, %v8483_v45  ;;  %v5031_v45 = vrot.slane %v8479_v6, 9  ;;  %v7565_v51 = vld [vmem:[#allocation5 + $0x6d4] sm:$0xf0] }
  0x8e   : > { %4077 = vmatpush.bf16.msra.mxu2 %v5694_v53  ;;  %4090 = vmatpush.bf16.msra.mxu3 %v5758_v54  ;;  %v8509_v53 = vpack.c.bf16 %v8485_v47, %v8485_v47  ;;  %v7583_v54 = vld [vmem:[#allocation5 + $0x764] sm:$0xf0]  ;;  %v5854_v47 = vor.u32 %v7551_v40, %v5853_v39  ;;  %v7581_v26 = vld [vmem:[#allocation5 + $0x754] sm:$0xf0]  ;;  %v5901_v56 = vld [vmem:[#allocation5 + $0x6c0] sm:$0xf] }
  0x8f   : > { %v5982_v3 = vor.u32 %v7583_v54, %v5981_v49  ;;  %v7547_v30 = vld [vmem:[#allocation5 + $0x644] sm:$0xf0]  ;;  %v5965_v28 = vld [vmem:[#allocation5 + $0x740] sm:$0xf]  ;;  %v5829_v39 = vld [vmem:[#allocation5 + $0x630] sm:$0xf] }
  0x90   : > { %v7563_v23 = vld [vmem:[#allocation5 + $0x6c4] sm:$0xf0]  ;;  %v6029_v29 = vld [vmem:[#allocation5 + $0x7c0] sm:$0xf]  ;;  %v7545_v40 = vld [vmem:[#allocation5 + $0x634] sm:$0xf0]  ;;  %v5966_v41 = vor.u32 %v7579_v18, %v5965_v28 }
  0x91   : > { %4052 = vmatpush.bf16.msra.mxu0 %v5558_v0  ;;  %4065 = vmatpush.bf16.msra.mxu1 %v5622_v1  ;;  %v5918_v0 = vor.u32 %v7567_v61, %v5917_v60  ;;  %v5845_v1 = vld [vmem:[#allocation5 + $0x650] sm:$0xf]  ;;  %v5902_v46 = vor.u32 %v7563_v23, %v5901_v56  ;;  %v7561_v60 = vld [vmem:[#allocation5 + $0x6b4] sm:$0xf0] }
  0x92   : > { %4078 = vmatpush.bf16.msra.mxu2 %v5686_v9  ;;  %4091 = vmatpush.bf16.msra.mxu3 %v5750_v10  ;;  %v5909_v9 = vld [vmem:[#allocation5 + $0x6d0] sm:$0xf]  ;;  %v5846_v24 = vor.u32 %v7549_v2, %v5845_v1  ;;  %v8528_v35 = vld.sshfl [vmem:[#allocation1] sm:$0xff pattern:$0x73625140] }
  0x93   : > { %v5973_v10 = vld [vmem:[#allocation5 + $0x750] sm:$0xf]  ;;  %v5910_v25 = vor.u32 %v7565_v51, %v5909_v9  ;;  %v7577_v49 = vld [vmem:[#allocation5 + $0x734] sm:$0xf0]  ;;  %v5885_v1 = vld [vmem:[#allocation5 + $0x6a0] sm:$0xf] }
  0x94   : > { %v5974_v33 = vor.u32 %v7581_v26, %v5973_v10  ;;  %v5957_v61 = vld [vmem:[#allocation5 + $0x730] sm:$0xf]  ;;  %v7593_v55 = vld [vmem:[#allocation5 + $0x7b4] sm:$0xf0]  ;;  %v7559_v2 = vld [vmem:[#allocation5 + $0x6a4] sm:$0xf0] }
  0x95   : > { %4053 = vmatpush.bf16.msra.mxu0 %v5550_v15  ;;  %4066 = vmatpush.bf16.msra.mxu1 %v5614_v31  ;;  %v7595_v15 = vld [vmem:[#allocation5 + $0x7c4] sm:$0xf0]  ;;  %v8526_v31 = vsel %vm8426_vm12, %v5031_v45, %v5032_v63  ;;  %v6021_v54 = vld [vmem:[#allocation5 + $0x7b0] sm:$0xf]  ;;  %v5821_v45 = vld [vmem:[#allocation5 + $0x620] sm:$0xf]  ;;  %v5886_v26 = vor.u32 %v7559_v2, %v5885_v1 }
  0x96   : > { %4079 = vmatpush.bf16.msra.mxu2 %v5678_v36  ;;  %4092 = vmatpush.bf16.msra.mxu3 %v5742_v43  ;;  %v8530_v36 = vld.sshfl [vmem:[#allocation1 + $0x10] sm:$0xff pattern:$0x73625140]  ;;  %v8532_v43 = vld.sshfl [vmem:[#allocation1 + $0x8] sm:$0xff pattern:$0x73625140] }
  0x97   : > { %v7543_v63 = vld [vmem:[#allocation5 + $0x624] sm:$0xf0]  ;;  %v6013_v9 = vld [vmem:[#allocation5 + $0x7a0] sm:$0xf]  ;;  %v5813_v44 = vld [vmem:[#allocation5 + $0x610] sm:$0xf] }
  0x98   : > { %4054 = vmatmul.bf16.vlgmr.msra.gmra.mxu0 %v8505_v50  ;;  %4067 = vmatmul.bf16.vlgmr.msra.gmra.mxu1 %v8513_v58  ;;  %v7591_v51 = vld [vmem:[#allocation5 + $0x7a4] sm:$0xf0]  ;;  %v5822_v10 = vor.u32 %v7543_v63, %v5821_v45  ;;  %v7541_v17 = vld [vmem:[#allocation5 + $0x614] sm:$0xf0]  ;;  %v5877_v56 = vld [vmem:[#allocation5 + $0x690] sm:$0xf] }
  0x99   : > { %4098 = vmatpush.bf16.msrb.mxu0 %v5862_v59  ;;  %4111 = vmatpush.bf16.msrb.mxu1 %v5926_v38  ;;  %v8534_v59 = vld.sshfl [vmem:[#allocation1 + $0x18] sm:$0xff pattern:$0x73625140]  ;;  %v5838_v38 = vor.u32 %v7547_v30, %v5837_v19  ;;  %v6014_v30 = vor.u32 %v7591_v51, %v6013_v9  ;;  %v7557_v23 = vld [vmem:[#allocation5 + $0x694] sm:$0xf0] }
  0x9a   : > { %4124 = vmatpush.bf16.msrb.mxu2 %v5990_v48  ;;  %4137 = vmatpush.bf16.msrb.mxu3 %v6054_v42  ;;  %389 = vst [vmem:[#allocation1] ss:$4 sm:$0xff] %v8439_v4  ;;  %v6030_v48 = vor.u32 %v7595_v15, %v6029_v29  ;;  %v5893_v42 = vld [vmem:[#allocation5 + $0x6b0] sm:$0xf]  ;;  %v5830_v4 = vor.u32 %v7545_v40, %v5829_v39  ;;  %v7589_v18 = vld [vmem:[#allocation5 + $0x794] sm:$0xf0] }
  0x9b   : > { %4080 = vmatmul.bf16.vlgmr.msra.gmra.mxu2 %v8509_v53  ;;  %4093 = vmatmul.bf16.vlgmr.msra.gmra.mxu3 %v8517_v62  ;;  %391 = vst [vmem:[#allocation1 + $0x1] ss:$4 sm:$0xff] %v8526_v31  ;;  %v5894_v57 = vor.u32 %v7561_v60, %v5893_v42  ;;  %v6005_v28 = vld [vmem:[#allocation5 + $0x790] sm:$0xf]  ;;  %v5805_v29 = vld [vmem:[#allocation5 + $0x600] sm:$0xf]  ;;  %v5814_v15 = vor.u32 %v7541_v17, %v5813_v44 }
  0x9c   : > { %v6006_v40 = vor.u32 %v7589_v18, %v6005_v28  ;;  %v5997_v42 = vld [vmem:[#allocation5 + $0x780] sm:$0xf]  ;;  %v7587_v60 = vld [vmem:[#allocation5 + $0x784] sm:$0xf0]  ;;  %v7649_v63 = vld [vmem:[#allocation5 + $0x974] sm:$0xf0]  ;;  %v8548_v28 = vpack.c.bf16 %v8532_v43, %v8532_v43  ;;  %v8552_v18 = vpack.c.bf16 %v8534_v59, %v8534_v59 }
  0x9d   : > { %4099 = vmatpush.bf16.msrb.mxu0 %v5854_v47  ;;  %4112 = vmatpush.bf16.msrb.mxu1 %v5918_v0  ;;  %v5958_v47 = vor.u32 %v7577_v49, %v5957_v61  ;;  %v6022_v0 = vor.u32 %v7593_v55, %v6021_v54  ;;  %v6117_v61 = vld [vmem:[#allocation5 + $0x870] sm:$0xf]  ;;  %v7617_v49 = vld [vmem:[#allocation5 + $0x874] sm:$0xf0]  ;;  %v5998_v2 = vor.u32 %v7587_v60, %v5997_v42  ;;  %v6109_v9 = vld [vmem:[#allocation5 + $0x860] sm:$0xf] }
  0x9e   : > { %4125 = vmatpush.bf16.msrb.mxu2 %v5982_v3  ;;  %4138 = vmatpush.bf16.msrb.mxu3 %v6046_v8  ;;  %v5949_v3 = vld [vmem:[#allocation5 + $0x720] sm:$0xf]  ;;  %v7575_v8 = vld [vmem:[#allocation5 + $0x724] sm:$0xf0]  ;;  %v6181_v54 = vld [vmem:[#allocation5 + $0x8f0] sm:$0xf] }
  0x9f   : > { %v5950_v19 = vor.u32 %v7575_v8, %v5949_v3  ;;  %v7633_v55 = vld [vmem:[#allocation5 + $0x8f4] sm:$0xf0]  ;;  %v6118_v3 = vor.u32 %v7617_v49, %v6117_v61  ;;  %v7615_v51 = vld [vmem:[#allocation5 + $0x864] sm:$0xf0]  ;;  %v6173_v44 = vld [vmem:[#allocation5 + $0x8e0] sm:$0xf] }
  0xa0   : > { %v6182_v8 = vor.u32 %v7633_v55, %v6181_v54  ;;  %v7631_v17 = vld [vmem:[#allocation5 + $0x8e4] sm:$0xf0]  ;;  %v6093_v54 = vld [vmem:[#allocation5 + $0x840] sm:$0xf] }
  0xa1   : > { %4100 = vmatpush.bf16.msrb.mxu0 %v5846_v24  ;;  %4113 = vmatpush.bf16.msrb.mxu1 %v5910_v25  ;;  %v5941_v24 = vld [vmem:[#allocation5 + $0x710] sm:$0xf]  ;;  %v7573_v25 = vld [vmem:[#allocation5 + $0x714] sm:$0xf0]  ;;  %v7611_v55 = vld [vmem:[#allocation5 + $0x844] sm:$0xf0] }
  0xa2   : > { %4126 = vmatpush.bf16.msrb.mxu2 %v5974_v33  ;;  %4139 = vmatpush.bf16.msrb.mxu3 %v6038_v34  ;;  %v5878_v33 = vor.u32 %v7557_v23, %v5877_v56  ;;  %v7539_v34 = vld [vmem:[#allocation5 + $0x604] sm:$0xf0]  ;;  %v5942_v39 = vor.u32 %v7573_v25, %v5941_v24  ;;  %v8544_v56 = vpack.c.bf16 %v8530_v36, %v8530_v36  ;;  %v6301_v24 = vld [vmem:[#allocation5 + $0x9e0] sm:$0xf] }
  0xa3   : > { %v7647_v23 = vld [vmem:[#allocation5 + $0x964] sm:$0xf0]  ;;  %v6110_v36 = vor.u32 %v7615_v51, %v6109_v9  ;;  %v8560_v42 = vld.sshfl [vmem:[#allocation1 + $0x8] sm:$0xff pattern:$0x73625140] }
  0xa4   : > { %v7663_v25 = vld [vmem:[#allocation5 + $0x9e4] sm:$0xf0]  ;;  %v8562_v60 = vld.sshfl [vmem:[#allocation1 + $0x18] sm:$0xff pattern:$0x73625140] }
  0xa5   : > { %4101 = vmatpush.bf16.msrb.mxu0 %v5838_v38  ;;  %4114 = vmatpush.bf16.msrb.mxu1 %v5902_v46  ;;  %v5869_v38 = vld [vmem:[#allocation5 + $0x680] sm:$0xf]  ;;  %v7555_v46 = vld [vmem:[#allocation5 + $0x684] sm:$0xf0]  ;;  %v7609_v9 = vld [vmem:[#allocation5 + $0x834] sm:$0xf0] }
  0xa6   : > { %4127 = vmatpush.bf16.msrb.mxu2 %v5966_v41  ;;  %4140 = vmatpush.bf16.msrb.mxu3 %v6030_v48  ;;  %v5933_v41 = vld [vmem:[#allocation5 + $0x700] sm:$0xf]  ;;  %v7571_v48 = vld [vmem:[#allocation5 + $0x704] sm:$0xf0]  ;;  %v5870_v45 = vor.u32 %v7555_v46, %v5869_v38  ;;  %v6229_v38 = vld [vmem:[#allocation5 + $0x950] sm:$0xf] }
  0xa7   : > { %v5934_v1 = vor.u32 %v7571_v48, %v5933_v41  ;;  %v7645_v46 = vld [vmem:[#allocation5 + $0x954] sm:$0xf0]  ;;  %v6302_v41 = vor.u32 %v7663_v25, %v6301_v24  ;;  %v8556_v59 = vld.sshfl [vmem:[#allocation1 + $0x10] sm:$0xff pattern:$0x73625140] }
  0xa8   : > { %v8554_v48 = vld.sshfl [vmem:[#allocation1] sm:$0xff pattern:$0x73625140] }
  0xa9   : > { %4102 = vmatpush.bf16.msrb.mxu0 %v5830_v4  ;;  %4115 = vmatpush.bf16.msrb.mxu1 %v5894_v57  ;;  %v6245_v4 = vld [vmem:[#allocation5 + $0x970] sm:$0xf]  ;;  %v5806_v57 = vor.u32 %v7539_v34, %v5805_v29  ;;  %v6174_v34 = vor.u32 %v7631_v17, %v6173_v44  ;;  %400 = vst [vmem:[#allocation1] ss:$4 sm:$0xff] %v8388_v20  ;;  %v7641_v17 = vld [vmem:[#allocation5 + $0x934] sm:$0xf0] }
  0xaa   : > { %4128 = vmatpush.bf16.msrb.mxu2 %v5958_v47  ;;  %4141 = vmatpush.bf16.msrb.mxu3 %v6022_v0  ;;  %v6309_v47 = vld [vmem:[#allocation5 + $0x9f0] sm:$0xf]  ;;  %v7665_v0 = vld [vmem:[#allocation5 + $0x9f4] sm:$0xf0]  ;;  %402 = vst [vmem:[#allocation1 + $0x1] ss:$4 sm:$0xff] %v8393_v27  ;;  %v6094_v20 = vor.u32 %v7611_v55, %v6093_v54 }
  0xab   : > { %v6101_v29 = vld [vmem:[#allocation5 + $0x850] sm:$0xf] }
  0xac   : > { %v6213_v44 = vld [vmem:[#allocation5 + $0x930] sm:$0xf] }
  0xad   : > { %4103 = vmatpush.bf16.msrb.mxu0 %v5822_v10  ;;  %4116 = vmatpush.bf16.msrb.mxu1 %v5886_v26  ;;  %v6246_v10 = vor.u32 %v7649_v63, %v6245_v4  ;;  %v6310_v26 = vor.u32 %v7665_v0, %v6309_v47  ;;  %v6230_v4 = vor.u32 %v7645_v46, %v6229_v38  ;;  %v7627_v63 = vld [vmem:[#allocation5 + $0x8c4] sm:$0xf0]  ;;  %v6221_v47 = vld [vmem:[#allocation5 + $0x940] sm:$0xf] }
  0xae   : > { %4129 = vmatpush.bf16.msrb.mxu2 %v5950_v19  ;;  %4142 = vmatpush.bf16.msrb.mxu3 %v6014_v30  ;;  %v6237_v19 = vld [vmem:[#allocation5 + $0x960] sm:$0xf]  ;;  %v8540_v30 = vpack.c.bf16 %v8528_v35, %v8528_v35  ;;  %v7613_v35 = vld [vmem:[#allocation5 + $0x854] sm:$0xf0]  ;;  %v7643_v0 = vld [vmem:[#allocation5 + $0x944] sm:$0xf0] }
  0xaf   : > { %v6238_v43 = vor.u32 %v7647_v23, %v6237_v19  ;;  %v6102_v61 = vor.u32 %v7613_v35, %v6101_v29  ;;  %v6222_v51 = vor.u32 %v7643_v0, %v6221_v47  ;;  %v6277_v19 = vld [vmem:[#allocation5 + $0x9b0] sm:$0xf]  ;;  %v7657_v23 = vld [vmem:[#allocation5 + $0x9b4] sm:$0xf0]  ;;  %v6077_v29 = vld [vmem:[#allocation5 + $0x820] sm:$0xf] }
  0xb0   : > { %v7607_v35 = vld [vmem:[#allocation5 + $0x824] sm:$0xf0]  ;;  %v6205_v38 = vld [vmem:[#allocation5 + $0x920] sm:$0xf]  ;;  %v6261_v47 = vld [vmem:[#allocation5 + $0x990] sm:$0xf] }
  0xb1   : > { %4104 = vmatpush.bf16.msrb.mxu0 %v5814_v15  ;;  %4117 = vmatpush.bf16.msrb.mxu1 %v5878_v33  ;;  %v6165_v15 = vld [vmem:[#allocation5 + $0x8d0] sm:$0xf]  ;;  %v7629_v33 = vld [vmem:[#allocation5 + $0x8d4] sm:$0xf0]  ;;  %v7639_v46 = vld [vmem:[#allocation5 + $0x924] sm:$0xf0] }
  0xb2   : > { %4130 = vmatpush.bf16.msrb.mxu2 %v5942_v39  ;;  %4143 = vmatpush.bf16.msrb.mxu3 %v6006_v40  ;;  %v6293_v39 = vld [vmem:[#allocation5 + $0x9d0] sm:$0xf]  ;;  %v7661_v40 = vld [vmem:[#allocation5 + $0x9d4] sm:$0xf0]  ;;  %v6166_v49 = vor.u32 %v7629_v33, %v6165_v15  ;;  %v6214_v15 = vor.u32 %v7641_v17, %v6213_v44  ;;  %v6278_v33 = vor.u32 %v7657_v23, %v6277_v19  ;;  %v6253_v44 = vld [vmem:[#allocation5 + $0x980] sm:$0xf] }
  0xb3   : > { %v6206_v54 = vor.u32 %v7639_v46, %v6205_v38  ;;  %v7653_v0 = vld [vmem:[#allocation5 + $0x994] sm:$0xf0]  ;;  %v7651_v17 = vld [vmem:[#allocation5 + $0x984] sm:$0xf0]  ;;  %v6373_v19 = vld [vmem:[#allocation5 + $0xa70] sm:$0xf] }
  0xb4   : > { %v7681_v23 = vld [vmem:[#allocation5 + $0xa74] sm:$0xf0]  ;;  %v6254_v46 = vor.u32 %v7651_v17, %v6253_v44  ;;  %v8588_v17 = vld.sshfl [vmem:[#allocation1 + $0x10] sm:$0xff pattern:$0x73625140] }
  0xb5   : > { %4105 = vmatpush.bf16.msrb.mxu0 %v5806_v57  ;;  %4118 = vmatpush.bf16.msrb.mxu1 %v5870_v45  ;;  %v6294_v57 = vor.u32 %v7661_v40, %v6293_v39  ;;  %v6157_v45 = vld [vmem:[#allocation5 + $0x8c0] sm:$0xf]  ;;  %v7655_v40 = vld [vmem:[#allocation5 + $0x9a4] sm:$0xf0]  ;;  %v7725_v44 = vld [vmem:[#allocation5 + $0xbd4] sm:$0xf0] }
  0xb6   : > { %4131 = vmatpush.bf16.msrb.mxu2 %v5934_v1  ;;  %4144 = vmatpush.bf16.msrb.mxu3 %v5998_v2  ;;  %v6285_v1 = vld [vmem:[#allocation5 + $0x9c0] sm:$0xf]  ;;  %v7659_v2 = vld [vmem:[#allocation5 + $0x9c4] sm:$0xf0] }
  0xb7   : > { %v6286_v27 = vor.u32 %v7659_v2, %v6285_v1  ;;  %v6269_v39 = vld [vmem:[#allocation5 + $0x9a0] sm:$0xf] }
  0xb8   : > { %4106 = vmatmul.bf16.vlgmr.msrb.gmra.mxu0 %v8540_v30  ;;  %4119 = vmatmul.bf16.vlgmr.msrb.gmra.mxu1 %v8548_v28  ;;  %v6270_v55 = vor.u32 %v7655_v40, %v6269_v39  ;;  %v6061_v1 = vld [vmem:[#allocation5 + $0x800] sm:$0xf]  ;;  %v6374_v39 = vor.u32 %v7681_v23, %v6373_v19 }
  0xb9   : > { %4150 = vmatpush.bf16.msra.mxu0 %v6118_v3  ;;  %4163 = vmatpush.bf16.msra.mxu1 %v6182_v8  ;;  %v6158_v3 = vor.u32 %v7627_v63, %v6157_v45  ;;  %v6085_v8 = vld [vmem:[#allocation5 + $0x830] sm:$0xf]  ;;  %v7637_v63 = vld [vmem:[#allocation5 + $0x914] sm:$0xf0]  ;;  %v6349_v19 = vld [vmem:[#allocation5 + $0xa40] sm:$0xf] }
  0xba   : > { %4176 = vmatpush.bf16.msra.mxu2 %v6246_v10  ;;  %4189 = vmatpush.bf16.msra.mxu3 %v6310_v26  ;;  %v6149_v10 = vld [vmem:[#allocation5 + $0x8b0] sm:$0xf]  ;;  %v7625_v26 = vld [vmem:[#allocation5 + $0x8b4] sm:$0xf0]  ;;  %v6086_v24 = vor.u32 %v7609_v9, %v6085_v8  ;;  %v6125_v8 = vld [vmem:[#allocation5 + $0x880] sm:$0xf] }
  0xbb   : > { %4132 = vmatmul.bf16.vlgmr.msrb.gmra.mxu2 %v8544_v56  ;;  %4145 = vmatmul.bf16.vlgmr.msrb.gmra.mxu3 %v8552_v18  ;;  %v6150_v25 = vor.u32 %v7625_v26, %v6149_v10  ;;  %v6197_v45 = vld [vmem:[#allocation5 + $0x910] sm:$0xf]  ;;  %v7619_v9 = vld [vmem:[#allocation5 + $0x884] sm:$0xf0]  ;;  %v6189_v10 = vld [vmem:[#allocation5 + $0x900] sm:$0xf] }
  0xbc   : > { %v7635_v26 = vld [vmem:[#allocation5 + $0x904] sm:$0xf0]  ;;  %v8592_v23 = vld.sshfl [vmem:[#allocation1 + $0x8] sm:$0xff pattern:$0x73625140] }
  0xbd   : > { %4151 = vmatpush.bf16.msra.mxu0 %v6110_v36  ;;  %4164 = vmatpush.bf16.msra.mxu1 %v6174_v34  ;;  %v6141_v36 = vld [vmem:[#allocation5 + $0x8a0] sm:$0xf]  ;;  %v7623_v34 = vld [vmem:[#allocation5 + $0x8a4] sm:$0xf0]  ;;  %v6190_v38 = vor.u32 %v7635_v26, %v6189_v10  ;;  %v7709_v26 = vld [vmem:[#allocation5 + $0xb54] sm:$0xf0] }
  0xbe   : > { %4177 = vmatpush.bf16.msra.mxu2 %v6238_v43  ;;  %4190 = vmatpush.bf16.msra.mxu3 %v6302_v41  ;;  %v6078_v43 = vor.u32 %v7607_v35, %v6077_v29  ;;  %v6142_v41 = vor.u32 %v7623_v34, %v6141_v36  ;;  %v6501_v29 = vld [vmem:[#allocation5 + $0xb70] sm:$0xf]  ;;  %v7729_v34 = vld [vmem:[#allocation5 + $0xbf4] sm:$0xf0] }
  0xbf   : > { %v6565_v36 = vld [vmem:[#allocation5 + $0xbf0] sm:$0xf] }
  0xc1   : > { %4152 = vmatpush.bf16.msra.mxu0 %v6102_v61  ;;  %4165 = vmatpush.bf16.msra.mxu1 %v6166_v49  ;;  %v6069_v61 = vld [vmem:[#allocation5 + $0x810] sm:$0xf]  ;;  %v7605_v49 = vld [vmem:[#allocation5 + $0x814] sm:$0xf0] }
  0xc2   : > { %4178 = vmatpush.bf16.msra.mxu2 %v6230_v4  ;;  %4191 = vmatpush.bf16.msra.mxu3 %v6294_v57  ;;  %v6133_v4 = vld [vmem:[#allocation5 + $0x890] sm:$0xf]  ;;  %v7621_v57 = vld [vmem:[#allocation5 + $0x894] sm:$0xf0]  ;;  %v6070_v2 = vor.u32 %v7605_v49, %v6069_v61  ;;  %v6566_v49 = vor.u32 %v7729_v34, %v6565_v36  ;;  %v7691_v34 = vld [vmem:[#allocation5 + $0xac4] sm:$0xf0] }
  0xc5   : > { %4153 = vmatpush.bf16.msra.mxu0 %v6094_v20  ;;  %4166 = vmatpush.bf16.msra.mxu1 %v6158_v3  ;;  %v6134_v20 = vor.u32 %v7621_v57, %v6133_v4  ;;  %v7603_v3 = vld [vmem:[#allocation5 + $0x804] sm:$0xf0]  ;;  %v6493_v4 = vld [vmem:[#allocation5 + $0xb60] sm:$0xf]  ;;  %v8570_v57 = vpack.c.bf16 %v8554_v48, %v8554_v48  ;;  %v7677_v48 = vld [vmem:[#allocation5 + $0xa54] sm:$0xf0] }
  0xc6   : > { %4179 = vmatpush.bf16.msra.mxu2 %v6222_v51  ;;  %4192 = vmatpush.bf16.msra.mxu3 %v6286_v27  ;;  %v6198_v51 = vor.u32 %v7637_v63, %v6197_v45  ;;  %v6262_v27 = vor.u32 %v7653_v0, %v6261_v47  ;;  %v6062_v35 = vor.u32 %v7603_v3, %v6061_v1  ;;  %v7711_v63 = vld [vmem:[#allocation5 + $0xb64] sm:$0xf0]  ;;  %v6557_v47 = vld [vmem:[#allocation5 + $0xbe0] sm:$0xf] }
  0xc7   : > { %v8574_v45 = vpack.c.bf16 %v8556_v59, %v8556_v59  ;;  %v7727_v0 = vld [vmem:[#allocation5 + $0xbe4] sm:$0xf0]  ;;  %v8578_v1 = vpack.c.bf16 %v8560_v42, %v8560_v42  ;;  %v6549_v42 = vld [vmem:[#allocation5 + $0xbd0] sm:$0xf] }
  0xc8   : > { %v6558_v10 = vor.u32 %v7727_v0, %v6557_v47  ;;  %v6550_v36 = vor.u32 %v7725_v44, %v6549_v42  ;;  %v7705_v47 = vld [vmem:[#allocation5 + $0xb34] sm:$0xf0]  ;;  %v6533_v0 = vld [vmem:[#allocation5 + $0xbb0] sm:$0xf]  ;;  %v6525_v42 = vld [vmem:[#allocation5 + $0xba0] sm:$0xf] }
  0xc9   : > { %4154 = vmatpush.bf16.msra.mxu0 %v6086_v24  ;;  %4167 = vmatpush.bf16.msra.mxu1 %v6150_v25  ;;  %v6437_v24 = vld [vmem:[#allocation5 + $0xaf0] sm:$0xf]  ;;  %v7697_v25 = vld [vmem:[#allocation5 + $0xaf4] sm:$0xf0]  ;;  %v7719_v44 = vld [vmem:[#allocation5 + $0xba4] sm:$0xf0] }
  0xca   : > { %4180 = vmatpush.bf16.msra.mxu2 %v6214_v15  ;;  %4193 = vmatpush.bf16.msra.mxu3 %v6278_v33  ;;  %v6126_v15 = vor.u32 %v7619_v9, %v6125_v8  ;;  %v7713_v33 = vld [vmem:[#allocation5 + $0xb74] sm:$0xf0]  ;;  %v6438_v40 = vor.u32 %v7697_v25, %v6437_v24  ;;  %v6421_v8 = vld [vmem:[#allocation5 + $0xad0] sm:$0xf] }
  0xcb   : > { %v6502_v61 = vor.u32 %v7713_v33, %v6501_v29  ;;  %v7693_v9 = vld [vmem:[#allocation5 + $0xad4] sm:$0xf0]  ;;  %v8594_v24 = vld.sshfl [vmem:[#allocation1 + $0x18] sm:$0xff pattern:$0x73625140] }
  0xcc   : > { %v6422_v29 = vor.u32 %v7693_v9, %v6421_v8 }
  0xcd   : > { %4155 = vmatpush.bf16.msra.mxu0 %v6078_v43  ;;  %4168 = vmatpush.bf16.msra.mxu1 %v6142_v41  ;;  %v6365_v43 = vld [vmem:[#allocation5 + $0xa60] sm:$0xf]  ;;  %v7679_v41 = vld [vmem:[#allocation5 + $0xa64] sm:$0xf0] }
  0xce   : > { %4181 = vmatpush.bf16.msra.mxu2 %v6206_v54  ;;  %4194 = vmatpush.bf16.msra.mxu3 %v6270_v55  ;;  %v6429_v54 = vld [vmem:[#allocation5 + $0xae0] sm:$0xf]  ;;  %v7695_v55 = vld [vmem:[#allocation5 + $0xae4] sm:$0xf0]  ;;  %v6366_v3 = vor.u32 %v7679_v41, %v6365_v43 }
  0xcf   : > { %v6430_v59 = vor.u32 %v7695_v55, %v6429_v54  ;;  %v6405_v55 = vld [vmem:[#allocation5 + $0xab0] sm:$0xf] }
  0xd1   : > { %4156 = vmatpush.bf16.msra.mxu0 %v6070_v2  ;;  %4169 = vmatpush.bf16.msra.mxu1 %v6134_v20  ;;  %v8582_v2 = vpack.c.bf16 %v8562_v60, %v8562_v60  ;;  %v6357_v20 = vld [vmem:[#allocation5 + $0xa50] sm:$0xf]  ;;  %v8586_v60 = vld.sshfl [vmem:[#allocation1] sm:$0xff pattern:$0x73625140] }
  0xd2   : > { %4182 = vmatpush.bf16.msra.mxu2 %v6198_v51  ;;  %4195 = vmatpush.bf16.msra.mxu3 %v6262_v27  ;;  %v6485_v51 = vld [vmem:[#allocation5 + $0xb50] sm:$0xf]  ;;  %v6494_v27 = vor.u32 %v7711_v63, %v6493_v4  ;;  %v6358_v25 = vor.u32 %v7677_v48, %v6357_v20  ;;  %411 = vst [vmem:[#allocation1] ss:$4 sm:$0xff] %v8479_v6  ;;  %v7689_v4 = vld [vmem:[#allocation5 + $0xab4] sm:$0xf0] }
  0xd3   : > { %v6486_v33 = vor.u32 %v7709_v26, %v6485_v51  ;;  %413 = vst [vmem:[#allocation1 + $0x1] ss:$4 sm:$0xff] %v8422_v14  ;;  %v6469_v63 = vld [vmem:[#allocation5 + $0xb30] sm:$0xf]  ;;  %v7721_v20 = vld [vmem:[#allocation5 + $0xbb4] sm:$0xf0]  ;;  %v6406_v48 = vor.u32 %v7689_v4, %v6405_v55 }
  0xd4   : > { %v6470_v8 = vor.u32 %v7705_v47, %v6469_v63  ;;  %v6534_v9 = vor.u32 %v7721_v20, %v6533_v0  ;;  %v6397_v51 = vld [vmem:[#allocation5 + $0xaa0] sm:$0xf]  ;;  %v7703_v26 = vld [vmem:[#allocation5 + $0xb24] sm:$0xf0] }
  0xd5   : > { %4157 = vmatpush.bf16.msra.mxu0 %v6062_v35  ;;  %4170 = vmatpush.bf16.msra.mxu1 %v6126_v15  ;;  %v7675_v35 = vld [vmem:[#allocation5 + $0xa44] sm:$0xf0]  ;;  %v6413_v15 = vld [vmem:[#allocation5 + $0xac0] sm:$0xf] }
  0xd6   : > { %4183 = vmatpush.bf16.msra.mxu2 %v6190_v38  ;;  %4196 = vmatpush.bf16.msra.mxu3 %v6254_v46  ;;  %v6477_v38 = vld [vmem:[#allocation5 + $0xb40] sm:$0xf]  ;;  %v7707_v46 = vld [vmem:[#allocation5 + $0xb44] sm:$0xf0]  ;;  %v6350_v43 = vor.u32 %v7675_v35, %v6349_v19  ;;  %v6414_v41 = vor.u32 %v7691_v34, %v6413_v15  ;;  %v7669_v35 = vld [vmem:[#allocation5 + $0xa14] sm:$0xf0] }
  0xd7   : > { %v6478_v6 = vor.u32 %v7707_v46, %v6477_v38  ;;  %v7685_v34 = vld [vmem:[#allocation5 + $0xa94] sm:$0xf0]  ;;  %v6453_v38 = vld [vmem:[#allocation5 + $0xb10] sm:$0xf]  ;;  %v6445_v55 = vld [vmem:[#allocation5 + $0xb00] sm:$0xf] }
  0xd8   : > { %4158 = vmatmul.bf16.vlgmr.msra.gmra.mxu0 %v8570_v57  ;;  %4171 = vmatmul.bf16.vlgmr.msra.gmra.mxu1 %v8578_v1  ;;  %v7701_v46 = vld [vmem:[#allocation5 + $0xb14] sm:$0xf0]  ;;  %v7699_v47 = vld [vmem:[#allocation5 + $0xb04] sm:$0xf0]  ;;  %v6509_v0 = vld [vmem:[#allocation5 + $0xb80] sm:$0xf] }
  0xd9   : > { %4202 = vmatpush.bf16.msrb.mxu0 %v6374_v39  ;;  %4215 = vmatpush.bf16.msrb.mxu1 %v6438_v40  ;;  %v6541_v39 = vld [vmem:[#allocation5 + $0xbc0] sm:$0xf]  ;;  %v7723_v40 = vld [vmem:[#allocation5 + $0xbc4] sm:$0xf0]  ;;  %v6454_v4 = vor.u32 %v7701_v46, %v6453_v38 }
  0xda   : > { %4228 = vmatpush.bf16.msrb.mxu2 %v6502_v61  ;;  %4241 = vmatpush.bf16.msrb.mxu3 %v6566_v49  ;;  %v6341_v61 = vld [vmem:[#allocation5 + $0xa30] sm:$0xf]  ;;  %v7673_v49 = vld [vmem:[#allocation5 + $0xa34] sm:$0xf0]  ;;  %v6542_v54 = vor.u32 %v7723_v40, %v6541_v39  ;;  %v7715_v20 = vld [vmem:[#allocation5 + $0xb84] sm:$0xf0] }
  0xdb   : > { %4184 = vmatmul.bf16.vlgmr.msra.gmra.mxu2 %v8574_v45  ;;  %4197 = vmatmul.bf16.vlgmr.msra.gmra.mxu3 %v8582_v2  ;;  %v6342_v14 = vor.u32 %v7673_v49, %v6341_v61  ;;  %v6517_v39 = vld [vmem:[#allocation5 + $0xb90] sm:$0xf]  ;;  %v7717_v40 = vld [vmem:[#allocation5 + $0xb94] sm:$0xf0]  ;;  %v6685_v38 = vld [vmem:[#allocation5 + $0xce0] sm:$0xf] }
  0xdc   : > { %v6518_v63 = vor.u32 %v7717_v40, %v6517_v39  ;;  %v7759_v46 = vld [vmem:[#allocation5 + $0xce4] sm:$0xf0]  ;;  %v6749_v39 = vld [vmem:[#allocation5 + $0xd60] sm:$0xf]  ;;  %v8600_v40 = vpack.c.bf16 %v8586_v60, %v8586_v60  ;;  %v7741_v60 = vld [vmem:[#allocation5 + $0xc54] sm:$0xf0] }
  0xdd   : > { %4203 = vmatpush.bf16.msrb.mxu0 %v6366_v3  ;;  %4216 = vmatpush.bf16.msrb.mxu1 %v6430_v59  ;;  %v6333_v3 = vld [vmem:[#allocation5 + $0xa20] sm:$0xf]  ;;  %v7671_v59 = vld [vmem:[#allocation5 + $0xa24] sm:$0xf0] }
  0xde   : > { %4229 = vmatpush.bf16.msrb.mxu2 %v6494_v27  ;;  %4242 = vmatpush.bf16.msrb.mxu3 %v6558_v10  ;;  %v7687_v27 = vld [vmem:[#allocation5 + $0xaa4] sm:$0xf0]  ;;  %v6461_v10 = vld [vmem:[#allocation5 + $0xb20] sm:$0xf]  ;;  %v6334_v19 = vor.u32 %v7671_v59, %v6333_v3  ;;  %v6693_v3 = vld [vmem:[#allocation5 + $0xcf0] sm:$0xf] }
  0xdf   : > { %v6462_v15 = vor.u32 %v7703_v26, %v6461_v10  ;;  %v7761_v59 = vld [vmem:[#allocation5 + $0xcf4] sm:$0xf0]  ;;  %v6821_v26 = vld [vmem:[#allocation5 + $0xdf0] sm:$0xf] }
  0xe0   : > { %v7777_v10 = vld [vmem:[#allocation5 + $0xd74] sm:$0xf0] }
  0xe1   : > { %4204 = vmatpush.bf16.msrb.mxu0 %v6358_v25  ;;  %4217 = vmatpush.bf16.msrb.mxu1 %v6422_v29  ;;  %v6398_v25 = vor.u32 %v7687_v27, %v6397_v51  ;;  %v6325_v29 = vld [vmem:[#allocation5 + $0xa10] sm:$0xf] }
  0xe2   : > { %4230 = vmatpush.bf16.msrb.mxu2 %v6486_v33  ;;  %4243 = vmatpush.bf16.msrb.mxu3 %v6550_v36  ;;  %v6526_v33 = vor.u32 %v7719_v44, %v6525_v42  ;;  %v6389_v36 = vld [vmem:[#allocation5 + $0xa90] sm:$0xf]  ;;  %v6326_v61 = vor.u32 %v7669_v35, %v6325_v29  ;;  %v7793_v42 = vld [vmem:[#allocation5 + $0xdf4] sm:$0xf0]  ;;  %v6446_v44 = vor.u32 %v7699_v47, %v6445_v55 }
  0xe3   : > { %v6390_v49 = vor.u32 %v7685_v34, %v6389_v36  ;;  %v6694_v29 = vor.u32 %v7761_v59, %v6693_v3  ;;  %v6822_v34 = vor.u32 %v7793_v42, %v6821_v26  ;;  %v6613_v55 = vld [vmem:[#allocation5 + $0xc50] sm:$0xf]  ;;  %v6686_v47 = vor.u32 %v7759_v46, %v6685_v38  ;;  %v8614_v59 = vld.sshfl [vmem:[#allocation1] sm:$0xff pattern:$0x73625140] }
  0xe4   : > { %v6614_v26 = vor.u32 %v7741_v60, %v6613_v55  ;;  %v7771_v38 = vld [vmem:[#allocation5 + $0xd44] sm:$0xf0]  ;;  %v6661_v60 = vld [vmem:[#allocation5 + $0xcb0] sm:$0xf] }
  0xe5   : > { %4205 = vmatpush.bf16.msrb.mxu0 %v6350_v43  ;;  %4218 = vmatpush.bf16.msrb.mxu1 %v6414_v41  ;;  %v6317_v43 = vld [vmem:[#allocation5 + $0xa00] sm:$0xf]  ;;  %v7667_v41 = vld [vmem:[#allocation5 + $0xa04] sm:$0xf0] }
  0xe6   : > { %4231 = vmatpush.bf16.msrb.mxu2 %v6478_v6  ;;  %4244 = vmatpush.bf16.msrb.mxu3 %v6542_v54  ;;  %v6381_v6 = vld [vmem:[#allocation5 + $0xa80] sm:$0xf]  ;;  %v7683_v54 = vld [vmem:[#allocation5 + $0xa84] sm:$0xf0]  ;;  %v6318_v51 = vor.u32 %v7667_v41, %v6317_v43  ;;  %v8604_v43 = vpack.c.bf16 %v8588_v17, %v8588_v17 }
  0xe7   : > { %v6382_v27 = vor.u32 %v7683_v54, %v6381_v6  ;;  %v7775_v41 = vld [vmem:[#allocation5 + $0xd64] sm:$0xf0]  ;;  %v8608_v6 = vpack.c.bf16 %v8592_v23, %v8592_v23  ;;  %v8612_v54 = vpack.c.bf16 %v8594_v24, %v8594_v24 }
  0xe8   : > { %v6750_v23 = vor.u32 %v7775_v41, %v6749_v39  ;;  %v8616_v24 = vld.sshfl [vmem:[#allocation1 + $0x10] sm:$0xff pattern:$0x73625140]  ;;  %v6597_v41 = vld [vmem:[#allocation5 + $0xc30] sm:$0xf] }
  0xe9   : > { %4206 = vmatpush.bf16.msrb.mxu0 %v6342_v14  ;;  %4219 = vmatpush.bf16.msrb.mxu1 %v6406_v48  ;;  %v6629_v14 = vld [vmem:[#allocation5 + $0xc70] sm:$0xf]  ;;  %v7745_v48 = vld [vmem:[#allocation5 + $0xc74] sm:$0xf0] }
  0xea   : > { %4232 = vmatpush.bf16.msrb.mxu2 %v6470_v8  ;;  %4245 = vmatpush.bf16.msrb.mxu3 %v6534_v9  ;;  %v6757_v8 = vld [vmem:[#allocation5 + $0xd70] sm:$0xf]  ;;  %v1056_v9 = vld [vmem:[#allocation7] sm:$0x3] }
  0xeb   : > { %v1058_v35 = vperm.slane %v1056_v9, 0  ;;  %v6758_v36 = vor.u32 %v7777_v10, %v6757_v8  ;;  %v8620_v8 = vld.sshfl [vmem:[#allocation1 + $0x8] sm:$0xff pattern:$0x73625140] }
  0xec   : > { %v8622_v9 = vld.sshfl [vmem:[#allocation1 + $0x18] sm:$0xff pattern:$0x73625140] }
  0xed   : > { %4207 = vmatpush.bf16.msrb.mxu0 %v6334_v19  ;;  %4220 = vmatpush.bf16.msrb.mxu1 %v6398_v25  ;;  %v6510_v19 = vor.u32 %v7715_v20, %v6509_v0  ;;  %v6630_v25 = vor.u32 %v7745_v48, %v6629_v14  ;;  %v6741_v0 = vld [vmem:[#allocation5 + $0xd50] sm:$0xf]  ;;  %v7773_v20 = vld [vmem:[#allocation5 + $0xd54] sm:$0xf0]  ;;  %422 = vst [vmem:[#allocation1] ss:$4 sm:$0xff] %v8526_v31 }
  0xee   : > { %4233 = vmatpush.bf16.msrb.mxu2 %v6462_v15  ;;  %4246 = vmatpush.bf16.msrb.mxu3 %v6526_v33  ;;  %v6621_v15 = vld [vmem:[#allocation5 + $0xc60] sm:$0xf]  ;;  %v7743_v33 = vld [vmem:[#allocation5 + $0xc64] sm:$0xf0]  ;;  %v6805_v14 = vld [vmem:[#allocation5 + $0xdd0] sm:$0xf] }
  0xef   : > { %v6622_v17 = vor.u32 %v7743_v33, %v6621_v15  ;;  %v7789_v48 = vld [vmem:[#allocation5 + $0xdd4] sm:$0xf0]  ;;  %424 = vst [vmem:[#allocation1 + $0x1] ss:$4 sm:$0xff] %v8433_v52  ;;  %v6669_v15 = vld [vmem:[#allocation5 + $0xcc0] sm:$0xf] }
  0xf0   : > { %v7755_v33 = vld [vmem:[#allocation5 + $0xcc4] sm:$0xf0]  ;;  %v6797_v31 = vld [vmem:[#allocation5 + $0xdc0] sm:$0xf] }
  0xf1   : > { %4208 = vmatpush.bf16.msrb.mxu0 %v6326_v61  ;;  %4221 = vmatpush.bf16.msrb.mxu1 %v6390_v49  ;;  %v6813_v61 = vld [vmem:[#allocation5 + $0xde0] sm:$0xf]  ;;  %v7791_v49 = vld [vmem:[#allocation5 + $0xde4] sm:$0xf0]  ;;  %v6670_v39 = vor.u32 %v7755_v33, %v6669_v15 }
  0xf2   : > { %4234 = vmatpush.bf16.msrb.mxu2 %v6454_v4  ;;  %4247 = vmatpush.bf16.msrb.mxu3 %v6518_v63  ;;  %v6677_v4 = vld [vmem:[#allocation5 + $0xcd0] sm:$0xf]  ;;  %v7757_v63 = vld [vmem:[#allocation5 + $0xcd4] sm:$0xf0]  ;;  %v6814_v3 = vor.u32 %v7791_v49, %v6813_v61  ;;  %v7767_v15 = vld [vmem:[#allocation5 + $0xd24] sm:$0xf0] }
  0xf3   : > { %v6678_v42 = vor.u32 %v7757_v63, %v6677_v4  ;;  %v7737_v61 = vld [vmem:[#allocation5 + $0xc34] sm:$0xf0]  ;;  %v6725_v63 = vld [vmem:[#allocation5 + $0xd30] sm:$0xf]  ;;  %v6781_v33 = vld [vmem:[#allocation5 + $0xda0] sm:$0xf] }
  0xf4   : > { %v7753_v4 = vld [vmem:[#allocation5 + $0xcb4] sm:$0xf0] }
  0xf5   : > { %4209 = vmatpush.bf16.msrb.mxu0 %v6318_v51  ;;  %4222 = vmatpush.bf16.msrb.mxu1 %v6382_v27  ;;  %v3951_v51 = vpop.f32.mrf.mxu0  ;;  %v3964_v10 = vpop.f32.mrf.mxu1 }
  0xf6   : > { %4235 = vmatpush.bf16.msrb.mxu2 %v6446_v44  ;;  %4248 = vmatpush.bf16.msrb.mxu3 %v6510_v19  ;;  %v3952_v27 = vadd.f32 %v3951_v51, %v1058_v35  ;;  %v6605_v44 = vld [vmem:[#allocation5 + $0xc40] sm:$0xf]  ;;  %v7739_v19 = vld [vmem:[#allocation5 + $0xc44] sm:$0xf0]  ;;  %v6598_v51 = vor.u32 %v7737_v61, %v6597_v41  ;;  %v6645_v61 = vld [vmem:[#allocation5 + $0xc90] sm:$0xf] }
  0xf7   : > { %v7787_v35 = vld [vmem:[#allocation5 + $0xdc4] sm:$0xf0]  ;;  %v6606_v46 = vor.u32 %v7739_v19, %v6605_v44  ;;  %v6653_v19 = vld [vmem:[#allocation5 + $0xca0] sm:$0xf] }
  0xf8   : > { %4210 = vmatmul.bf16.vlgmr.msrb.gmra.mxu0 %v8600_v40  ;;  %4223 = vmatmul.bf16.vlgmr.msrb.gmra.mxu1 %v8608_v6  ;;  %v6798_v55 = vor.u32 %v7787_v35, %v6797_v31  ;;  %v6581_v31 = vld [vmem:[#allocation5 + $0xc10] sm:$0xf]  ;;  %v7733_v35 = vld [vmem:[#allocation5 + $0xc14] sm:$0xf0] }
  0xf9   : > { %4254 = vmatpush.bf16.msra.mxu0 %v6630_v25  ;;  %4267 = vmatpush.bf16.msra.mxu1 %v6694_v29  ;;  %v6742_v25 = vor.u32 %v7773_v20, %v6741_v0  ;;  %v6806_v29 = vor.u32 %v7789_v48, %v6805_v14  ;;  %v7769_v0 = vld [vmem:[#allocation5 + $0xd34] sm:$0xf0]  ;;  %v6789_v20 = vld [vmem:[#allocation5 + $0xdb0] sm:$0xf] }
  0xfa   : > { %4280 = vmatpush.bf16.msra.mxu2 %v6758_v36  ;;  %4293 = vmatpush.bf16.msra.mxu3 %v6822_v34  ;;  %v6733_v36 = vld [vmem:[#allocation5 + $0xd40] sm:$0xf]  ;;  %v3965_v34 = vadd.f32 %v3964_v10, %v3952_v27  ;;  %v3977_v49 = vpop.f32.mrf.mxu2  ;;  %v7785_v14 = vld [vmem:[#allocation5 + $0xdb4] sm:$0xf0]  ;;  %v6662_v27 = vor.u32 %v7753_v4, %v6661_v60  ;;  %v6773_v4 = vld [vmem:[#allocation5 + $0xd90] sm:$0xf] }
  0xfb   : > { %4236 = vmatmul.bf16.vlgmr.msrb.gmra.mxu2 %v8604_v43  ;;  %4249 = vmatmul.bf16.vlgmr.msrb.gmra.mxu3 %v8612_v54  ;;  %v6734_v52 = vor.u32 %v7771_v38, %v6733_v36  ;;  %v6589_v10 = vld [vmem:[#allocation5 + $0xc20] sm:$0xf]  ;;  %v6790_v44 = vor.u32 %v7785_v14, %v6789_v20  ;;  %v7783_v36 = vld [vmem:[#allocation5 + $0xda4] sm:$0xf0]  ;;  %v7765_v60 = vld [vmem:[#allocation5 + $0xd14] sm:$0xf0]  ;;  %v6582_v14 = vor.u32 %v7733_v35, %v6581_v31 }
  0xfc   : > { %v6782_v41 = vor.u32 %v7783_v36, %v6781_v33  ;;  %v7809_v33 = vld [vmem:[#allocation5 + $0xe74] sm:$0xf0] }
  0xfd   : > { %4255 = vmatpush.bf16.msra.mxu0 %v6622_v17  ;;  %4268 = vmatpush.bf16.msra.mxu1 %v6686_v47  ;;  %v3978_v17 = vadd.f32 %v3977_v49, %v3965_v34  ;;  %v3990_v47 = vpop.f32.mrf.mxu3  ;;  %v3953_v48 = vpop.f32.mrf.mxu0  ;;  %v7749_v49 = vld [vmem:[#allocation5 + $0xc94] sm:$0xf0] }
  0xfe   : > { %4281 = vmatpush.bf16.msra.mxu2 %v6750_v23  ;;  %4294 = vmatpush.bf16.msra.mxu3 %v6814_v3  ;;  %v3966_v3 = vpop.f32.mrf.mxu1  ;;  %v6646_v48 = vor.u32 %v7749_v49, %v6645_v61  ;;  %v7825_v36 = vld [vmem:[#allocation5 + $0xef4] sm:$0xf0] }
  0xff   : > { %v3991_v23 = vadd.f32 %v3990_v47, %v3978_v17  ;;  %v6573_v47 = vld [vmem:[#allocation5 + $0xc00] sm:$0xf]  ;;  %v7731_v3 = vld [vmem:[#allocation5 + $0xc04] sm:$0xf0]  ;;  %v7841_v35 = vld [vmem:[#allocation5 + $0xf74] sm:$0xf0] }
 0x101   : > { %4256 = vmatpush.bf16.msra.mxu0 %v6614_v26  ;;  %4269 = vmatpush.bf16.msra.mxu1 %v6678_v42  ;;  %v7735_v26 = vld [vmem:[#allocation5 + $0xc24] sm:$0xf0]  ;;  %v6726_v42 = vor.u32 %v7769_v0, %v6725_v63  ;;  %v7781_v63 = vld [vmem:[#allocation5 + $0xd94] sm:$0xf0] }
 0x102   : > { %4282 = vmatpush.bf16.msra.mxu2 %v6742_v25  ;;  %4295 = vmatpush.bf16.msra.mxu3 %v6806_v29  ;;  %v7751_v25 = vld [vmem:[#allocation5 + $0xca4] sm:$0xf0]  ;;  %v6717_v29 = vld [vmem:[#allocation5 + $0xd20] sm:$0xf]  ;;  %v6590_v34 = vor.u32 %v7735_v26, %v6589_v10  ;;  %v6774_v26 = vor.u32 %v7781_v63, %v6773_v4 }
 0x103   : > { %v6654_v38 = vor.u32 %v7751_v25, %v6653_v19  ;;  %v6765_v19 = vld [vmem:[#allocation5 + $0xd80] sm:$0xf] }
 0x104   : > { %v6877_v63 = vld [vmem:[#allocation5 + $0xe60] sm:$0xf] }
 0x105   : > { %4257 = vmatpush.bf16.msra.mxu0 %v6606_v46  ;;  %4270 = vmatpush.bf16.msra.mxu1 %v6670_v39  ;;  %v3979_v46 = vpop.f32.mrf.mxu2  ;;  %v6718_v39 = vor.u32 %v7767_v15, %v6717_v29  ;;  %v4003_v17 = vpop.f32.mrf.mxu0  ;;  %v7779_v29 = vld [vmem:[#allocation5 + $0xd84] sm:$0xf0]  ;;  %v6885_v15 = vld [vmem:[#allocation5 + $0xe70] sm:$0xf] }
 0x106   : > { %4283 = vmatpush.bf16.msra.mxu2 %v6734_v52  ;;  %4296 = vmatpush.bf16.msra.mxu3 %v6798_v55  ;;  %v6709_v52 = vld [vmem:[#allocation5 + $0xd10] sm:$0xf]  ;;  %v3992_v55 = vpop.f32.mrf.mxu3  ;;  %v4004_v0 = vadd.f32 %v4003_v17, %v3991_v23  ;;  %v4016_v20 = vpop.f32.mrf.mxu1  ;;  %v6766_v49 = vor.u32 %v7779_v29, %v6765_v19  ;;  %v7807_v17 = vld [vmem:[#allocation5 + $0xe64] sm:$0xf0]  ;;  %v8642_v29 = vpack.c.bf16 %v8622_v9, %v8622_v9 }
 0x107   : > { %v6710_v10 = vor.u32 %v7765_v60, %v6709_v52  ;;  %v6949_v23 = vld [vmem:[#allocation5 + $0xef0] sm:$0xf]  ;;  %v6886_v60 = vor.u32 %v7809_v33, %v6885_v15  ;;  %v7805_v15 = vld [vmem:[#allocation5 + $0xe54] sm:$0xf0] }
 0x108   : > { %v4017_v25 = vadd.f32 %v4016_v20, %v4004_v0  ;;  %v7077_v46 = vld [vmem:[#allocation5 + $0xff0] sm:$0xf]  ;;  %v6950_v4 = vor.u32 %v7825_v36, %v6949_v23  ;;  %8820 = vst [vmem:[#allocation13_spill] sm:$0xff] %v8642_v29  ;;  %v7821_v23 = vld [vmem:[#allocation5 + $0xed4] sm:$0xf0] }
 0x109   : > { %4258 = vmatpush.bf16.msra.mxu0 %v6598_v51  ;;  %4271 = vmatpush.bf16.msra.mxu1 %v6662_v27  ;;  %v6637_v51 = vld [vmem:[#allocation5 + $0xc80] sm:$0xf]  ;;  %v7747_v27 = vld [vmem:[#allocation5 + $0xc84] sm:$0xf0]  ;;  %v6933_v33 = vld [vmem:[#allocation5 + $0xed0] sm:$0xf] }
 0x10a   : > { %4284 = vmatpush.bf16.msra.mxu2 %v6726_v42  ;;  %4297 = vmatpush.bf16.msra.mxu3 %v6790_v44  ;;  %v6701_v42 = vld [vmem:[#allocation5 + $0xd00] sm:$0xf]  ;;  %v7763_v44 = vld [vmem:[#allocation5 + $0xd04] sm:$0xf0]  ;;  %v6638_v31 = vor.u32 %v7747_v27, %v6637_v51  ;;  %v8630_v27 = vpack.c.bf16 %v8614_v59, %v8614_v59  ;;  %v6869_v59 = vld [vmem:[#allocation5 + $0xe50] sm:$0xf] }
 0x10b   : > { %v6702_v61 = vor.u32 %v7763_v44, %v6701_v42  ;;  %v7069_v42 = vld [vmem:[#allocation5 + $0xfe0] sm:$0xf]  ;;  %v7855_v44 = vld [vmem:[#allocation5 + $0xfe4] sm:$0xf0] }
 0x10c   : > { %v8646_v36 = vld.sshfl [vmem:[#allocation1 + $0x10] sm:$0xff pattern:$0x73625140] }
 0x10d   : > { %4259 = vmatpush.bf16.msra.mxu0 %v6590_v34  ;;  %4272 = vmatpush.bf16.msra.mxu1 %v6654_v38  ;;  %v7013_v34 = vld [vmem:[#allocation5 + $0xf70] sm:$0xf]  ;;  %v6574_v38 = vor.u32 %v7731_v3, %v6573_v47  ;;  %v7823_v47 = vld [vmem:[#allocation5 + $0xee4] sm:$0xf0]  ;;  %v7005_v3 = vld [vmem:[#allocation5 + $0xf60] sm:$0xf] }
 0x10e   : > { %4285 = vmatpush.bf16.msra.mxu2 %v6718_v39  ;;  %4298 = vmatpush.bf16.msra.mxu3 %v6782_v41  ;;  %v7857_v39 = vld [vmem:[#allocation5 + $0xff4] sm:$0xf0]  ;;  %v4029_v41 = vpop.f32.mrf.mxu2  ;;  %v4042_v55 = vpop.f32.mrf.mxu3  ;;  %v7014_v0 = vor.u32 %v7841_v35, %v7013_v34  ;;  %v6878_v34 = vor.u32 %v7807_v17, %v6877_v63  ;;  %v7070_v35 = vor.u32 %v7855_v44, %v7069_v42 }
 0x10f   : > { %v4030_v52 = vadd.f32 %v4029_v41, %v4017_v25  ;;  %v7078_v20 = vor.u32 %v7857_v39, %v7077_v46  ;;  %v4018_v19 = vpop.f32.mrf.mxu1  ;;  %v8638_v25 = vpack.c.bf16 %v8620_v8, %v8620_v8  ;;  %v8650_v8 = vld.sshfl [vmem:[#allocation1 + $0x18] sm:$0xff pattern:$0x73625140]  ;;  %v7837_v39 = vld [vmem:[#allocation5 + $0xf54] sm:$0xf0] }
 0x110   : > { %v6997_v46 = vld [vmem:[#allocation5 + $0xf50] sm:$0xf] }
 0x111   : > { %4260 = vmatpush.bf16.msra.mxu0 %v6582_v14  ;;  %4273 = vmatpush.bf16.msra.mxu1 %v6646_v48  ;;  %v4005_v14 = vpop.f32.mrf.mxu0  ;;  %v6941_v48 = vld [vmem:[#allocation5 + $0xee0] sm:$0xf]  ;;  %v4043_v51 = vadd.f32 %v4042_v55, %v4030_v52  ;;  %8819 = vst [vmem:[#allocation12_spill] sm:$0xff] %v8638_v25  ;;  %v7061_v41 = vld [vmem:[#allocation5 + $0xfd0] sm:$0xf]  ;;  %v6870_v52 = vor.u32 %v7805_v15, %v6869_v59 }
 0x112   : > { %4286 = vmatpush.bf16.msra.mxu2 %v6710_v10  ;;  %4299 = vmatpush.bf16.msra.mxu3 %v6774_v26  ;;  %v8634_v10 = vpack.c.bf16 %v8616_v24, %v8616_v24  ;;  %v7839_v26 = vld [vmem:[#allocation5 + $0xf64] sm:$0xf0]  ;;  %v8644_v24 = vld.sshfl [vmem:[#allocation1] sm:$0xff pattern:$0x73625140]  ;;  %v6934_v55 = vor.u32 %v7821_v23, %v6933_v33  ;;  %v6998_v63 = vor.u32 %v7837_v39, %v6997_v46 }
 0x113   : > { %v7006_v9 = vor.u32 %v7839_v26, %v7005_v3  ;;  %v6989_v14 = vld [vmem:[#allocation5 + $0xf40] sm:$0xf]  ;;  %v6853_v59 = vld [vmem:[#allocation5 + $0xe30] sm:$0xf]  ;;  %v7801_v15 = vld [vmem:[#allocation5 + $0xe34] sm:$0xf0] }
 0x114   : > { %v7833_v46 = vld [vmem:[#allocation5 + $0xf34] sm:$0xf0]  ;;  %v7045_v39 = vld [vmem:[#allocation5 + $0xfb0] sm:$0xf] }
 0x115   : > { %4261 = vmatpush.bf16.msra.mxu0 %v6574_v38  ;;  %4274 = vmatpush.bf16.msra.mxu1 %v6638_v31  ;;  %v6942_v38 = vor.u32 %v7823_v47, %v6941_v48  ;;  %v8648_v31 = vld.sshfl [vmem:[#allocation1 + $0x8] sm:$0xff pattern:$0x73625140]  ;;  %v7851_v47 = vld [vmem:[#allocation5 + $0xfc4] sm:$0xf0] }
 0x116   : > { %4287 = vmatpush.bf16.msra.mxu2 %v6702_v61  ;;  %4300 = vmatpush.bf16.msra.mxu3 %v6766_v49  ;;  %433 = vst [vmem:[#allocation1] ss:$4 sm:$0xff] %v8408_v32  ;;  %v7853_v61 = vld [vmem:[#allocation5 + $0xfd4] sm:$0xf0]  ;;  %v4031_v49 = vpop.f32.mrf.mxu2  ;;  %v7803_v32 = vld [vmem:[#allocation5 + $0xe44] sm:$0xf0] }
 0x117   : > { %435 = vst [vmem:[#allocation1 + $0x1] ss:$4 sm:$0xff] %v8413_v37  ;;  %v7062_v17 = vor.u32 %v7853_v61, %v7061_v41  ;;  %v7835_v37 = vld [vmem:[#allocation5 + $0xf44] sm:$0xf0]  ;;  %v7053_v48 = vld [vmem:[#allocation5 + $0xfc0] sm:$0xf]  ;;  %v4068_v19 = vpop.f32.mrf.mxu1  ;;  %v6854_v61 = vor.u32 %v7801_v15, %v6853_v59 }
 0x118   : > { %4262 = vmatmul.bf16.vlgmr.msra.gmra.mxu0 %v8630_v27  ;;  %4275 = vmatmul.bf16.vlgmr.msra.gmra.mxu1 %v8638_v25  ;;  %v6990_v33 = vor.u32 %v7835_v37, %v6989_v14  ;;  %v7054_v23 = vor.u32 %v7851_v47, %v7053_v48  ;;  %v7849_v41 = vld [vmem:[#allocation5 + $0xfb4] sm:$0xf0]  ;;  %v6845_v49 = vld [vmem:[#allocation5 + $0xe20] sm:$0xf]  ;;  %v7831_v14 = vld [vmem:[#allocation5 + $0xf24] sm:$0xf0] }
 0x119   : > { %4306 = vmatpush.bf16.msrb.mxu0 %v6886_v60  ;;  %4319 = vmatpush.bf16.msrb.mxu1 %v6950_v4  ;;  %v4044_v60 = vpop.f32.mrf.mxu3  ;;  %v6861_v4 = vld [vmem:[#allocation5 + $0xe40] sm:$0xf]  ;;  %v4055_v3 = vpop.f32.mrf.mxu0  ;;  %v7847_v48 = vld [vmem:[#allocation5 + $0xfa4] sm:$0xf0] }
 0x11a   : > { %4332 = vmatpush.bf16.msrb.mxu2 %v7014_v0  ;;  %4345 = vmatpush.bf16.msrb.mxu3 %v7078_v20  ;;  %v6925_v0 = vld [vmem:[#allocation5 + $0xec0] sm:$0xf]  ;;  %v7819_v20 = vld [vmem:[#allocation5 + $0xec4] sm:$0xf0]  ;;  %v4056_v26 = vadd.f32 %v4055_v3, %v4043_v51  ;;  %v6862_v42 = vor.u32 %v7803_v32, %v6861_v4  ;;  %v7046_v60 = vor.u32 %v7849_v41, %v7045_v39 }
 0x11b   : > { %4288 = vmatmul.bf16.vlgmr.msra.gmra.mxu2 %v8634_v10  ;;  %4301 = vmatmul.bf16.vlgmr.msra.gmra.mxu3 %v8642_v29  ;;  %v6926_v44 = vor.u32 %v7819_v20, %v6925_v0  ;;  %v6909_v32 = vld [vmem:[#allocation5 + $0xea0] sm:$0xf]  ;;  %v7887_v29 = vld [vmem:[#allocation5 + $0x10e4] sm:$0xf0] }
 0x11c   : > { %v7037_v37 = vld [vmem:[#allocation5 + $0xfa0] sm:$0xf] }
 0x11d   : > { %4307 = vmatpush.bf16.msrb.mxu0 %v6878_v34  ;;  %4320 = vmatpush.bf16.msrb.mxu1 %v6942_v38  ;;  %v6917_v34 = vld [vmem:[#allocation5 + $0xeb0] sm:$0xf]  ;;  %v7817_v38 = vld [vmem:[#allocation5 + $0xeb4] sm:$0xf0]  ;;  %v6829_v39 = vld [vmem:[#allocation5 + $0xe00] sm:$0xf] }
 0x11e   : > { %4333 = vmatpush.bf16.msrb.mxu2 %v7006_v9  ;;  %4346 = vmatpush.bf16.msrb.mxu3 %v7070_v35  ;;  %v6981_v9 = vld [vmem:[#allocation5 + $0xf30] sm:$0xf]  ;;  %v4069_v35 = vadd.f32 %v4068_v19, %v4056_v26  ;;  %v6918_v51 = vor.u32 %v7817_v38, %v6917_v34  ;;  %v4081_v4 = vpop.f32.mrf.mxu2  ;;  %v7797_v19 = vld [vmem:[#allocation5 + $0xe14] sm:$0xf0]  ;;  %v7261_v25 = vld [vmem:[#allocation5 + $0x1160] sm:$0xf] }
 0x11f   : > { %v4070_v59 = vpop.f32.mrf.mxu1  ;;  %v7813_v34 = vld [vmem:[#allocation5 + $0xe94] sm:$0xf0]  ;;  %v6965_v38 = vld [vmem:[#allocation5 + $0xf10] sm:$0xf] }
 0x120   : > { %v4082_v0 = vadd.f32 %v4081_v4, %v4069_v35  ;;  %v7029_v35 = vld [vmem:[#allocation5 + $0xf90] sm:$0xf]  ;;  %v6957_v4 = vld [vmem:[#allocation5 + $0xf00] sm:$0xf] }
 0x121   : > { %4308 = vmatpush.bf16.msrb.mxu0 %v6870_v52  ;;  %4321 = vmatpush.bf16.msrb.mxu1 %v6934_v55  ;;  %v7799_v52 = vld [vmem:[#allocation5 + $0xe24] sm:$0xf0]  ;;  %v6982_v55 = vor.u32 %v7833_v46, %v6981_v9  ;;  %v4094_v20 = vpop.f32.mrf.mxu3  ;;  %v4057_v47 = vpop.f32.mrf.mxu0  ;;  %v7829_v9 = vld [vmem:[#allocation5 + $0xf14] sm:$0xf0]  ;;  %v7333_v59 = vld [vmem:[#allocation5 + $0x11f0] sm:$0xf] }
 0x122   : > { %4334 = vmatpush.bf16.msrb.mxu2 %v6998_v63  ;;  %4347 = vmatpush.bf16.msrb.mxu3 %v7062_v17  ;;  %v7815_v63 = vld [vmem:[#allocation5 + $0xea4] sm:$0xf0]  ;;  %v6973_v17 = vld [vmem:[#allocation5 + $0xf20] sm:$0xf]  ;;  %v8658_v3 = vadd.f32 %v4094_v20, %v4082_v0  ;;  %v6846_v26 = vor.u32 %v7799_v52, %v6845_v49  ;;  %v7845_v46 = vld [vmem:[#allocation5 + $0xf94] sm:$0xf0] }
 0x123   : > { %v6974_v15 = vor.u32 %v7831_v14, %v6973_v17  ;;  %v6893_v49 = vld [vmem:[#allocation5 + $0xe80] sm:$0xf]  ;;  %v7811_v52 = vld [vmem:[#allocation5 + $0xe84] sm:$0xf0]  ;;  %v7141_v20 = vld [vmem:[#allocation5 + $0x1070] sm:$0xf] }
 0x124   : > { %v7843_v0 = vld [vmem:[#allocation5 + $0xf84] sm:$0xf0]  ;;  %v7873_v14 = vld [vmem:[#allocation5 + $0x1074] sm:$0xf0] }
 0x125   : > { %4309 = vmatpush.bf16.msrb.mxu0 %v6862_v42  ;;  %4322 = vmatpush.bf16.msrb.mxu1 %v6926_v44  ;;  %v6910_v42 = vor.u32 %v7815_v63, %v6909_v32  ;;  %v6837_v44 = vld [vmem:[#allocation5 + $0xe10] sm:$0xf]  ;;  %v7827_v32 = vld [vmem:[#allocation5 + $0xf04] sm:$0xf0]  ;;  %v7021_v63 = vld [vmem:[#allocation5 + $0xf80] sm:$0xf] }
 0x126   : > { %4335 = vmatpush.bf16.msrb.mxu2 %v6990_v33  ;;  %4348 = vmatpush.bf16.msrb.mxu3 %v7054_v23  ;;  %v7038_v33 = vor.u32 %v7847_v48, %v7037_v37  ;;  %v6901_v23 = vld [vmem:[#allocation5 + $0xe90] sm:$0xf]  ;;  %v6838_v41 = vor.u32 %v7797_v19, %v6837_v44  ;;  %v4083_v17 = vpop.f32.mrf.mxu2  ;;  %v7889_v47 = vld [vmem:[#allocation5 + $0x10f4] sm:$0xf0]  ;;  %v6894_v44 = vor.u32 %v7811_v52, %v6893_v49  ;;  %v7919_v49 = vld [vmem:[#allocation5 + $0x11e4] sm:$0xf0] }
 0x127   : > { %v7205_v48 = vld [vmem:[#allocation5 + $0x10f0] sm:$0xf]  ;;  %v7905_v19 = vld [vmem:[#allocation5 + $0x1174] sm:$0xf0]  ;;  %v8670_v52 = vpack.c.bf16 %v8648_v31, %v8648_v31 }
 0x128   : > { %v7901_v31 = vld [vmem:[#allocation5 + $0x1154] sm:$0xf0] }
 0x129   : > { %4310 = vmatpush.bf16.msrb.mxu0 %v6854_v61  ;;  %4323 = vmatpush.bf16.msrb.mxu1 %v6918_v51  ;;  %v6902_v61 = vor.u32 %v7813_v34, %v6901_v23  ;;  %v7795_v51 = vld [vmem:[#allocation5 + $0xe04] sm:$0xf0]  ;;  %v4096_v37 = vpop.f32.mrf.mxu3  ;;  %v7022_v23 = vor.u32 %v7843_v0, %v7021_v63  ;;  %v7142_v34 = vor.u32 %v7873_v14, %v7141_v20  ;;  %v7189_v0 = vld [vmem:[#allocation5 + $0x10d0] sm:$0xf]  ;;  %v7885_v20 = vld [vmem:[#allocation5 + $0x10d4] sm:$0xf0] }
 0x12a   : > { %4336 = vmatpush.bf16.msrb.mxu2 %v6982_v55  ;;  %4349 = vmatpush.bf16.msrb.mxu3 %v7046_v60  ;;  %v6966_v55 = vor.u32 %v7829_v9, %v6965_v38  ;;  %v7030_v60 = vor.u32 %v7845_v46, %v7029_v35  ;;  %v7206_v38 = vor.u32 %v7889_v47, %v7205_v48  ;;  %v7133_v9 = vld [vmem:[#allocation5 + $0x1060] sm:$0xf]  ;;  %v7871_v35 = vld [vmem:[#allocation5 + $0x1064] sm:$0xf0]  ;;  %v7253_v14 = vld [vmem:[#allocation5 + $0x1150] sm:$0xf] }
 0x12b   : > { %v7197_v37 = vld [vmem:[#allocation5 + $0x10e0] sm:$0xf]  ;;  %8822 = vst [vmem:[#allocation15_spill] sm:$0xff] %v8670_v52  ;;  %v7917_v48 = vld [vmem:[#allocation5 + $0x11d4] sm:$0xf0]  ;;  %v7190_v47 = vor.u32 %v7885_v20, %v7189_v0 }
 0x12c   : > { %v7913_v0 = vld [vmem:[#allocation5 + $0x11b4] sm:$0xf0] }
 0x12d   : > { %4311 = vmatpush.bf16.msrb.mxu0 %v6846_v26  ;;  %4324 = vmatpush.bf16.msrb.mxu1 %v6910_v42  ;;  %v7269_v26 = vld [vmem:[#allocation5 + $0x1170] sm:$0xf]  ;;  %v6830_v42 = vor.u32 %v7795_v51, %v6829_v39  ;;  %v8662_v39 = vpack.c.bf16 %v8644_v24, %v8644_v24  ;;  %v7325_v51 = vld [vmem:[#allocation5 + $0x11e0] sm:$0xf]  ;;  %v7134_v24 = vor.u32 %v7871_v35, %v7133_v9 }
 0x12e   : > { %4337 = vmatpush.bf16.msrb.mxu2 %v6974_v15  ;;  %4350 = vmatpush.bf16.msrb.mxu3 %v7038_v33  ;;  %v7921_v15 = vld [vmem:[#allocation5 + $0x11f4] sm:$0xf0]  ;;  %v6958_v33 = vor.u32 %v7827_v32, %v6957_v4  ;;  %v7270_v46 = vor.u32 %v7905_v19, %v7269_v26  ;;  %v7125_v4 = vld [vmem:[#allocation5 + $0x1050] sm:$0xf]  ;;  %v7326_v63 = vor.u32 %v7919_v49, %v7325_v51  ;;  %v7867_v26 = vld [vmem:[#allocation5 + $0x1044] sm:$0xf0] }
 0x12f   : > { %v7334_v17 = vor.u32 %v7921_v15, %v7333_v59  ;;  %v7181_v19 = vld [vmem:[#allocation5 + $0x10c0] sm:$0xf]  ;;  %v7883_v59 = vld [vmem:[#allocation5 + $0x10c4] sm:$0xf0] }
 0x130   : > { %v7245_v15 = vld [vmem:[#allocation5 + $0x1140] sm:$0xf] }
 0x131   : > { %4312 = vmatpush.bf16.msrb.mxu0 %v6838_v41  ;;  %4325 = vmatpush.bf16.msrb.mxu1 %v6902_v61  ;;  %v8666_v41 = vpack.c.bf16 %v8646_v36, %v8646_v36  ;;  %v7903_v61 = vld [vmem:[#allocation5 + $0x1164] sm:$0xf0]  ;;  %v7869_v36 = vld [vmem:[#allocation5 + $0x1054] sm:$0xf0] }
 0x132   : > { %4338 = vmatpush.bf16.msrb.mxu2 %v6966_v55  ;;  %4351 = vmatpush.bf16.msrb.mxu3 %v7030_v60  ;;  %v8674_v55 = vpack.c.bf16 %v8650_v8, %v8650_v8  ;;  %v7198_v60 = vor.u32 %v7887_v29, %v7197_v37  ;;  %v7262_v32 = vor.u32 %v7903_v61, %v7261_v25  ;;  %v7317_v8 = vld [vmem:[#allocation5 + $0x11d0] sm:$0xf]  ;;  %v7117_v25 = vld [vmem:[#allocation5 + $0x1040] sm:$0xf]  ;;  %v7865_v61 = vld [vmem:[#allocation5 + $0x1034] sm:$0xf0] }
 0x133   : > { %8821 = vst [vmem:[#allocation14_spill] sm:$0xff] %v8666_v41  ;;  %v7126_v29 = vor.u32 %v7869_v36, %v7125_v4  ;;  %v7118_v35 = vor.u32 %v7867_v26, %v7117_v25  ;;  %v7109_v37 = vld [vmem:[#allocation5 + $0x1030] sm:$0xf]  ;;  %v7879_v25 = vld [vmem:[#allocation5 + $0x10a4] sm:$0xf0] }
 0x134   : > { %8823 = vst [vmem:[#allocation16_spill] sm:$0xff] %v8674_v55  ;;  %v7237_v4 = vld [vmem:[#allocation5 + $0x1130] sm:$0xf]  ;;  %v7110_v20 = vor.u32 %v7865_v61, %v7109_v37  ;;  %v7229_v26 = vld [vmem:[#allocation5 + $0x1120] sm:$0xf] }
 0x135   : > { %4313 = vmatpush.bf16.msrb.mxu0 %v6830_v42  ;;  %4326 = vmatpush.bf16.msrb.mxu1 %v6894_v44  ;;  %v7254_v42 = vor.u32 %v7901_v31, %v7253_v14  ;;  %v7318_v44 = vor.u32 %v7917_v48, %v7317_v8  ;;  %v7101_v14 = vld [vmem:[#allocation5 + $0x1020] sm:$0xf]  ;;  %v7863_v31 = vld [vmem:[#allocation5 + $0x1024] sm:$0xf0]  ;;  %v7157_v61 = vld [vmem:[#allocation5 + $0x1090] sm:$0xf] }
 0x136   : > { %4339 = vmatpush.bf16.msrb.mxu2 %v6958_v33  ;;  %4352 = vmatpush.bf16.msrb.mxu3 %v7022_v23  ;;  %v7899_v33 = vld [vmem:[#allocation5 + $0x1144] sm:$0xf0]  ;;  %v7309_v23 = vld [vmem:[#allocation5 + $0x11c0] sm:$0xf] }
 0x137   : > { %v7246_v51 = vor.u32 %v7899_v33, %v7245_v15  ;;  %v7911_v15 = vld [vmem:[#allocation5 + $0x11a4] sm:$0xf0] }
 0x138   : > { %4314 = vmatmul.bf16.vlgmr.msrb.gmra.mxu0 %v8662_v39  ;;  %4327 = vmatmul.bf16.vlgmr.msrb.gmra.mxu1 %v8670_v52  ;;  %v7374_v52 = vld [vmem:[#allocation5 + $0xe4] sm:$0xf] }
 0x139   : > { %4358 = vmatpush.bf16.msra.mxu0 %v7142_v34  ;;  %4371 = vmatpush.bf16.msra.mxu1 %v7206_v38  ;;  %v7915_v34 = vld [vmem:[#allocation5 + $0x11c4] sm:$0xf0]  ;;  %v4107_v38 = vpop.f32.mrf.mxu0 }
 0x13a   : > { %4384 = vmatpush.bf16.msra.mxu2 %v7270_v46  ;;  %4397 = vmatpush.bf16.msra.mxu3 %v7334_v17  ;;  %v4108_v9 = vadd.f32 %v4107_v38, %v8658_v3  ;;  %v7182_v46 = vor.u32 %v7883_v59, %v7181_v19  ;;  %v4120_v17 = vpop.f32.mrf.mxu1  ;;  %v7310_v49 = vor.u32 %v7915_v34, %v7309_v23  ;;  %v7895_v19 = vld [vmem:[#allocation5 + $0x1124] sm:$0xf0]  ;;  %v7293_v59 = vld [vmem:[#allocation5 + $0x11a0] sm:$0xf] }
 0x13b   : > { %4340 = vmatmul.bf16.vlgmr.msrb.gmra.mxu2 %v8666_v41  ;;  %4353 = vmatmul.bf16.vlgmr.msrb.gmra.mxu3 %v8674_v55  ;;  %v7102_v34 = vor.u32 %v7863_v31, %v7101_v14  ;;  %v7294_v37 = vor.u32 %v7911_v15, %v7293_v59  ;;  %v7213_v14 = vld [vmem:[#allocation5 + $0x1100] sm:$0xf]  ;;  %v7891_v31 = vld [vmem:[#allocation5 + $0x1104] sm:$0xf0]  ;;  %v7392_v59 = vld [vmem:[#allocation5 + $0x174] sm:$0xf] }
 0x13c   : > { %v4121_v36 = vadd.f32 %v4120_v17, %v4108_v9  ;;  %v7093_v9 = vld [vmem:[#allocation5 + $0x1010] sm:$0xf]  ;;  %v7230_v17 = vor.u32 %v7895_v19, %v7229_v26  ;;  %v5095_v26 = vld [vmem:[#allocation5 + $0x78] sm:$0xf0]  ;;  %v5151_v41 = vld [vmem:[#allocation5 + $0xe8] sm:$0xf0] }
 0x13d   : > { %4359 = vmatpush.bf16.msra.mxu0 %v7134_v24  ;;  %4372 = vmatpush.bf16.msra.mxu1 %v7198_v60  ;;  %v7173_v24 = vld [vmem:[#allocation5 + $0x10b0] sm:$0xf]  ;;  %v7881_v60 = vld [vmem:[#allocation5 + $0x10b4] sm:$0xf0]  ;;  %v5159_v19 = vld [vmem:[#allocation5 + $0xf8] sm:$0xf0] }
 0x13e   : > { %4385 = vmatpush.bf16.msra.mxu2 %v7262_v32  ;;  %4398 = vmatpush.bf16.msra.mxu3 %v7326_v63  ;;  %v7897_v32 = vld [vmem:[#allocation5 + $0x1134] sm:$0xf0]  ;;  %v7301_v63 = vld [vmem:[#allocation5 + $0x11b0] sm:$0xf]  ;;  %v7174_v3 = vor.u32 %v7881_v60, %v7173_v24 }
 0x13f   : > { %v7238_v8 = vor.u32 %v7897_v32, %v7237_v4  ;;  %v7302_v48 = vor.u32 %v7913_v0, %v7301_v63  ;;  %v7893_v24 = vld [vmem:[#allocation5 + $0x1114] sm:$0xf0]  ;;  %v7285_v60 = vld [vmem:[#allocation5 + $0x1190] sm:$0xf]  ;;  %v7859_v32 = vld [vmem:[#allocation5 + $0x1004] sm:$0xf0] }
 0x140   : > { %v7909_v4 = vld [vmem:[#allocation5 + $0x1194] sm:$0xf0]  ;;  %v7149_v63 = vld [vmem:[#allocation5 + $0x1080] sm:$0xf]  ;;  %v7875_v0 = vld [vmem:[#allocation5 + $0x1084] sm:$0xf0] }
 0x141   : > { %4360 = vmatpush.bf16.msra.mxu0 %v7126_v29  ;;  %4373 = vmatpush.bf16.msra.mxu1 %v7190_v47  ;;  %v4133_v29 = vpop.f32.mrf.mxu2  ;;  %v7165_v47 = vld [vmem:[#allocation5 + $0x10a0] sm:$0xf]  ;;  %v4109_v33 = vpop.f32.mrf.mxu0 }
 0x142   : > { %4386 = vmatpush.bf16.msra.mxu2 %v7254_v42  ;;  %4399 = vmatpush.bf16.msra.mxu3 %v7318_v44  ;;  %v4134_v42 = vadd.f32 %v4133_v29, %v4121_v36  ;;  %v4146_v44 = vpop.f32.mrf.mxu3  ;;  %v7166_v38 = vor.u32 %v7879_v25, %v7165_v47  ;;  %v7085_v36 = vld [vmem:[#allocation5 + $0x1000] sm:$0xf]  ;;  %v7286_v29 = vor.u32 %v7909_v4, %v7285_v60  ;;  %v7907_v47 = vld [vmem:[#allocation5 + $0x1184] sm:$0xf0]  ;;  %v7360_v25 = vld [vmem:[#allocation5 + $0x74] sm:$0xf] }
 0x143   : > { %v5223_v33 = vld [vmem:[#allocation5 + $0x178] sm:$0xf0]  ;;  %v7358_v4 = vld [vmem:[#allocation5 + $0x64] sm:$0xf] }
 0x144   : > { %v8681_v23 = vadd.f32 %v4146_v44, %v4134_v42  ;;  %v7376_v44 = vld [vmem:[#allocation5 + $0xf4] sm:$0xf] }
 0x145   : > { %4361 = vmatpush.bf16.msra.mxu0 %v7118_v35  ;;  %4374 = vmatpush.bf16.msra.mxu1 %v7182_v46  ;;  %v7861_v35 = vld [vmem:[#allocation5 + $0x1014] sm:$0xf0]  ;;  %v4122_v46 = vpop.f32.mrf.mxu1  ;;  %v5162_v60 = vor.u32 %v7376_v44, %v5159_v19  ;;  %v7372_v44 = vld [vmem:[#allocation5 + $0xd4] sm:$0xf]  ;;  %v5143_v19 = vld [vmem:[#allocation5 + $0xd8] sm:$0xf0] }
 0x146   : > { %4387 = vmatpush.bf16.msra.mxu2 %v7246_v51  ;;  %4400 = vmatpush.bf16.msra.mxu3 %v7310_v49  ;;  %v7877_v51 = vld [vmem:[#allocation5 + $0x1094] sm:$0xf0]  ;;  %v7221_v49 = vld [vmem:[#allocation5 + $0x1110] sm:$0xf] }
 0x147   : > { %v436_v46 = vld.sshfl [vmem:[#allocation1] sm:$0xff pattern:$0x73625140] }
 0x149   : > { %4362 = vmatpush.bf16.msra.mxu0 %v7110_v20  ;;  %4375 = vmatpush.bf16.msra.mxu1 %v7174_v3  ;;  %v7094_v20 = vor.u32 %v7861_v35, %v7093_v9  ;;  %v7158_v3 = vor.u32 %v7877_v51, %v7157_v61  ;;  %v4135_v42 = vpop.f32.mrf.mxu2  ;;  %v7086_v9 = vor.u32 %v7859_v32, %v7085_v36  ;;  %v437_v51 = vld.sshfl [vmem:[#allocation1 + $0x8] sm:$0xff pattern:$0x73625140] }
 0x14a   : > { %4388 = vmatpush.bf16.msra.mxu2 %v7238_v8  ;;  %4401 = vmatpush.bf16.msra.mxu3 %v7302_v48  ;;  %v7277_v8 = vld [vmem:[#allocation5 + $0x1180] sm:$0xf]  ;;  %v7222_v48 = vor.u32 %v7893_v24, %v7221_v49  ;;  %v4148_v15 = vpop.f32.mrf.mxu3  ;;  %v7150_v35 = vor.u32 %v7875_v0, %v7149_v63  ;;  %v439_v49 = vld.sshfl [vmem:[#allocation1 + $0x18] sm:$0xff pattern:$0x73625140]  ;;  %v5098_v24 = vor.u32 %v7360_v25, %v5095_v26 }
 0x14b   : > { %v7278_v61 = vor.u32 %v7907_v47, %v7277_v8  ;;  %v5087_v42 = vld [vmem:[#allocation5 + $0x68] sm:$0xf0]  ;;  %v5226_v15 = vor.u32 %v7392_v59, %v5223_v33  ;;  %v8683_v36 = vpack.c.bf16 %v436_v46, %v436_v46  ;;  %v7406_v0 = vld [vmem:[#allocation5 + $0x1e4] sm:$0xf]  ;;  %v5079_v47 = vld [vmem:[#allocation5 + $0x58] sm:$0xf0] }
 0x14c   : > { %v5215_v63 = vld [vmem:[#allocation5 + $0x168] sm:$0xf0]  ;;  %v5090_v8 = vor.u32 %v7358_v4, %v5087_v42  ;;  %v7388_v59 = vld [vmem:[#allocation5 + $0x154] sm:$0xf]  ;;  %v5207_v33 = vld [vmem:[#allocation5 + $0x158] sm:$0xf0] }
 0x14d   : > { %4363 = vmatpush.bf16.msra.mxu0 %v7102_v34  ;;  %4376 = vmatpush.bf16.msra.mxu1 %v7166_v38  ;;  %v7408_v34 = vld [vmem:[#allocation5 + $0x1f4] sm:$0xf]  ;;  %v5287_v38 = vld [vmem:[#allocation5 + $0x1f8] sm:$0xf0] }
 0x14e   : > { %4389 = vmatpush.bf16.msra.mxu2 %v7230_v17  ;;  %4402 = vmatpush.bf16.msra.mxu3 %v7294_v37  ;;  %v438_v17 = vld.sshfl [vmem:[#allocation1 + $0x10] sm:$0xff pattern:$0x73625140]  ;;  %v7214_v37 = vor.u32 %v7891_v31, %v7213_v14  ;;  %v5290_v55 = vor.u32 %v7408_v34, %v5287_v38  ;;  %v8687_v14 = vpack.c.bf16 %v437_v51, %v437_v51  ;;  %v7404_v34 = vld [vmem:[#allocation5 + $0x1d4] sm:$0xf] }
 0x14f   : > { %v8685_v32 = vpack.c.bf16 %v438_v17, %v438_v17  ;;  %v8689_v31 = vpack.c.bf16 %v439_v49, %v439_v49  ;;  %v5271_v38 = vld [vmem:[#allocation5 + $0x1d8] sm:$0xf0]  ;;  %v7370_v17 = vld [vmem:[#allocation5 + $0xc4] sm:$0xf]  ;;  %v5199_v51 = vld [vmem:[#allocation5 + $0x148] sm:$0xf0] }
 0x150   : > { %v5274_v46 = vor.u32 %v7404_v34, %v5271_v38  ;;  %v7402_v49 = vld [vmem:[#allocation5 + $0x1c4] sm:$0xf]  ;;  %v5055_v34 = vld [vmem:[#allocation5 + $0x28] sm:$0xf0] }
 0x151   : > { %4364 = vmatpush.bf16.msra.mxu0 %v7094_v20  ;;  %4377 = vmatpush.bf16.msra.mxu1 %v7158_v3  ;;  %v7390_v20 = vld [vmem:[#allocation5 + $0x164] sm:$0xf]  ;;  %v5279_v3 = vld [vmem:[#allocation5 + $0x1e8] sm:$0xf0]  ;;  %8824 = vst [vmem:[#allocation17_spill] sm:$0xff] %v8689_v31 }
 0x152   : > { %4390 = vmatpush.bf16.msra.mxu2 %v7222_v48  ;;  %4403 = vmatpush.bf16.msra.mxu3 %v7286_v29  ;;  %v5154_v48 = vor.u32 %v7374_v52, %v5151_v41  ;;  %v7356_v29 = vld [vmem:[#allocation5 + $0x54] sm:$0xf]  ;;  %v5218_v25 = vor.u32 %v7390_v20, %v5215_v63  ;;  %v5282_v26 = vor.u32 %v7406_v0, %v5279_v3  ;;  %v5063_v0 = vld [vmem:[#allocation5 + $0x38] sm:$0xf0] }
 0x153   : > { %v5082_v41 = vor.u32 %v7356_v29, %v5079_v47  ;;  %v5146_v52 = vor.u32 %v7372_v44, %v5143_v19  ;;  %v7352_v63 = vld [vmem:[#allocation5 + $0x34] sm:$0xf]  ;;  %v5127_v29 = vld [vmem:[#allocation5 + $0xb8] sm:$0xf0] }
 0x154   : > { %v7384_v47 = vld [vmem:[#allocation5 + $0x134] sm:$0xf]  ;;  %v5255_v19 = vld [vmem:[#allocation5 + $0x1b8] sm:$0xf0] }
 0x155   : > { %4365 = vmatpush.bf16.msra.mxu0 %v7086_v9  ;;  %4378 = vmatpush.bf16.msra.mxu1 %v7150_v35  ;;  %v5071_v9 = vld [vmem:[#allocation5 + $0x48] sm:$0xf0]  ;;  %v5210_v35 = vor.u32 %v7388_v59, %v5207_v33  ;;  %v4172_v20 = vpop.f32.mrf.mxu1  ;;  %v7400_v44 = vld [vmem:[#allocation5 + $0x1b4] sm:$0xf]  ;;  %v5066_v59 = vor.u32 %v7352_v63, %v5063_v0  ;;  %v7350_v33 = vld [vmem:[#allocation5 + $0x24] sm:$0xf] }
 0x156   : > { %4391 = vmatpush.bf16.msra.mxu2 %v7214_v37  ;;  %4404 = vmatpush.bf16.msra.mxu3 %v7278_v61  ;;  %v5135_v37 = vld [vmem:[#allocation5 + $0xc8] sm:$0xf0]  ;;  %v7386_v61 = vld [vmem:[#allocation5 + $0x144] sm:$0xf] }
 0x157   : > { %v5202_v3 = vor.u32 %v7386_v61, %v5199_v51  ;;  %v7398_v61 = vld [vmem:[#allocation5 + $0x1a4] sm:$0xf]  ;;  %v5247_v51 = vld [vmem:[#allocation5 + $0x1a8] sm:$0xf0] }
 0x158   : > { %4366 = vmatmul.bf16.vlgmr.msra.gmra.mxu0 %v8683_v36  ;;  %4379 = vmatmul.bf16.vlgmr.msra.gmra.mxu1 %v8687_v14  ;;  %v5250_v0 = vor.u32 %v7398_v61, %v5247_v51  ;;  %v7440_v61 = vld [vmem:[#allocation5 + $0x2f4] sm:$0xf]  ;;  %v5415_v51 = vld [vmem:[#allocation5 + $0x2f8] sm:$0xf0] }
 0x159   : > { %4410 = vmatpush.bf16.msrb.mxu0 %v5098_v24  ;;  %4423 = vmatpush.bf16.msrb.mxu1 %v5162_v60  ;;  %v5263_v24 = vld [vmem:[#allocation5 + $0x1c8] sm:$0xf0]  ;;  %v4159_v60 = vpop.f32.mrf.mxu0 }
 0x15a   : > { %4436 = vmatpush.bf16.msrb.mxu2 %v5226_v15  ;;  %4449 = vmatpush.bf16.msrb.mxu3 %v5290_v55  ;;  %v7354_v55 = vld [vmem:[#allocation5 + $0x44] sm:$0xf]  ;;  %v4160_v4 = vadd.f32 %v4159_v60, %v8681_v23  ;;  %v5138_v15 = vor.u32 %v7370_v17, %v5135_v37  ;;  %v5183_v37 = vld [vmem:[#allocation5 + $0x128] sm:$0xf0]  ;;  %v5058_v60 = vor.u32 %v7350_v33, %v5055_v34 }
 0x15b   : > { %4392 = vmatmul.bf16.vlgmr.msra.gmra.mxu2 %v8685_v32  ;;  %4405 = vmatmul.bf16.vlgmr.msra.gmra.mxu3 %v8689_v31  ;;  %v5074_v42 = vor.u32 %v7354_v55, %v5071_v9  ;;  %v7366_v55 = vld [vmem:[#allocation5 + $0xa4] sm:$0xf]  ;;  %v5119_v9 = vld [vmem:[#allocation5 + $0xa8] sm:$0xf0] }
 0x15c   : > { %v5103_v33 = vld [vmem:[#allocation5 + $0x88] sm:$0xf0]  ;;  %v7454_v31 = vld [vmem:[#allocation5 + $0x364] sm:$0xf] }
 0x15d   : > { %4411 = vmatpush.bf16.msrb.mxu0 %v5090_v8  ;;  %4424 = vmatpush.bf16.msrb.mxu1 %v5154_v48  ;;  %v5266_v8 = vor.u32 %v7402_v49, %v5263_v24  ;;  %v7368_v48 = vld [vmem:[#allocation5 + $0xb4] sm:$0xf] }
 0x15e   : > { %4437 = vmatpush.bf16.msrb.mxu2 %v5218_v25  ;;  %4450 = vmatpush.bf16.msrb.mxu3 %v5282_v26  ;;  %v4173_v25 = vadd.f32 %v4172_v20, %v4160_v4  ;;  %v5191_v26 = vld [vmem:[#allocation5 + $0x138] sm:$0xf0]  ;;  %v5130_v23 = vor.u32 %v7368_v48, %v5127_v29  ;;  %v4198_v17 = vpop.f32.mrf.mxu3  ;;  %v5122_v4 = vor.u32 %v7366_v55, %v5119_v9  ;;  %v4174_v20 = vpop.f32.mrf.mxu1  ;;  %v7380_v48 = vld [vmem:[#allocation5 + $0x114] sm:$0xf]  ;;  %v7394_v55 = vld [vmem:[#allocation5 + $0x184] sm:$0xf] }
 0x15f   : > { %v5194_v38 = vor.u32 %v7384_v47, %v5191_v26  ;;  %v5175_v29 = vld [vmem:[#allocation5 + $0x118] sm:$0xf0]  ;;  %v7396_v47 = vld [vmem:[#allocation5 + $0x194] sm:$0xf]  ;;  %v7346_v26 = vld [vmem:[#allocation5 + $0x4] sm:$0xf] }
 0x160   : > { %v5178_v34 = vor.u32 %v7380_v48, %v5175_v29  ;;  %v5543_v20 = vld [vmem:[#allocation5 + $0x3f8] sm:$0xf0]  ;;  %v7422_v48 = vld [vmem:[#allocation5 + $0x264] sm:$0xf]  ;;  %v5343_v29 = vld [vmem:[#allocation5 + $0x268] sm:$0xf0] }
 0x161   : > { %4412 = vmatpush.bf16.msrb.mxu0 %v5082_v41  ;;  %4425 = vmatpush.bf16.msrb.mxu1 %v5146_v52  ;;  %v5258_v41 = vor.u32 %v7400_v44, %v5255_v19  ;;  %v4185_v52 = vpop.f32.mrf.mxu2  ;;  %v4161_v49 = vpop.f32.mrf.mxu0 }
 0x162   : > { %4438 = vmatpush.bf16.msrb.mxu2 %v5210_v35  ;;  %4451 = vmatpush.bf16.msrb.mxu3 %v5274_v46  ;;  %v7382_v35 = vld [vmem:[#allocation5 + $0x124] sm:$0xf]  ;;  %v4186_v46 = vadd.f32 %v4185_v52, %v4173_v25  ;;  %v5239_v25 = vld [vmem:[#allocation5 + $0x198] sm:$0xf0]  ;;  %v5167_v52 = vld [vmem:[#allocation5 + $0x108] sm:$0xf0] }
 0x163   : > { %v5186_v63 = vor.u32 %v7382_v35, %v5183_v37  ;;  %v5231_v35 = vld [vmem:[#allocation5 + $0x188] sm:$0xf0]  ;;  %v7456_v49 = vld [vmem:[#allocation5 + $0x374] sm:$0xf] }
 0x164   : > { %v8696_v24 = vadd.f32 %v4198_v17, %v4186_v46  ;;  %v7424_v46 = vld [vmem:[#allocation5 + $0x274] sm:$0xf]  ;;  %v5351_v17 = vld [vmem:[#allocation5 + $0x278] sm:$0xf0] }
 0x165   : > { %4413 = vmatpush.bf16.msrb.mxu0 %v5074_v42  ;;  %4426 = vmatpush.bf16.msrb.mxu1 %v5138_v15  ;;  %v7348_v42 = vld [vmem:[#allocation5 + $0x14] sm:$0xf]  ;;  %v5047_v15 = vld [vmem:[#allocation5 + $0x18] sm:$0xf0] }
 0x166   : > { %4439 = vmatpush.bf16.msrb.mxu2 %v5202_v3  ;;  %4452 = vmatpush.bf16.msrb.mxu3 %v5266_v8  ;;  %v7364_v3 = vld [vmem:[#allocation5 + $0x94] sm:$0xf]  ;;  %v5111_v8 = vld [vmem:[#allocation5 + $0x98] sm:$0xf0]  ;;  %v5050_v44 = vor.u32 %v7348_v42, %v5047_v15  ;;  %v4200_v37 = vpop.f32.mrf.mxu3 }
 0x167   : > { %v5114_v19 = vor.u32 %v7364_v3, %v5111_v8  ;;  %v5479_v42 = vld [vmem:[#allocation5 + $0x378] sm:$0xf0]  ;;  %v7472_v15 = vld [vmem:[#allocation5 + $0x3f4] sm:$0xf]  ;;  %v5354_v3 = vor.u32 %v7424_v46, %v5351_v17  ;;  %v5418_v8 = vor.u32 %v7440_v61, %v5415_v51  ;;  %v5407_v37 = vld [vmem:[#allocation5 + $0x2e8] sm:$0xf0] }
 0x168   : > { %v5463_v46 = vld [vmem:[#allocation5 + $0x358] sm:$0xf0]  ;;  %v7468_v17 = vld [vmem:[#allocation5 + $0x3d4] sm:$0xf] }
 0x169   : > { %4414 = vmatpush.bf16.msrb.mxu0 %v5066_v59  ;;  %4427 = vmatpush.bf16.msrb.mxu1 %v5130_v23  ;;  %v5039_v59 = vld [vmem:[#allocation5 + $0x8] sm:$0xf0]  ;;  %v7362_v23 = vld [vmem:[#allocation5 + $0x84] sm:$0xf]  ;;  %v4187_v9 = vpop.f32.mrf.mxu2  ;;  %v5527_v61 = vld [vmem:[#allocation5 + $0x3d8] sm:$0xf0] }
 0x16a   : > { %4440 = vmatpush.bf16.msrb.mxu2 %v5194_v38  ;;  %4453 = vmatpush.bf16.msrb.mxu3 %v5258_v41  ;;  %v5242_v38 = vor.u32 %v7396_v47, %v5239_v25  ;;  %v7378_v41 = vld [vmem:[#allocation5 + $0x104] sm:$0xf]  ;;  %v5482_v47 = vor.u32 %v7456_v49, %v5479_v42  ;;  %v5546_v25 = vor.u32 %v7472_v15, %v5543_v20  ;;  %v5391_v20 = vld [vmem:[#allocation5 + $0x2c8] sm:$0xf0] }
 0x16b   : > { %v7438_v9 = vld [vmem:[#allocation5 + $0x2e4] sm:$0xf]  ;;  %v5530_v42 = vor.u32 %v7468_v17, %v5527_v61  ;;  %v5375_v17 = vld [vmem:[#allocation5 + $0x2a8] sm:$0xf0] }
 0x16c   : > { %v7434_v15 = vld [vmem:[#allocation5 + $0x2c4] sm:$0xf] }
 0x16d   : > { %4415 = vmatpush.bf16.msrb.mxu0 %v5058_v60  ;;  %4428 = vmatpush.bf16.msrb.mxu1 %v5122_v4  ;;  %v5042_v60 = vor.u32 %v7346_v26, %v5039_v59  ;;  %v5106_v4 = vor.u32 %v7362_v23, %v5103_v33  ;;  %v5471_v26 = vld [vmem:[#allocation5 + $0x368] sm:$0xf0]  ;;  %v5346_v59 = vor.u32 %v7422_v48, %v5343_v29  ;;  %v7420_v33 = vld [vmem:[#allocation5 + $0x254] sm:$0xf]  ;;  %v7446_v61 = vld [vmem:[#allocation5 + $0x324] sm:$0xf] }
 0x16e   : > { %4441 = vmatpush.bf16.msrb.mxu2 %v5186_v63  ;;  %4454 = vmatpush.bf16.msrb.mxu3 %v5250_v0  ;;  %v5170_v63 = vor.u32 %v7378_v41, %v5167_v52  ;;  %v5234_v0 = vor.u32 %v7394_v55, %v5231_v35  ;;  %v5410_v23 = vor.u32 %v7438_v9, %v5407_v37  ;;  %v7436_v52 = vld [vmem:[#allocation5 + $0x2d4] sm:$0xf]  ;;  %v5399_v55 = vld [vmem:[#allocation5 + $0x2d8] sm:$0xf0] }
 0x16f   : > { %v7452_v35 = vld [vmem:[#allocation5 + $0x354] sm:$0xf]  ;;  %v5402_v49 = vor.u32 %v7436_v52, %v5399_v55 }
 0x170   : > { %v7416_v29 = vld [vmem:[#allocation5 + $0x234] sm:$0xf] }
 0x171   : > { %4416 = vmatpush.bf16.msrb.mxu0 %v5050_v44  ;;  %4429 = vmatpush.bf16.msrb.mxu1 %v5114_v19  ;;  %v7470_v44 = vld [vmem:[#allocation5 + $0x3e4] sm:$0xf]  ;;  %v5535_v19 = vld [vmem:[#allocation5 + $0x3e8] sm:$0xf0]  ;;  %v7432_v37 = vld [vmem:[#allocation5 + $0x2b4] sm:$0xf] }
 0x172   : > { %4442 = vmatpush.bf16.msrb.mxu2 %v5178_v34  ;;  %4455 = vmatpush.bf16.msrb.mxu3 %v5242_v38  ;;  %v5335_v34 = vld [vmem:[#allocation5 + $0x258] sm:$0xf0]  ;;  %v5474_v38 = vor.u32 %v7454_v31, %v5471_v26  ;;  %v5538_v41 = vor.u32 %v7470_v44, %v5535_v19  ;;  %v7418_v31 = vld [vmem:[#allocation5 + $0x244] sm:$0xf]  ;;  %v7448_v44 = vld [vmem:[#allocation5 + $0x334] sm:$0xf] }
 0x173   : > { %v5338_v51 = vor.u32 %v7420_v33, %v5335_v34  ;;  %v5383_v26 = vld [vmem:[#allocation5 + $0x2b8] sm:$0xf0] }
 0x174   : > { %v5511_v33 = vld [vmem:[#allocation5 + $0x3b8] sm:$0xf0] }
 0x175   : > { %4417 = vmatpush.bf16.msrb.mxu0 %v5042_v60  ;;  %4430 = vmatpush.bf16.msrb.mxu1 %v5106_v4  ;;  %v5327_v60 = vld [vmem:[#allocation5 + $0x248] sm:$0xf0]  ;;  %v5466_v4 = vor.u32 %v7452_v35, %v5463_v46  ;;  %v4224_v48 = vpop.f32.mrf.mxu1  ;;  %v7430_v46 = vld [vmem:[#allocation5 + $0x2a4] sm:$0xf] }
 0x176   : > { %4443 = vmatpush.bf16.msrb.mxu2 %v5170_v63  ;;  %4456 = vmatpush.bf16.msrb.mxu3 %v5234_v0  ;;  %v7450_v63 = vld [vmem:[#allocation5 + $0x344] sm:$0xf] }
 0x177   : > { %v7466_v0 = vld [vmem:[#allocation5 + $0x3c4] sm:$0xf] }
 0x178   : > { %4418 = vmatmul.bf16.vlgmr.msrb.gmra.mxu0 %v8443_v7  ;;  %4431 = vmatmul.bf16.vlgmr.msrb.gmra.mxu1 %v8447_v13  ;;  %v5519_v7 = vld [vmem:[#allocation5 + $0x3c8] sm:$0xf0]  ;;  %v5330_v13 = vor.u32 %v7418_v31, %v5327_v60  ;;  %v7462_v60 = vld [vmem:[#allocation5 + $0x3a4] sm:$0xf] }
 0x179   : > { %4462 = vmatpush.bf16.msra.mxu0 %v5354_v3  ;;  %4475 = vmatpush.bf16.msra.mxu1 %v5418_v8  ;;  %v4211_v3 = vpop.f32.mrf.mxu0  ;;  %v5394_v8 = vor.u32 %v7434_v15, %v5391_v20  ;;  %v5522_v9 = vor.u32 %v7466_v0, %v5519_v7  ;;  %v5439_v31 = vld [vmem:[#allocation5 + $0x328] sm:$0xf0]  ;;  %v5303_v0 = vld [vmem:[#allocation5 + $0x218] sm:$0xf0] }
 0x17a   : > { %4488 = vmatpush.bf16.msra.mxu2 %v5482_v47  ;;  %4501 = vmatpush.bf16.msra.mxu3 %v5546_v25  ;;  %v5319_v47 = vld [vmem:[#allocation5 + $0x238] sm:$0xf0] }
 0x17b   : > { %4444 = vmatmul.bf16.vlgmr.msrb.gmra.mxu2 %v8441_v5  ;;  %4457 = vmatmul.bf16.vlgmr.msrb.gmra.mxu3 %v8445_v12  ;;  %v5455_v5 = vld [vmem:[#allocation5 + $0x348] sm:$0xf0]  ;;  %v4212_v12 = vadd.f32 %v4211_v3, %v8696_v24  ;;  %v5322_v34 = vor.u32 %v7416_v29, %v5319_v47  ;;  %v5386_v24 = vor.u32 %v7432_v37, %v5383_v26  ;;  %v5431_v29 = vld [vmem:[#allocation5 + $0x318] sm:$0xf0]  ;;  %v7460_v47 = vld [vmem:[#allocation5 + $0x394] sm:$0xf] }
 0x17c   : > { %v5458_v25 = vor.u32 %v7450_v63, %v5455_v5  ;;  %v5378_v63 = vor.u32 %v7430_v46, %v5375_v17  ;;  %v7412_v5 = vld [vmem:[#allocation5 + $0x214] sm:$0xf]  ;;  %v5442_v3 = vor.u32 %v7446_v61, %v5439_v31  ;;  %v5671_v61 = vld [vmem:[#allocation5 + $0x4f8] sm:$0xf0] }
 0x17d   : > { %4463 = vmatpush.bf16.msra.mxu0 %v5346_v59  ;;  %4476 = vmatpush.bf16.msra.mxu1 %v5410_v23  ;;  %v4225_v19 = vadd.f32 %v4224_v48, %v4212_v12  ;;  %v5447_v59 = vld [vmem:[#allocation5 + $0x338] sm:$0xf0]  ;;  %v7464_v23 = vld [vmem:[#allocation5 + $0x3b4] sm:$0xf]  ;;  %v4226_v7 = vpop.f32.mrf.mxu1  ;;  %v5306_v37 = vor.u32 %v7412_v5, %v5303_v0 }
 0x17e   : > { %4489 = vmatpush.bf16.msra.mxu2 %v5474_v38  ;;  %4502 = vmatpush.bf16.msra.mxu3 %v5538_v41  ;;  %v7414_v38 = vld [vmem:[#allocation5 + $0x224] sm:$0xf]  ;;  %v5311_v41 = vld [vmem:[#allocation5 + $0x228] sm:$0xf0]  ;;  %v5450_v52 = vor.u32 %v7448_v44, %v5447_v59  ;;  %v5514_v55 = vor.u32 %v7464_v23, %v5511_v33  ;;  %v4237_v35 = vpop.f32.mrf.mxu2  ;;  %v7444_v48 = vld [vmem:[#allocation5 + $0x314] sm:$0xf] }
 0x17f   : > { %v5314_v20 = vor.u32 %v7414_v38, %v5311_v41  ;;  %v5295_v44 = vld [vmem:[#allocation5 + $0x208] sm:$0xf0]  ;;  %v5434_v23 = vor.u32 %v7444_v48, %v5431_v29  ;;  %v7458_v38 = vld [vmem:[#allocation5 + $0x384] sm:$0xf]  ;;  %v7504_v17 = vld [vmem:[#allocation5 + $0x4f4] sm:$0xf] }
 0x180   : > { %v5359_v59 = vld [vmem:[#allocation5 + $0x288] sm:$0xf0]  ;;  %v5674_v0 = vor.u32 %v7504_v17, %v5671_v61  ;;  %v7486_v7 = vld [vmem:[#allocation5 + $0x464] sm:$0xf] }
 0x181   : > { %4464 = vmatpush.bf16.msra.mxu0 %v5338_v51  ;;  %4477 = vmatpush.bf16.msra.mxu1 %v5402_v49  ;;  %v4238_v51 = vadd.f32 %v4237_v35, %v4225_v19  ;;  %v4250_v49 = vpop.f32.mrf.mxu3  ;;  %v7426_v19 = vld [vmem:[#allocation5 + $0x284] sm:$0xf]  ;;  %v5607_v35 = vld [vmem:[#allocation5 + $0x478] sm:$0xf0]  ;;  %v5663_v48 = vld [vmem:[#allocation5 + $0x4e8] sm:$0xf0] }
 0x182   : > { %4490 = vmatpush.bf16.msra.mxu2 %v5466_v4  ;;  %4503 = vmatpush.bf16.msra.mxu3 %v5530_v42  ;;  %v5503_v4 = vld [vmem:[#allocation5 + $0x3a8] sm:$0xf0]  ;;  %v4213_v42 = vpop.f32.mrf.mxu0  ;;  %v5362_v31 = vor.u32 %v7426_v19, %v5359_v59  ;;  %v7518_v29 = vld [vmem:[#allocation5 + $0x564] sm:$0xf]  ;;  %v5591_v19 = vld [vmem:[#allocation5 + $0x458] sm:$0xf0] }
 0x183   : > { %v8703_v15 = vadd.f32 %v4250_v49, %v4238_v51  ;;  %v5506_v12 = vor.u32 %v7462_v60, %v5503_v4  ;;  %v7520_v51 = vld [vmem:[#allocation5 + $0x574] sm:$0xf]  ;;  %v5735_v60 = vld [vmem:[#allocation5 + $0x578] sm:$0xf0]  ;;  %v5583_v17 = vld [vmem:[#allocation5 + $0x448] sm:$0xf0] }
 0x184   : > { %v7536_v4 = vld [vmem:[#allocation5 + $0x5f4] sm:$0xf]  ;;  %v5799_v42 = vld [vmem:[#allocation5 + $0x5f8] sm:$0xf0] }
 0x185   : > { %4465 = vmatpush.bf16.msra.mxu0 %v5330_v13  ;;  %4478 = vmatpush.bf16.msra.mxu1 %v5394_v8  ;;  %v7428_v13 = vld [vmem:[#allocation5 + $0x294] sm:$0xf]  ;;  %v5367_v8 = vld [vmem:[#allocation5 + $0x298] sm:$0xf0] }
 0x186   : > { %4491 = vmatpush.bf16.msra.mxu2 %v5458_v25  ;;  %4504 = vmatpush.bf16.msra.mxu3 %v5522_v9  ;;  %v5495_v25 = vld [vmem:[#allocation5 + $0x398] sm:$0xf0]  ;;  %v7410_v9 = vld [vmem:[#allocation5 + $0x204] sm:$0xf]  ;;  %v5370_v26 = vor.u32 %v7428_v13, %v5367_v8  ;;  %v4239_v41 = vpop.f32.mrf.mxu2  ;;  %v5802_v13 = vor.u32 %v7536_v4, %v5799_v42 }
 0x187   : > { %v5498_v33 = vor.u32 %v7460_v47, %v5495_v25  ;;  %v5298_v49 = vor.u32 %v7410_v9, %v5295_v44  ;;  %v7502_v8 = vld [vmem:[#allocation5 + $0x4e4] sm:$0xf]  ;;  %v5727_v47 = vld [vmem:[#allocation5 + $0x568] sm:$0xf0]  ;;  %v7484_v44 = vld [vmem:[#allocation5 + $0x454] sm:$0xf] }
 0x188   : > { %v7534_v25 = vld [vmem:[#allocation5 + $0x5e4] sm:$0xf]  ;;  %v5791_v9 = vld [vmem:[#allocation5 + $0x5e8] sm:$0xf0]  ;;  %v5730_v59 = vor.u32 %v7518_v29, %v5727_v47  ;;  %v7532_v41 = vld [vmem:[#allocation5 + $0x5d4] sm:$0xf] }
 0x189   : > { %4466 = vmatpush.bf16.msra.mxu0 %v5322_v34  ;;  %4479 = vmatpush.bf16.msra.mxu1 %v5386_v24  ;;  %v7442_v34 = vld [vmem:[#allocation5 + $0x304] sm:$0xf]  ;;  %v5423_v24 = vld [vmem:[#allocation5 + $0x308] sm:$0xf0]  ;;  %v4252_v46 = vpop.f32.mrf.mxu3  ;;  %v5703_v29 = vld [vmem:[#allocation5 + $0x538] sm:$0xf0] }
 0x18a   : > { %4492 = vmatpush.bf16.msra.mxu2 %v5450_v52  ;;  %4505 = vmatpush.bf16.msra.mxu3 %v5514_v55  ;;  %v5487_v52 = vld [vmem:[#allocation5 + $0x388] sm:$0xf0]  ;;  %v7488_v55 = vld [vmem:[#allocation5 + $0x474] sm:$0xf]  ;;  %v7482_v46 = vld [vmem:[#allocation5 + $0x444] sm:$0xf] }
 0x18b   : > { %v5610_v5 = vor.u32 %v7488_v55, %v5607_v35  ;;  %v5594_v55 = vor.u32 %v7484_v44, %v5591_v19  ;;  %v7530_v4 = vld [vmem:[#allocation5 + $0x5c4] sm:$0xf]  ;;  %v7528_v47 = vld [vmem:[#allocation5 + $0x5b4] sm:$0xf] }
 0x18d   : > { %4467 = vmatpush.bf16.msra.mxu0 %v5314_v20  ;;  %4480 = vmatpush.bf16.msra.mxu1 %v5378_v63  ;;  %v5426_v20 = vor.u32 %v7442_v34, %v5423_v24  ;;  %v5490_v63 = vor.u32 %v7458_v38, %v5487_v52  ;;  %v5655_v34 = vld [vmem:[#allocation5 + $0x4d8] sm:$0xf0]  ;;  %v7516_v24 = vld [vmem:[#allocation5 + $0x554] sm:$0xf] }
 0x18e   : > { %4493 = vmatpush.bf16.msra.mxu2 %v5442_v3  ;;  %4506 = vmatpush.bf16.msra.mxu3 %v5506_v12  ;;  %v5599_v3 = vld [vmem:[#allocation5 + $0x468] sm:$0xf0]  ;;  %v5738_v12 = vor.u32 %v7520_v51, %v5735_v60  ;;  %v5719_v38 = vld [vmem:[#allocation5 + $0x558] sm:$0xf0] }
 0x18f   : > { %v5783_v52 = vld [vmem:[#allocation5 + $0x5d8] sm:$0xf0]  ;;  %v5722_v61 = vor.u32 %v7516_v24, %v5719_v38  ;;  %v5711_v60 = vld [vmem:[#allocation5 + $0x548] sm:$0xf0] }
 0x190   : > { %v5786_v51 = vor.u32 %v7532_v41, %v5783_v52  ;;  %v5695_v41 = vld [vmem:[#allocation5 + $0x528] sm:$0xf0]  ;;  %v7526_v52 = vld [vmem:[#allocation5 + $0x5a4] sm:$0xf] }
 0x191   : > { %4468 = vmatpush.bf16.msra.mxu0 %v5306_v37  ;;  %4481 = vmatpush.bf16.msra.mxu1 %v5370_v26  ;;  %v5602_v37 = vor.u32 %v7486_v7, %v5599_v3  ;;  %v5666_v26 = vor.u32 %v7502_v8, %v5663_v48  ;;  %v7512_v8 = vld [vmem:[#allocation5 + $0x534] sm:$0xf] }
 0x192   : > { %4494 = vmatpush.bf16.msra.mxu2 %v5434_v23  ;;  %4507 = vmatpush.bf16.msra.mxu3 %v5498_v33  ;;  %v5794_v23 = vor.u32 %v7534_v25, %v5791_v9  ;;  %v7500_v33 = vld [vmem:[#allocation5 + $0x4d4] sm:$0xf]  ;;  %v5767_v25 = vld [vmem:[#allocation5 + $0x5b8] sm:$0xf0]  ;;  %v5706_v44 = vor.u32 %v7512_v8, %v5703_v29  ;;  %v5679_v29 = vld [vmem:[#allocation5 + $0x508] sm:$0xf0] }
 0x193   : > { %v5658_v35 = vor.u32 %v7500_v33, %v5655_v34  ;;  %v5770_v19 = vor.u32 %v7528_v47, %v5767_v25  ;;  %v5631_v33 = vld [vmem:[#allocation5 + $0x4a8] sm:$0xf0]  ;;  %v7510_v34 = vld [vmem:[#allocation5 + $0x524] sm:$0xf] }
 0x194   : > { %v7522_v47 = vld [vmem:[#allocation5 + $0x584] sm:$0xf] }
 0x195   : > { %4469 = vmatpush.bf16.msra.mxu0 %v5298_v49  ;;  %4482 = vmatpush.bf16.msra.mxu1 %v5362_v31  ;;  %v5647_v49 = vld [vmem:[#allocation5 + $0x4c8] sm:$0xf0]  ;;  %v7514_v31 = vld [vmem:[#allocation5 + $0x544] sm:$0xf]  ;;  %v4263_v42 = vpop.f32.mrf.mxu0 }
 0x196   : > { %4495 = vmatpush.bf16.msra.mxu2 %v5426_v20  ;;  %4508 = vmatpush.bf16.msra.mxu3 %v5490_v63  ;;  %v4276_v63 = vpop.f32.mrf.mxu1  ;;  %v5714_v7 = vor.u32 %v7514_v31, %v5711_v60  ;;  %v5698_v31 = vor.u32 %v7510_v34, %v5695_v41  ;;  %v5991_v34 = vld [vmem:[#allocation5 + $0x778] sm:$0xf0] }
 0x198   : > { %4470 = vmatmul.bf16.vlgmr.msra.gmra.mxu0 %v8461_v16  ;;  %4483 = vmatmul.bf16.vlgmr.msra.gmra.mxu1 %v8469_v22  ;;  %v5775_v16 = vld [vmem:[#allocation5 + $0x5c8] sm:$0xf0]  ;;  %v5586_v22 = vor.u32 %v7482_v46, %v5583_v17 }
 0x199   : > { %4514 = vmatpush.bf16.msrb.mxu0 %v5610_v5  ;;  %4527 = vmatpush.bf16.msrb.mxu1 %v5674_v0  ;;  %v7480_v5 = vld [vmem:[#allocation5 + $0x434] sm:$0xf]  ;;  %v5575_v0 = vld [vmem:[#allocation5 + $0x438] sm:$0xf0]  ;;  %v5778_v3 = vor.u32 %v7530_v4, %v5775_v16 }
 0x19a   : > { %4540 = vmatpush.bf16.msrb.mxu2 %v5738_v12  ;;  %4553 = vmatpush.bf16.msrb.mxu3 %v5802_v13  ;;  %v7496_v12 = vld [vmem:[#allocation5 + $0x4b4] sm:$0xf]  ;;  %v5639_v13 = vld [vmem:[#allocation5 + $0x4b8] sm:$0xf0]  ;;  %v5578_v9 = vor.u32 %v7480_v5, %v5575_v0 }
 0x19b   : > { %4496 = vmatmul.bf16.vlgmr.msra.gmra.mxu2 %v8459_v11  ;;  %4509 = vmatmul.bf16.vlgmr.msra.gmra.mxu3 %v8467_v21  ;;  %v7498_v11 = vld [vmem:[#allocation5 + $0x4c4] sm:$0xf]  ;;  %v4264_v21 = vadd.f32 %v4263_v42, %v8703_v15  ;;  %v5642_v15 = vor.u32 %v7496_v12, %v5639_v13  ;;  %v7492_v4 = vld [vmem:[#allocation5 + $0x494] sm:$0xf]  ;;  %v5623_v16 = vld [vmem:[#allocation5 + $0x498] sm:$0xf0] }
 0x19c   : > { %v5650_v20 = vor.u32 %v7498_v11, %v5647_v49  ;;  %v5559_v11 = vld [vmem:[#allocation5 + $0x418] sm:$0xf0]  ;;  %v7508_v42 = vld [vmem:[#allocation5 + $0x514] sm:$0xf]  ;;  %v5626_v0 = vor.u32 %v7492_v4, %v5623_v16  ;;  %v5615_v12 = vld [vmem:[#allocation5 + $0x488] sm:$0xf0] }
 0x19d   : > { %4515 = vmatpush.bf16.msrb.mxu0 %v5602_v37  ;;  %4528 = vmatpush.bf16.msrb.mxu1 %v5666_v26  ;;  %v4277_v48 = vadd.f32 %v4276_v63, %v4264_v21  ;;  %v7478_v37 = vld [vmem:[#allocation5 + $0x424] sm:$0xf]  ;;  %v5567_v26 = vld [vmem:[#allocation5 + $0x428] sm:$0xf0]  ;;  %v5687_v21 = vld [vmem:[#allocation5 + $0x518] sm:$0xf0] }
 0x19e   : > { %4541 = vmatpush.bf16.msrb.mxu2 %v5730_v59  ;;  %4554 = vmatpush.bf16.msrb.mxu3 %v5794_v23  ;;  %v4289_v59 = vpop.f32.mrf.mxu2  ;;  %v7494_v23 = vld [vmem:[#allocation5 + $0x4a4] sm:$0xf]  ;;  %v4302_v38 = vpop.f32.mrf.mxu3  ;;  %v5570_v17 = vor.u32 %v7478_v37, %v5567_v26  ;;  %v5690_v13 = vor.u32 %v7508_v42, %v5687_v21  ;;  %v5863_v37 = vld [vmem:[#allocation5 + $0x678] sm:$0xf0]  ;;  %v5983_v4 = vld [vmem:[#allocation5 + $0x768] sm:$0xf0] }
 0x19f   : > { %v4290_v24 = vadd.f32 %v4289_v59, %v4277_v48  ;;  %v4278_v49 = vpop.f32.mrf.mxu1  ;;  %v7474_v63 = vld [vmem:[#allocation5 + $0x404] sm:$0xf]  ;;  %v7584_v59 = vld [vmem:[#allocation5 + $0x774] sm:$0xf]  ;;  %v6047_v42 = vld [vmem:[#allocation5 + $0x7e8] sm:$0xf0] }
 0x1a0   : > { %v7506_v48 = vld [vmem:[#allocation5 + $0x504] sm:$0xf] }
 0x1a1   : > { %4516 = vmatpush.bf16.msrb.mxu0 %v5594_v55  ;;  %4529 = vmatpush.bf16.msrb.mxu1 %v5658_v35  ;;  %v5759_v55 = vld [vmem:[#allocation5 + $0x5a8] sm:$0xf0]  ;;  %v4265_v35 = vpop.f32.mrf.mxu0  ;;  %v8710_v46 = vadd.f32 %v4302_v38, %v4290_v24  ;;  %v7600_v24 = vld [vmem:[#allocation5 + $0x7f4] sm:$0xf]  ;;  %v6055_v38 = vld [vmem:[#allocation5 + $0x7f8] sm:$0xf0]  ;;  %v5682_v41 = vor.u32 %v7506_v48, %v5679_v29 }
 0x1a2   : > { %4542 = vmatpush.bf16.msrb.mxu2 %v5722_v61  ;;  %4555 = vmatpush.bf16.msrb.mxu3 %v5786_v51  ;;  %v5634_v61 = vor.u32 %v7494_v23, %v5631_v33  ;;  %v7476_v51 = vld [vmem:[#allocation5 + $0x414] sm:$0xf]  ;;  %v5762_v60 = vor.u32 %v7526_v52, %v5759_v55  ;;  %v7566_v49 = vld [vmem:[#allocation5 + $0x6e4] sm:$0xf]  ;;  %v6039_v48 = vld [vmem:[#allocation5 + $0x7d8] sm:$0xf0] }
 0x1a3   : > { %v5562_v5 = vor.u32 %v7476_v51, %v5559_v11  ;;  %v5994_v51 = vor.u32 %v7584_v59, %v5991_v34  ;;  %v6058_v11 = vor.u32 %v7600_v24, %v6055_v38  ;;  %v7598_v16 = vld [vmem:[#allocation5 + $0x7e4] sm:$0xf]  ;;  %v6031_v59 = vld [vmem:[#allocation5 + $0x7c8] sm:$0xf0]  ;;  %v7544_v24 = vld [vmem:[#allocation5 + $0x634] sm:$0xf] }
 0x1a4   : > { %v5831_v38 = vld [vmem:[#allocation5 + $0x638] sm:$0xf0] }
 0x1a5   : > { %4517 = vmatpush.bf16.msrb.mxu0 %v5586_v22  ;;  %4530 = vmatpush.bf16.msrb.mxu1 %v5650_v20  ;;  %v7524_v22 = vld [vmem:[#allocation5 + $0x594] sm:$0xf]  ;;  %v5751_v20 = vld [vmem:[#allocation5 + $0x598] sm:$0xf0] }
 0x1a6   : > { %4543 = vmatpush.bf16.msrb.mxu2 %v5714_v7  ;;  %4556 = vmatpush.bf16.msrb.mxu3 %v5778_v3  ;;  %v5551_v7 = vld [vmem:[#allocation5 + $0x408] sm:$0xf0]  ;;  %v7490_v3 = vld [vmem:[#allocation5 + $0x484] sm:$0xf]  ;;  %v5754_v8 = vor.u32 %v7524_v22, %v5751_v20  ;;  %v4291_v25 = vpop.f32.mrf.mxu2  ;;  %v4304_v26 = vpop.f32.mrf.mxu3  ;;  %v7548_v20 = vld [vmem:[#allocation5 + $0x654] sm:$0xf] }
 0x1a7   : > { %v5554_v23 = vor.u32 %v7474_v63, %v5551_v7  ;;  %v5618_v33 = vor.u32 %v7490_v3, %v5615_v12  ;;  %v5847_v63 = vld [vmem:[#allocation5 + $0x658] sm:$0xf0]  ;;  %v7564_v7 = vld [vmem:[#allocation5 + $0x6d4] sm:$0xf]  ;;  %v7546_v25 = vld [vmem:[#allocation5 + $0x644] sm:$0xf] }
 0x1a8   : > { %v5911_v3 = vld [vmem:[#allocation5 + $0x6d8] sm:$0xf0]  ;;  %v7580_v12 = vld [vmem:[#allocation5 + $0x754] sm:$0xf]  ;;  %v5850_v29 = vor.u32 %v7548_v20, %v5847_v63  ;;  %v5903_v26 = vld [vmem:[#allocation5 + $0x6c8] sm:$0xf0] }
 0x1a9   : > { %4518 = vmatpush.bf16.msrb.mxu0 %v5578_v9  ;;  %4531 = vmatpush.bf16.msrb.mxu1 %v5642_v15  ;;  %v5743_v9 = vld [vmem:[#allocation5 + $0x588] sm:$0xf0]  ;;  %v7552_v15 = vld [vmem:[#allocation5 + $0x674] sm:$0xf]  ;;  %v7574_v63 = vld [vmem:[#allocation5 + $0x724] sm:$0xf] }
 0x1aa   : > { %4544 = vmatpush.bf16.msrb.mxu2 %v5706_v44  ;;  %4557 = vmatpush.bf16.msrb.mxu3 %v5770_v19  ;;  %v7568_v44 = vld [vmem:[#allocation5 + $0x6f4] sm:$0xf]  ;;  %v5927_v19 = vld [vmem:[#allocation5 + $0x6f8] sm:$0xf0]  ;;  %v5746_v52 = vor.u32 %v7522_v47, %v5743_v9  ;;  %v5866_v55 = vor.u32 %v7552_v15, %v5863_v37  ;;  %v5914_v47 = vor.u32 %v7564_v7, %v5911_v3  ;;  %v5839_v9 = vld [vmem:[#allocation5 + $0x648] sm:$0xf0] }
 0x1ab   : > { %v5930_v35 = vor.u32 %v7568_v44, %v5927_v19  ;;  %v5967_v44 = vld [vmem:[#allocation5 + $0x748] sm:$0xf0]  ;;  %v7594_v19 = vld [vmem:[#allocation5 + $0x7c4] sm:$0xf] }
 0x1ac   : > { %v5887_v20 = vld [vmem:[#allocation5 + $0x6a8] sm:$0xf0]  ;;  %v7590_v3 = vld [vmem:[#allocation5 + $0x7a4] sm:$0xf] }
 0x1ad   : > { %4519 = vmatpush.bf16.msrb.mxu0 %v5570_v17  ;;  %4532 = vmatpush.bf16.msrb.mxu1 %v5634_v61  ;;  %v7550_v17 = vld [vmem:[#allocation5 + $0x664] sm:$0xf]  ;;  %v5855_v61 = vld [vmem:[#allocation5 + $0x668] sm:$0xf0] }
 0x1ae   : > { %4545 = vmatpush.bf16.msrb.mxu2 %v5698_v31  ;;  %4558 = vmatpush.bf16.msrb.mxu3 %v5762_v60  ;;  %v5919_v31 = vld [vmem:[#allocation5 + $0x6e8] sm:$0xf0]  ;;  %v7582_v60 = vld [vmem:[#allocation5 + $0x764] sm:$0xf]  ;;  %v5858_v21 = vor.u32 %v7550_v17, %v5855_v61  ;;  %v7576_v17 = vld [vmem:[#allocation5 + $0x734] sm:$0xf] }
 0x1af   : > { %v5922_v22 = vor.u32 %v7566_v49, %v5919_v31  ;;  %v6023_v49 = vld [vmem:[#allocation5 + $0x7b8] sm:$0xf0]  ;;  %v5834_v31 = vor.u32 %v7544_v24, %v5831_v38  ;;  %v5951_v7 = vld [vmem:[#allocation5 + $0x728] sm:$0xf0] }
 0x1b0   : > { %v5871_v24 = vld [vmem:[#allocation5 + $0x688] sm:$0xf0] }
 0x1b1   : > { %4520 = vmatpush.bf16.msrb.mxu0 %v5562_v5  ;;  %4533 = vmatpush.bf16.msrb.mxu1 %v5626_v0  ;;  %v5986_v5 = vor.u32 %v7582_v60, %v5983_v4  ;;  %v6050_v0 = vor.u32 %v7598_v16, %v6047_v42  ;;  %v7542_v60 = vld [vmem:[#allocation5 + $0x624] sm:$0xf]  ;;  %v5823_v4 = vld [vmem:[#allocation5 + $0x628] sm:$0xf0] }
 0x1b2   : > { %4546 = vmatpush.bf16.msrb.mxu2 %v5690_v13  ;;  %4559 = vmatpush.bf16.msrb.mxu3 %v5754_v8  ;;  %v5975_v13 = vld [vmem:[#allocation5 + $0x758] sm:$0xf0]  ;;  %v7596_v8 = vld [vmem:[#allocation5 + $0x7d4] sm:$0xf] }
 0x1b3   : > { %v5978_v15 = vor.u32 %v7580_v12, %v5975_v13  ;;  %v6042_v37 = vor.u32 %v7596_v8, %v6039_v48  ;;  %v6015_v12 = vld [vmem:[#allocation5 + $0x7a8] sm:$0xf0]  ;;  %v5826_v48 = vor.u32 %v7542_v60, %v5823_v4  ;;  %v7648_v60 = vld [vmem:[#allocation5 + $0x974] sm:$0xf] }
 0x1b5   : > { %4521 = vmatpush.bf16.msrb.mxu0 %v5554_v23  ;;  %4534 = vmatpush.bf16.msrb.mxu1 %v5618_v33  ;;  %v4315_v23 = vpop.f32.mrf.mxu0  ;;  %v4328_v34 = vpop.f32.mrf.mxu1 }
 0x1b6   : > { %4547 = vmatpush.bf16.msrb.mxu2 %v5682_v41  ;;  %4560 = vmatpush.bf16.msrb.mxu3 %v5746_v52  ;;  %v6034_v52 = vor.u32 %v7594_v19, %v6031_v59  ;;  %v7588_v19 = vld [vmem:[#allocation5 + $0x794] sm:$0xf]  ;;  %v6007_v59 = vld [vmem:[#allocation5 + $0x798] sm:$0xf0] }
 0x1b8   : > { %4522 = vmatmul.bf16.vlgmr.msrb.gmra.mxu0 %v8505_v50  ;;  %4535 = vmatmul.bf16.vlgmr.msrb.gmra.mxu1 %v8513_v58  ;;  %v7562_v50 = vld [vmem:[#allocation5 + $0x6c4] sm:$0xf]  ;;  %v4316_v58 = vadd.f32 %v4315_v23, %v8710_v46 }
 0x1b9   : > { %4566 = vmatpush.bf16.msra.mxu0 %v5866_v55  ;;  %4579 = vmatpush.bf16.msra.mxu1 %v5930_v35  ;;  %v5906_v33 = vor.u32 %v7562_v50, %v5903_v26  ;;  %v7560_v55 = vld [vmem:[#allocation5 + $0x6b4] sm:$0xf]  ;;  %v5895_v35 = vld [vmem:[#allocation5 + $0x6b8] sm:$0xf0]  ;;  %v7538_v23 = vld [vmem:[#allocation5 + $0x604] sm:$0xf] }
 0x1ba   : > { %4592 = vmatpush.bf16.msra.mxu2 %v5994_v51  ;;  %4605 = vmatpush.bf16.msra.mxu3 %v6058_v11  ;;  %v4329_v61 = vadd.f32 %v4328_v34, %v4316_v58  ;;  %v5959_v51 = vld [vmem:[#allocation5 + $0x738] sm:$0xf0]  ;;  %v7592_v11 = vld [vmem:[#allocation5 + $0x7b4] sm:$0xf]  ;;  %v5898_v46 = vor.u32 %v7560_v55, %v5895_v35  ;;  %v7554_v34 = vld [vmem:[#allocation5 + $0x684] sm:$0xf] }
 0x1bb   : > { %4548 = vmatmul.bf16.vlgmr.msrb.gmra.mxu2 %v8509_v53  ;;  %4561 = vmatmul.bf16.vlgmr.msrb.gmra.mxu3 %v8517_v62  ;;  %v7578_v53 = vld [vmem:[#allocation5 + $0x744] sm:$0xf]  ;;  %v5842_v62 = vor.u32 %v7546_v25, %v5839_v9  ;;  %v5962_v16 = vor.u32 %v7576_v17, %v5959_v51  ;;  %v6026_v42 = vor.u32 %v7592_v11, %v6023_v49  ;;  %v5815_v25 = vld [vmem:[#allocation5 + $0x618] sm:$0xf0]  ;;  %v7556_v50 = vld [vmem:[#allocation5 + $0x694] sm:$0xf] }
 0x1bc   : > { %v5970_v41 = vor.u32 %v7578_v53, %v5967_v44  ;;  %v5879_v26 = vld [vmem:[#allocation5 + $0x698] sm:$0xf0]  ;;  %v7572_v53 = vld [vmem:[#allocation5 + $0x714] sm:$0xf]  ;;  %v5935_v55 = vld [vmem:[#allocation5 + $0x708] sm:$0xf0] }
 0x1bd   : > { %4567 = vmatpush.bf16.msra.mxu0 %v5858_v21  ;;  %4580 = vmatpush.bf16.msra.mxu1 %v5922_v22  ;;  %v7558_v22 = vld [vmem:[#allocation5 + $0x6a4] sm:$0xf]  ;;  %v4317_v13 = vpop.f32.mrf.mxu0  ;;  %v4330_v9 = vpop.f32.mrf.mxu1  ;;  %v5943_v44 = vld [vmem:[#allocation5 + $0x718] sm:$0xf0]  ;;  %v7616_v51 = vld [vmem:[#allocation5 + $0x874] sm:$0xf] }
 0x1be   : > { %4593 = vmatpush.bf16.msra.mxu2 %v5986_v5  ;;  %4606 = vmatpush.bf16.msra.mxu3 %v6050_v0  ;;  %v4341_v21 = vpop.f32.mrf.mxu2  ;;  %v4354_v0 = vpop.f32.mrf.mxu3  ;;  %v5946_v38 = vor.u32 %v7572_v53, %v5943_v44  ;;  %v7586_v35 = vld [vmem:[#allocation5 + $0x784] sm:$0xf]  ;;  %v6119_v11 = vld [vmem:[#allocation5 + $0x878] sm:$0xf0] }
 0x1bf   : > { %v4342_v5 = vadd.f32 %v4341_v21, %v4329_v61  ;;  %v5999_v61 = vld [vmem:[#allocation5 + $0x788] sm:$0xf0]  ;;  %v7664_v21 = vld [vmem:[#allocation5 + $0x9f4] sm:$0xf]  ;;  %v7662_v9 = vld [vmem:[#allocation5 + $0x9e4] sm:$0xf] }
 0x1c0   : > { %v6103_v53 = vld [vmem:[#allocation5 + $0x858] sm:$0xf0] }
 0x1c1   : > { %4568 = vmatpush.bf16.msra.mxu0 %v5850_v29  ;;  %4581 = vmatpush.bf16.msra.mxu1 %v5914_v47  ;;  %v8717_v8 = vadd.f32 %v4354_v0, %v4342_v5  ;;  %v5890_v29 = vor.u32 %v7558_v22, %v5887_v20  ;;  %v7540_v47 = vld [vmem:[#allocation5 + $0x614] sm:$0xf]  ;;  %v6311_v22 = vld [vmem:[#allocation5 + $0x9f8] sm:$0xf0]  ;;  %v6122_v5 = vor.u32 %v7616_v51, %v6119_v11  ;;  %v7658_v51 = vld [vmem:[#allocation5 + $0x9c4] sm:$0xf] }
 0x1c2   : > { %4594 = vmatpush.bf16.msra.mxu2 %v5978_v15  ;;  %4607 = vmatpush.bf16.msra.mxu3 %v6042_v37  ;;  %v5954_v15 = vor.u32 %v7574_v63, %v5951_v7  ;;  %v6018_v37 = vor.u32 %v7590_v3, %v6015_v12  ;;  %v5818_v58 = vor.u32 %v7540_v47, %v5815_v25  ;;  %v7614_v7 = vld [vmem:[#allocation5 + $0x864] sm:$0xf]  ;;  %v6111_v3 = vld [vmem:[#allocation5 + $0x868] sm:$0xf0] }
 0x1c3   : > { %v6002_v63 = vor.u32 %v7586_v35, %v5999_v61  ;;  %v6314_v13 = vor.u32 %v7664_v21, %v6311_v22  ;;  %v7646_v47 = vld [vmem:[#allocation5 + $0x964] sm:$0xf]  ;;  %v6239_v25 = vld [vmem:[#allocation5 + $0x968] sm:$0xf0]  ;;  %v7624_v21 = vld [vmem:[#allocation5 + $0x8b4] sm:$0xf] }
 0x1c4   : > { %v6242_v44 = vor.u32 %v7646_v47, %v6239_v25  ;;  %v6223_v61 = vld [vmem:[#allocation5 + $0x948] sm:$0xf0]  ;;  %v6151_v22 = vld [vmem:[#allocation5 + $0x8b8] sm:$0xf0]  ;;  %v7622_v25 = vld [vmem:[#allocation5 + $0x8a4] sm:$0xf] }
 0x1c5   : > { %4569 = vmatpush.bf16.msra.mxu0 %v5842_v62  ;;  %4582 = vmatpush.bf16.msra.mxu1 %v5906_v33  ;;  %v5882_v62 = vor.u32 %v7556_v50, %v5879_v26  ;;  %v5807_v33 = vld [vmem:[#allocation5 + $0x608] sm:$0xf0]  ;;  %v7612_v26 = vld [vmem:[#allocation5 + $0x854] sm:$0xf] }
 0x1c6   : > { %4595 = vmatpush.bf16.msra.mxu2 %v5970_v41  ;;  %4608 = vmatpush.bf16.msra.mxu3 %v6034_v52  ;;  %v6010_v41 = vor.u32 %v7588_v19, %v6007_v59  ;;  %v7570_v52 = vld [vmem:[#allocation5 + $0x704] sm:$0xf]  ;;  %v4343_v17 = vpop.f32.mrf.mxu2  ;;  %v4356_v49 = vpop.f32.mrf.mxu3  ;;  %v5810_v4 = vor.u32 %v7538_v23, %v5807_v33  ;;  %v7628_v59 = vld [vmem:[#allocation5 + $0x8d4] sm:$0xf]  ;;  %v6167_v23 = vld [vmem:[#allocation5 + $0x8d8] sm:$0xf0] }
 0x1c7   : > { %v5938_v20 = vor.u32 %v7570_v52, %v5935_v55  ;;  %v7660_v33 = vld [vmem:[#allocation5 + $0x9d4] sm:$0xf]  ;;  %v6095_v52 = vld [vmem:[#allocation5 + $0x848] sm:$0xf0] }
 0x1c8   : > { %v6159_v17 = vld [vmem:[#allocation5 + $0x8c8] sm:$0xf0] }
 0x1c9   : > { %4570 = vmatpush.bf16.msra.mxu0 %v5834_v31  ;;  %4583 = vmatpush.bf16.msra.mxu1 %v5898_v46  ;;  %v7632_v31 = vld [vmem:[#allocation5 + $0x8f4] sm:$0xf]  ;;  %v6183_v46 = vld [vmem:[#allocation5 + $0x8f8] sm:$0xf0]  ;;  %v6287_v11 = vld [vmem:[#allocation5 + $0x9c8] sm:$0xf0] }
 0x1ca   : > { %4596 = vmatpush.bf16.msra.mxu2 %v5962_v16  ;;  %4609 = vmatpush.bf16.msra.mxu3 %v6026_v42  ;;  %v5874_v16 = vor.u32 %v7554_v34, %v5871_v24  ;;  %v6247_v42 = vld [vmem:[#allocation5 + $0x978] sm:$0xf0]  ;;  %v6186_v0 = vor.u32 %v7632_v31, %v6183_v46  ;;  %v6106_v24 = vor.u32 %v7612_v26, %v6103_v53  ;;  %v6207_v26 = vld [vmem:[#allocation5 + $0x928] sm:$0xf0]  ;;  %v7654_v53 = vld [vmem:[#allocation5 + $0x9a4] sm:$0xf] }
 0x1cb   : > { %v6250_v12 = vor.u32 %v7648_v60, %v6247_v42  ;;  %v6295_v34 = vld [vmem:[#allocation5 + $0x9d8] sm:$0xf0]  ;;  %v7608_v60 = vld [vmem:[#allocation5 + $0x834] sm:$0xf]  ;;  %v6290_v42 = vor.u32 %v7658_v51, %v6287_v11  ;;  %v6063_v11 = vld [vmem:[#allocation5 + $0x808] sm:$0xf0] }
 0x1cc   : > { %v6298_v35 = vor.u32 %v7660_v33, %v6295_v34  ;;  %v6071_v33 = vld [vmem:[#allocation5 + $0x818] sm:$0xf0] }
 0x1cd   : > { %4571 = vmatpush.bf16.msra.mxu0 %v5826_v48  ;;  %4584 = vmatpush.bf16.msra.mxu1 %v5890_v29  ;;  %v7630_v48 = vld [vmem:[#allocation5 + $0x8e4] sm:$0xf]  ;;  %v6175_v29 = vld [vmem:[#allocation5 + $0x8e8] sm:$0xf0] }
 0x1ce   : > { %4597 = vmatpush.bf16.msra.mxu2 %v5954_v15  ;;  %4610 = vmatpush.bf16.msra.mxu3 %v6018_v37  ;;  %v6303_v15 = vld [vmem:[#allocation5 + $0x9e8] sm:$0xf0]  ;;  %v6114_v37 = vor.u32 %v7614_v7, %v6111_v3  ;;  %v6178_v50 = vor.u32 %v7630_v48, %v6175_v29  ;;  %v6279_v7 = vld [vmem:[#allocation5 + $0x9b8] sm:$0xf0] }
 0x1cf   : > { %v6306_v19 = vor.u32 %v7662_v9, %v6303_v15  ;;  %v6143_v9 = vld [vmem:[#allocation5 + $0x8a8] sm:$0xf0]  ;;  %v7638_v15 = vld [vmem:[#allocation5 + $0x924] sm:$0xf] }
 0x1d1   : > { %4572 = vmatpush.bf16.msra.mxu0 %v5818_v58  ;;  %4585 = vmatpush.bf16.msra.mxu1 %v5882_v62  ;;  %v7644_v58 = vld [vmem:[#allocation5 + $0x954] sm:$0xf]  ;;  %v6231_v62 = vld [vmem:[#allocation5 + $0x958] sm:$0xf0] }
 0x1d2   : > { %4598 = vmatpush.bf16.msra.mxu2 %v5946_v38  ;;  %4611 = vmatpush.bf16.msra.mxu3 %v6010_v41  ;;  %v6170_v38 = vor.u32 %v7628_v59, %v6167_v23  ;;  %v7610_v41 = vld [vmem:[#allocation5 + $0x844] sm:$0xf]  ;;  %v6234_v55 = vor.u32 %v7644_v58, %v6231_v62  ;;  %v6146_v58 = vor.u32 %v7622_v25, %v6143_v9  ;;  %v7604_v62 = vld [vmem:[#allocation5 + $0x814] sm:$0xf] }
 0x1d3   : > { %v7678_v9 = vld [vmem:[#allocation5 + $0xa64] sm:$0xf] }
 0x1d5   : > { %4573 = vmatpush.bf16.msra.mxu0 %v5810_v4  ;;  %4586 = vmatpush.bf16.msra.mxu1 %v5874_v16  ;;  %v4367_v49 = vpop.f32.mrf.mxu0  ;;  %v4380_v46 = vpop.f32.mrf.mxu1  ;;  %v6087_v4 = vld [vmem:[#allocation5 + $0x838] sm:$0xf0] }
 0x1d6   : > { %4599 = vmatpush.bf16.msra.mxu2 %v5938_v20  ;;  %4612 = vmatpush.bf16.msra.mxu3 %v6002_v63  ;;  %v7640_v20 = vld [vmem:[#allocation5 + $0x934] sm:$0xf]  ;;  %v6090_v3 = vor.u32 %v7608_v60, %v6087_v4  ;;  %v6191_v60 = vld [vmem:[#allocation5 + $0x908] sm:$0xf0]  ;;  %v7650_v4 = vld [vmem:[#allocation5 + $0x984] sm:$0xf] }
 0x1d8   : > { %4574 = vmatmul.bf16.vlgmr.msra.gmra.mxu0 %v8540_v30  ;;  %4587 = vmatmul.bf16.vlgmr.msra.gmra.mxu1 %v8548_v28  ;;  %v7626_v30 = vld [vmem:[#allocation5 + $0x8c4] sm:$0xf]  ;;  %v4368_v28 = vadd.f32 %v4367_v49, %v8717_v8  ;;  %v6154_v8 = vor.u32 %v7624_v21, %v6151_v22  ;;  %v7680_v21 = vld [vmem:[#allocation5 + $0xa74] sm:$0xf]  ;;  %v6375_v22 = vld [vmem:[#allocation5 + $0xa78] sm:$0xf0] }
 0x1d9   : > { %4618 = vmatpush.bf16.msrb.mxu0 %v6122_v5  ;;  %4631 = vmatpush.bf16.msrb.mxu1 %v6186_v0  ;;  %v6162_v31 = vor.u32 %v7626_v30, %v6159_v17  ;;  %v6215_v5 = vld [vmem:[#allocation5 + $0x938] sm:$0xf0]  ;;  %v7656_v0 = vld [vmem:[#allocation5 + $0x9b4] sm:$0xf]  ;;  %v7618_v49 = vld [vmem:[#allocation5 + $0x884] sm:$0xf] }
 0x1da   : > { %4644 = vmatpush.bf16.msrb.mxu2 %v6250_v12  ;;  %4657 = vmatpush.bf16.msrb.mxu3 %v6314_v13  ;;  %v4381_v63 = vadd.f32 %v4380_v46, %v4368_v28  ;;  %v7606_v12 = vld [vmem:[#allocation5 + $0x824] sm:$0xf]  ;;  %v6079_v13 = vld [vmem:[#allocation5 + $0x828] sm:$0xf0]  ;;  %v6218_v48 = vor.u32 %v7640_v20, %v6215_v5  ;;  %v6282_v29 = vor.u32 %v7656_v0, %v6279_v7  ;;  %v7652_v30 = vld [vmem:[#allocation5 + $0x994] sm:$0xf] }
 0x1db   : > { %4600 = vmatmul.bf16.vlgmr.msra.gmra.mxu2 %v8544_v56  ;;  %4613 = vmatmul.bf16.vlgmr.msra.gmra.mxu3 %v8552_v18  ;;  %v7642_v56 = vld [vmem:[#allocation5 + $0x944] sm:$0xf]  ;;  %v6098_v18 = vor.u32 %v7610_v41, %v6095_v52  ;;  %v6082_v23 = vor.u32 %v7606_v12, %v6079_v13  ;;  %v7620_v41 = vld [vmem:[#allocation5 + $0x894] sm:$0xf]  ;;  %v6135_v52 = vld [vmem:[#allocation5 + $0x898] sm:$0xf0] }
 0x1dc   : > { %v6226_v16 = vor.u32 %v7642_v56, %v6223_v61  ;;  %v6263_v17 = vld [vmem:[#allocation5 + $0x998] sm:$0xf0]  ;;  %v7602_v56 = vld [vmem:[#allocation5 + $0x804] sm:$0xf]  ;;  %v6074_v61 = vor.u32 %v7604_v62, %v6071_v33  ;;  %v6138_v51 = vor.u32 %v7620_v41, %v6135_v52  ;;  %v6127_v28 = vld [vmem:[#allocation5 + $0x888] sm:$0xf0] }
 0x1dd   : > { %4619 = vmatpush.bf16.msrb.mxu0 %v6114_v37  ;;  %4632 = vmatpush.bf16.msrb.mxu1 %v6178_v50  ;;  %v4382_v34 = vpop.f32.mrf.mxu1  ;;  %v7634_v46 = vld [vmem:[#allocation5 + $0x904] sm:$0xf]  ;;  %v6439_v5 = vld [vmem:[#allocation5 + $0xaf8] sm:$0xf0]  ;;  %v7712_v0 = vld [vmem:[#allocation5 + $0xb74] sm:$0xf]  ;;  %v6066_v7 = vor.u32 %v7602_v56, %v6063_v11 }
 0x1de   : > { %4645 = vmatpush.bf16.msrb.mxu2 %v6242_v44  ;;  %4658 = vmatpush.bf16.msrb.mxu3 %v6306_v19  ;;  %v4393_v47 = vpop.f32.mrf.mxu2  ;;  %v4406_v50 = vpop.f32.mrf.mxu3  ;;  %v6271_v44 = vld [vmem:[#allocation5 + $0x9a8] sm:$0xf0]  ;;  %v7728_v12 = vld [vmem:[#allocation5 + $0xbf4] sm:$0xf]  ;;  %v6567_v13 = vld [vmem:[#allocation5 + $0xbf8] sm:$0xf0] }
 0x1df   : > { %v4394_v37 = vadd.f32 %v4393_v47, %v4381_v63  ;;  %v4369_v19 = vpop.f32.mrf.mxu0  ;;  %v7696_v63 = vld [vmem:[#allocation5 + $0xaf4] sm:$0xf]  ;;  %v6378_v47 = vor.u32 %v7680_v21, %v6375_v22  ;;  %v6551_v56 = vld [vmem:[#allocation5 + $0xbd8] sm:$0xf0]  ;;  %v7674_v11 = vld [vmem:[#allocation5 + $0xa44] sm:$0xf] }
 0x1e0   : > { %v6442_v25 = vor.u32 %v7696_v63, %v6439_v5  ;;  %v6495_v19 = vld [vmem:[#allocation5 + $0xb68] sm:$0xf0]  ;;  %v7676_v34 = vld [vmem:[#allocation5 + $0xa54] sm:$0xf] }
 0x1e1   : > { %4620 = vmatpush.bf16.msrb.mxu0 %v6106_v24  ;;  %4633 = vmatpush.bf16.msrb.mxu1 %v6170_v38  ;;  %v8724_v59 = vadd.f32 %v4406_v50, %v4394_v37  ;;  %v6210_v24 = vor.u32 %v7638_v15, %v6207_v26  ;;  %v6274_v38 = vor.u32 %v7654_v53, %v6271_v44  ;;  %v6367_v15 = vld [vmem:[#allocation5 + $0xa68] sm:$0xf0]  ;;  %v7694_v26 = vld [vmem:[#allocation5 + $0xae4] sm:$0xf]  ;;  %v7692_v52 = vld [vmem:[#allocation5 + $0xad4] sm:$0xf] }
 0x1e2   : > { %4646 = vmatpush.bf16.msrb.mxu2 %v6234_v55  ;;  %4659 = vmatpush.bf16.msrb.mxu3 %v6298_v35  ;;  %v7636_v55 = vld [vmem:[#allocation5 + $0x914] sm:$0xf]  ;;  %v6199_v35 = vld [vmem:[#allocation5 + $0x918] sm:$0xf0]  ;;  %v6570_v50 = vor.u32 %v7728_v12, %v6567_v13  ;;  %v6431_v53 = vld [vmem:[#allocation5 + $0xae8] sm:$0xf0]  ;;  %v6370_v62 = vor.u32 %v7678_v9, %v6367_v15 }
 0x1e3   : > { %v7710_v44 = vld [vmem:[#allocation5 + $0xb64] sm:$0xf]  ;;  %v6434_v33 = vor.u32 %v7694_v26, %v6431_v53  ;;  %v7672_v22 = vld [vmem:[#allocation5 + $0xa34] sm:$0xf]  ;;  %v6471_v13 = vld [vmem:[#allocation5 + $0xb38] sm:$0xf0] }
 0x1e4   : > { %v7704_v12 = vld [vmem:[#allocation5 + $0xb34] sm:$0xf]  ;;  %v7670_v15 = vld [vmem:[#allocation5 + $0xa24] sm:$0xf]  ;;  %vm4878_vm14 = vcmp.ge.f32.partialorder %v8724_v59, 0.0 }
 0x1e5   : > { %4621 = vmatpush.bf16.msrb.mxu0 %v6098_v18  ;;  %4634 = vmatpush.bf16.msrb.mxu1 %v6162_v31  ;;  %v6202_v18 = vor.u32 %v7636_v55, %v6199_v35  ;;  %v6266_v31 = vor.u32 %v7652_v30, %v6263_v17  ;;  %v6423_v55 = vld [vmem:[#allocation5 + $0xad8] sm:$0xf0]  ;;  %v7708_v35 = vld [vmem:[#allocation5 + $0xb54] sm:$0xf]  ;;  %v7686_v53 = vld [vmem:[#allocation5 + $0xaa4] sm:$0xf] }
 0x1e6   : > { %4647 = vmatpush.bf16.msrb.mxu2 %v6226_v16  ;;  %4660 = vmatpush.bf16.msrb.mxu3 %v6290_v42  ;;  %v4395_v16 = vpop.f32.mrf.mxu2  ;;  %v6255_v42 = vld [vmem:[#allocation5 + $0x988] sm:$0xf0]  ;;  %v4408_v20 = vpop.f32.mrf.mxu3  ;;  %v6487_v30 = vld [vmem:[#allocation5 + $0xb58] sm:$0xf0]  ;;  %v7724_v17 = vld [vmem:[#allocation5 + $0xbd4] sm:$0xf] }
 0x1e7   : > { %v7722_v16 = vld [vmem:[#allocation5 + $0xbc4] sm:$0xf]  ;;  %v6343_v20 = vld [vmem:[#allocation5 + $0xa38] sm:$0xf0] }
 0x1e9   : > { %4622 = vmatpush.bf16.msrb.mxu0 %v6090_v3  ;;  %4635 = vmatpush.bf16.msrb.mxu1 %v6154_v8  ;;  %v6130_v3 = vor.u32 %v7618_v49, %v6127_v28  ;;  %v6503_v8 = vld [vmem:[#allocation5 + $0xb78] sm:$0xf0]  ;;  %v6351_v49 = vld [vmem:[#allocation5 + $0xa48] sm:$0xf0]  ;;  %v8010_v28 = vld [vmem:[#allocation7] sm:$0x3] }
 0x1ea   : > { %4648 = vmatpush.bf16.msrb.mxu2 %v6218_v48  ;;  %4661 = vmatpush.bf16.msrb.mxu3 %v6282_v29  ;;  %v6194_v48 = vor.u32 %v7634_v46, %v6191_v60  ;;  %v6258_v29 = vor.u32 %v7650_v4, %v6255_v42  ;;  %v6506_v37 = vor.u32 %v7712_v0, %v6503_v8  ;;  %v6415_v46 = vld [vmem:[#allocation5 + $0xac8] sm:$0xf0]  ;;  %v7706_v60 = vld [vmem:[#allocation5 + $0xb44] sm:$0xf]  ;;  %v6407_v8 = vld [vmem:[#allocation5 + $0xab8] sm:$0xf0] }
 0x1eb   : > { %v6479_v4 = vld [vmem:[#allocation5 + $0xb48] sm:$0xf0] }
 0x1ec   : > { %v6482_v0 = vor.u32 %v7706_v60, %v6479_v4  ;;  %v6319_v60 = vld [vmem:[#allocation5 + $0xa08] sm:$0xf0]  ;;  %v7682_v4 = vld [vmem:[#allocation5 + $0xa84] sm:$0xf] }
 0x1ed   : > { %4623 = vmatpush.bf16.msrb.mxu0 %v6082_v23  ;;  %4636 = vmatpush.bf16.msrb.mxu1 %v6146_v58  ;;  %v7726_v23 = vld [vmem:[#allocation5 + $0xbe4] sm:$0xf]  ;;  %v6559_v58 = vld [vmem:[#allocation5 + $0xbe8] sm:$0xf0] }
 0x1ee   : > { %4649 = vmatpush.bf16.msrb.mxu2 %v6210_v24  ;;  %4662 = vmatpush.bf16.msrb.mxu3 %v6274_v38  ;;  %v6359_v24 = vld [vmem:[#allocation5 + $0xa58] sm:$0xf0]  ;;  %v6498_v38 = vor.u32 %v7710_v44, %v6495_v19  ;;  %v6562_v41 = vor.u32 %v7726_v23, %v6559_v58  ;;  %v6399_v44 = vld [vmem:[#allocation5 + $0xaa8] sm:$0xf0]  ;;  %v7702_v19 = vld [vmem:[#allocation5 + $0xb24] sm:$0xf] }
 0x1ef   : > { %v6463_v58 = vld [vmem:[#allocation5 + $0xb28] sm:$0xf0] }
 0x1f1   : > { %4624 = vmatpush.bf16.msrb.mxu0 %v6074_v61  ;;  %4637 = vmatpush.bf16.msrb.mxu1 %v6138_v51  ;;  %v6362_v61 = vor.u32 %v7676_v34, %v6359_v24  ;;  %v6426_v51 = vor.u32 %v7692_v52, %v6423_v55  ;;  %v6402_v52 = vor.u32 %v7686_v53, %v6399_v44  ;;  %v7668_v55 = vld [vmem:[#allocation5 + $0xa14] sm:$0xf]  ;;  %v6623_v53 = vld [vmem:[#allocation5 + $0xc68] sm:$0xf0] }
 0x1f2   : > { %4650 = vmatpush.bf16.msrb.mxu2 %v6202_v18  ;;  %4663 = vmatpush.bf16.msrb.mxu3 %v6266_v31  ;;  %v1059_v18 = vperm.slane %v8010_v28, 1  ;;  %v6554_v31 = vor.u32 %v7724_v17, %v6551_v56  ;;  %v6466_v56 = vor.u32 %v7702_v19, %v6463_v58  ;;  %v6455_v28 = vld [vmem:[#allocation5 + $0xb18] sm:$0xf0]  ;;  %v6687_v58 = vld [vmem:[#allocation5 + $0xce8] sm:$0xf0] }
 0x1f5   : > { %4625 = vmatpush.bf16.msrb.mxu0 %v6066_v7  ;;  %4638 = vmatpush.bf16.msrb.mxu1 %v6130_v3  ;;  %v4419_v42 = vpop.f32.mrf.mxu0  ;;  %v4432_v5 = vpop.f32.mrf.mxu1  ;;  %v7688_v3 = vld [vmem:[#allocation5 + $0xab4] sm:$0xf] }
 0x1f6   : > { %4651 = vmatpush.bf16.msrb.mxu2 %v6194_v48  ;;  %4664 = vmatpush.bf16.msrb.mxu3 %v6258_v29  ;;  %v4420_v63 = vadd.f32 %v4419_v42, %v1059_v18  ;;  %v7720_v48 = vld [vmem:[#allocation5 + $0xbb4] sm:$0xf]  ;;  %v6535_v29 = vld [vmem:[#allocation5 + $0xbb8] sm:$0xf0]  ;;  %v6410_v9 = vor.u32 %v7688_v3, %v6407_v8 }
 0x1f7   : > { %v6538_v26 = vor.u32 %v7720_v48, %v6535_v29  ;;  %v7716_v18 = vld [vmem:[#allocation5 + $0xb94] sm:$0xf]  ;;  %v6695_v8 = vld [vmem:[#allocation5 + $0xcf8] sm:$0xf0] }
 0x1f8   : > { %4626 = vmatmul.bf16.vlgmr.msrb.gmra.mxu0 %v8570_v57  ;;  %4639 = vmatmul.bf16.vlgmr.msrb.gmra.mxu1 %v8578_v1  ;;  %v6490_v57 = vor.u32 %v7708_v35, %v6487_v30  ;;  %v6543_v1 = vld [vmem:[#allocation5 + $0xbc8] sm:$0xf0]  ;;  %v6327_v35 = vld [vmem:[#allocation5 + $0xa18] sm:$0xf0]  ;;  %v7760_v3 = vld [vmem:[#allocation5 + $0xcf4] sm:$0xf] }
 0x1f9   : > { %4670 = vmatpush.bf16.msra.mxu0 %v6378_v47  ;;  %4683 = vmatpush.bf16.msra.mxu1 %v6442_v25  ;;  %v6546_v7 = vor.u32 %v7722_v16, %v6543_v1  ;;  %v4433_v47 = vadd.f32 %v4432_v5, %v4420_v63  ;;  %v6346_v25 = vor.u32 %v7672_v22, %v6343_v20  ;;  %v6383_v16 = vld [vmem:[#allocation5 + $0xa88] sm:$0xf0]  ;;  %v7714_v22 = vld [vmem:[#allocation5 + $0xb84] sm:$0xf]  ;;  %v7744_v5 = vld [vmem:[#allocation5 + $0xc74] sm:$0xf] }
 0x1fa   : > { %4696 = vmatpush.bf16.msra.mxu2 %v6506_v37  ;;  %4709 = vmatpush.bf16.msra.mxu3 %v6570_v50  ;;  %v6335_v37 = vld [vmem:[#allocation5 + $0xa28] sm:$0xf0]  ;;  %v6474_v50 = vor.u32 %v7704_v12, %v6471_v13  ;;  %v7776_v12 = vld [vmem:[#allocation5 + $0xd74] sm:$0xf]  ;;  %v6386_v48 = vor.u32 %v7682_v4, %v6383_v16  ;;  %v6759_v29 = vld [vmem:[#allocation5 + $0xd78] sm:$0xf0] }
 0x1fb   : > { %4652 = vmatmul.bf16.vlgmr.msrb.gmra.mxu2 %v8574_v45  ;;  %4665 = vmatmul.bf16.vlgmr.msrb.gmra.mxu3 %v8582_v2  ;;  %v7690_v45 = vld [vmem:[#allocation5 + $0xac4] sm:$0xf]  ;;  %v6354_v2 = vor.u32 %v7674_v11, %v6351_v49  ;;  %v6391_v11 = vld [vmem:[#allocation5 + $0xa98] sm:$0xf0]  ;;  %v7700_v49 = vld [vmem:[#allocation5 + $0xb14] sm:$0xf]  ;;  %v6762_v44 = vor.u32 %v7776_v12, %v6759_v29 }
 0x1fc   : > { %v6418_v21 = vor.u32 %v7690_v45, %v6415_v46  ;;  %v6330_v45 = vor.u32 %v7668_v55, %v6327_v35  ;;  %v6458_v1 = vor.u32 %v7700_v49, %v6455_v28  ;;  %v6511_v63 = vld [vmem:[#allocation5 + $0xb88] sm:$0xf0]  ;;  %v6615_v55 = vld [vmem:[#allocation5 + $0xc58] sm:$0xf0]  ;;  %v7788_v49 = vld [vmem:[#allocation5 + $0xdd4] sm:$0xf] }
 0x1fd   : > { %4671 = vmatpush.bf16.msra.mxu0 %v6370_v62  ;;  %4684 = vmatpush.bf16.msra.mxu1 %v6434_v33  ;;  %v7718_v62 = vld [vmem:[#allocation5 + $0xba4] sm:$0xf]  ;;  %v6527_v33 = vld [vmem:[#allocation5 + $0xba8] sm:$0xf0]  ;;  %v4434_v17 = vpop.f32.mrf.mxu1  ;;  %v6807_v28 = vld [vmem:[#allocation5 + $0xdd8] sm:$0xf0] }
 0x1fe   : > { %4697 = vmatpush.bf16.msra.mxu2 %v6498_v38  ;;  %4710 = vmatpush.bf16.msra.mxu3 %v6562_v41  ;;  %v4445_v23 = vpop.f32.mrf.mxu2  ;;  %v4458_v24 = vpop.f32.mrf.mxu3  ;;  %v6338_v41 = vor.u32 %v7670_v15, %v6335_v37  ;;  %v6514_v15 = vor.u32 %v7714_v22, %v6511_v63  ;;  %v6671_v4 = vld [vmem:[#allocation5 + $0xcc8] sm:$0xf0]  ;;  %v6599_v22 = vld [vmem:[#allocation5 + $0xc38] sm:$0xf0] }
 0x1ff   : > { %v4446_v34 = vadd.f32 %v4445_v23, %v4433_v47  ;;  %v4421_v38 = vpop.f32.mrf.mxu0  ;;  %v7792_v47 = vld [vmem:[#allocation5 + $0xdf4] sm:$0xf]  ;;  %v7758_v23 = vld [vmem:[#allocation5 + $0xce4] sm:$0xf]  ;;  %v6735_v16 = vld [vmem:[#allocation5 + $0xd48] sm:$0xf0] }
 0x200   : > { %v6727_v12 = vld [vmem:[#allocation5 + $0xd38] sm:$0xf0] }
 0x201   : > { %4672 = vmatpush.bf16.msra.mxu0 %v6362_v61  ;;  %4685 = vmatpush.bf16.msra.mxu1 %v6426_v51  ;;  %v8730_v30 = vadd.f32 %v4458_v24, %v4446_v34  ;;  %v6530_v61 = vor.u32 %v7718_v62, %v6527_v33  ;;  %v7684_v51 = vld [vmem:[#allocation5 + $0xa94] sm:$0xf]  ;;  %v7774_v62 = vld [vmem:[#allocation5 + $0xd64] sm:$0xf]  ;;  %v6751_v33 = vld [vmem:[#allocation5 + $0xd68] sm:$0xf0] }
 0x202   : > { %4698 = vmatpush.bf16.msra.mxu2 %v6490_v57  ;;  %4711 = vmatpush.bf16.msra.mxu3 %v6554_v31  ;;  %v6519_v57 = vld [vmem:[#allocation5 + $0xb98] sm:$0xf0]  ;;  %v7666_v31 = vld [vmem:[#allocation5 + $0xa04] sm:$0xf]  ;;  %v6394_v46 = vor.u32 %v7684_v51, %v6391_v11  ;;  %v6815_v24 = vld [vmem:[#allocation5 + $0xde8] sm:$0xf0]  ;;  %v6754_v35 = vor.u32 %v7774_v62, %v6751_v33 }
 0x203   : > { %v6522_v42 = vor.u32 %v7716_v18, %v6519_v57  ;;  %v6322_v13 = vor.u32 %v7666_v31, %v6319_v60  ;;  %v7790_v34 = vld [vmem:[#allocation5 + $0xde4] sm:$0xf]  ;;  %v7772_v51 = vld [vmem:[#allocation5 + $0xd54] sm:$0xf]  ;;  %v6743_v11 = vld [vmem:[#allocation5 + $0xd58] sm:$0xf0]  ;;  %v6810_v60 = vor.u32 %v7788_v49, %v6807_v28 }
 0x204   : > { %v6818_v17 = vor.u32 %v7790_v34, %v6815_v24  ;;  %v7738_v31 = vld [vmem:[#allocation5 + $0xc44] sm:$0xf]  ;;  %v6711_v49 = vld [vmem:[#allocation5 + $0xd18] sm:$0xf0]  ;;  %v7780_v28 = vld [vmem:[#allocation5 + $0xd94] sm:$0xf] }
 0x205   : > { %4673 = vmatpush.bf16.msra.mxu0 %v6354_v2  ;;  %4686 = vmatpush.bf16.msra.mxu1 %v6418_v21  ;;  %v7698_v2 = vld [vmem:[#allocation5 + $0xb04] sm:$0xf]  ;;  %v6447_v21 = vld [vmem:[#allocation5 + $0xb08] sm:$0xf0] }
 0x206   : > { %4699 = vmatpush.bf16.msra.mxu2 %v6482_v0  ;;  %4712 = vmatpush.bf16.msra.mxu3 %v6546_v7  ;;  %v4447_v20 = vpop.f32.mrf.mxu2  ;;  %v6631_v0 = vld [vmem:[#allocation5 + $0xc78] sm:$0xf0]  ;;  %v4460_v7 = vpop.f32.mrf.mxu3 }
 0x207   : > { %v6634_v37 = vor.u32 %v7744_v5, %v6631_v0  ;;  %v7752_v7 = vld [vmem:[#allocation5 + $0xcb4] sm:$0xf] }
 0x209   : > { %4674 = vmatpush.bf16.msra.mxu0 %v6346_v25  ;;  %4687 = vmatpush.bf16.msra.mxu1 %v6410_v9  ;;  %v6823_v25 = vld [vmem:[#allocation5 + $0xdf8] sm:$0xf0]  ;;  %v6450_v9 = vor.u32 %v7698_v2, %v6447_v21  ;;  %v7736_v21 = vld [vmem:[#allocation5 + $0xc34] sm:$0xf] }
 0x20a   : > { %4700 = vmatpush.bf16.msra.mxu2 %v6474_v50  ;;  %4713 = vmatpush.bf16.msra.mxu3 %v6538_v26  ;;  %v6698_v50 = vor.u32 %v7760_v3, %v6695_v8  ;;  %v7742_v26 = vld [vmem:[#allocation5 + $0xc64] sm:$0xf]  ;;  %v6826_v19 = vor.u32 %v7792_v47, %v6823_v25  ;;  %v6663_v3 = vld [vmem:[#allocation5 + $0xcb8] sm:$0xf0]  ;;  %v7768_v8 = vld [vmem:[#allocation5 + $0xd34] sm:$0xf]  ;;  %v6602_v47 = vor.u32 %v7736_v21, %v6599_v22 }
 0x20b   : > { %v6626_v38 = vor.u32 %v7742_v26, %v6623_v53  ;;  %v6666_v25 = vor.u32 %v7752_v7, %v6663_v3  ;;  %v6655_v26 = vld [vmem:[#allocation5 + $0xca8] sm:$0xf0]  ;;  %v7766_v53 = vld [vmem:[#allocation5 + $0xd24] sm:$0xf]  ;;  %v6887_v21 = vld [vmem:[#allocation5 + $0xe78] sm:$0xf0] }
 0x20c   : > { %v7015_v3 = vld [vmem:[#allocation5 + $0xf78] sm:$0xf0] }
 0x20d   : > { %4675 = vmatpush.bf16.msra.mxu0 %v6338_v41  ;;  %4688 = vmatpush.bf16.msra.mxu1 %v6402_v52  ;;  %v6690_v41 = vor.u32 %v7758_v23, %v6687_v58  ;;  %v7740_v52 = vld [vmem:[#allocation5 + $0xc54] sm:$0xf]  ;;  %v7782_v23 = vld [vmem:[#allocation5 + $0xda4] sm:$0xf]  ;;  %v6783_v58 = vld [vmem:[#allocation5 + $0xda8] sm:$0xf0] }
 0x20e   : > { %4701 = vmatpush.bf16.msra.mxu2 %v6466_v56  ;;  %4714 = vmatpush.bf16.msra.mxu3 %v6530_v61  ;;  %v7756_v56 = vld [vmem:[#allocation5 + $0xcd4] sm:$0xf]  ;;  %v6679_v61 = vld [vmem:[#allocation5 + $0xcd8] sm:$0xf0]  ;;  %v6618_v18 = vor.u32 %v7740_v52, %v6615_v55 }
 0x20f   : > { %v6682_v57 = vor.u32 %v7756_v56, %v6679_v61  ;;  %v6583_v52 = vld [vmem:[#allocation5 + $0xc18] sm:$0xf0]  ;;  %v6786_v56 = vor.u32 %v7782_v23, %v6783_v58  ;;  %v7748_v61 = vld [vmem:[#allocation5 + $0xc94] sm:$0xf] }
 0x211   : > { %4676 = vmatpush.bf16.msra.mxu0 %v6330_v45  ;;  %4689 = vmatpush.bf16.msra.mxu1 %v6394_v46  ;;  %v6607_v45 = vld [vmem:[#allocation5 + $0xc48] sm:$0xf0]  ;;  %v6746_v46 = vor.u32 %v7772_v51, %v6743_v11  ;;  %v6647_v51 = vld [vmem:[#allocation5 + $0xc98] sm:$0xf0]  ;;  %v7764_v11 = vld [vmem:[#allocation5 + $0xd14] sm:$0xf] }
 0x212   : > { %4702 = vmatpush.bf16.msra.mxu2 %v6458_v1  ;;  %4715 = vmatpush.bf16.msra.mxu3 %v6522_v42  ;;  %v7786_v1 = vld [vmem:[#allocation5 + $0xdc4] sm:$0xf]  ;;  %v6799_v42 = vld [vmem:[#allocation5 + $0xdc8] sm:$0xf0] }
 0x213   : > { %v6802_v0 = vor.u32 %v7786_v1, %v6799_v42  ;;  %v6703_v1 = vld [vmem:[#allocation5 + $0xd08] sm:$0xf0]  ;;  %v7778_v42 = vld [vmem:[#allocation5 + $0xd84] sm:$0xf] }
 0x215   : > { %4677 = vmatpush.bf16.msra.mxu0 %v6322_v13  ;;  %4690 = vmatpush.bf16.msra.mxu1 %v6386_v48  ;;  %v4471_v2 = vpop.f32.mrf.mxu0  ;;  %v4484_v63 = vpop.f32.mrf.mxu1  ;;  %v7784_v13 = vld [vmem:[#allocation5 + $0xdb4] sm:$0xf]  ;;  %v6791_v48 = vld [vmem:[#allocation5 + $0xdb8] sm:$0xf0] }
 0x216   : > { %4703 = vmatpush.bf16.msra.mxu2 %v6450_v9  ;;  %4716 = vmatpush.bf16.msra.mxu3 %v6514_v15  ;;  %v4472_v20 = vadd.f32 %v4471_v2, %v8730_v30  ;;  %v7734_v9 = vld [vmem:[#allocation5 + $0xc24] sm:$0xf]  ;;  %v6591_v15 = vld [vmem:[#allocation5 + $0xc28] sm:$0xf0]  ;;  %v6730_v30 = vor.u32 %v7768_v8, %v6727_v12  ;;  %v7856_v8 = vld [vmem:[#allocation5 + $0xff4] sm:$0xf] }
 0x217   : > { %v6594_v24 = vor.u32 %v7734_v9, %v6591_v15  ;;  %v7079_v12 = vld [vmem:[#allocation5 + $0xff8] sm:$0xf0]  ;;  %v6879_v9 = vld [vmem:[#allocation5 + $0xe68] sm:$0xf0] }
 0x218   : > { %4678 = vmatmul.bf16.vlgmr.msra.gmra.mxu0 %v8600_v40  ;;  %4691 = vmatmul.bf16.vlgmr.msra.gmra.mxu1 %v8608_v6  ;;  %v7754_v40 = vld [vmem:[#allocation5 + $0xcc4] sm:$0xf]  ;;  %v6610_v6 = vor.u32 %v7738_v31, %v6607_v45  ;;  %v4485_v29 = vadd.f32 %v4484_v63, %v4472_v20  ;;  %v6650_v45 = vor.u32 %v7748_v61, %v6647_v51  ;;  %v7824_v20 = vld [vmem:[#allocation5 + $0xef4] sm:$0xf]  ;;  %v6951_v63 = vld [vmem:[#allocation5 + $0xef8] sm:$0xf0] }
 0x219   : > { %4722 = vmatpush.bf16.msrb.mxu0 %v6634_v37  ;;  %4735 = vmatpush.bf16.msrb.mxu1 %v6698_v50  ;;  %v6794_v37 = vor.u32 %v7784_v13, %v6791_v48  ;;  %v7750_v50 = vld [vmem:[#allocation5 + $0xca4] sm:$0xf]  ;;  %v8825_v61 = vld [vmem:[#allocation12_spill] sm:$0xff]  ;;  %v8826_v51 = vld [vmem:[#allocation13_spill] sm:$0xff] }
 0x21a   : > { %4748 = vmatpush.bf16.msrb.mxu2 %v6762_v44  ;;  %4761 = vmatpush.bf16.msrb.mxu3 %v6826_v19  ;;  %v6719_v19 = vld [vmem:[#allocation5 + $0xd28] sm:$0xf0] }
 0x21b   : > { %4704 = vmatmul.bf16.vlgmr.msra.gmra.mxu2 %v8604_v43  ;;  %4717 = vmatmul.bf16.vlgmr.msra.gmra.mxu3 %v8612_v54  ;;  %v7770_v43 = vld [vmem:[#allocation5 + $0xd44] sm:$0xf]  ;;  %v6674_v54 = vor.u32 %v7754_v40, %v6671_v4  ;;  %v6639_v40 = vld [vmem:[#allocation5 + $0xc88] sm:$0xf0]  ;;  %v6714_v4 = vor.u32 %v7764_v11, %v6711_v49 }
 0x21c   : > { %v6738_v5 = vor.u32 %v7770_v43, %v6735_v16  ;;  %v7762_v16 = vld [vmem:[#allocation5 + $0xd04] sm:$0xf] }
 0x21d   : > { %4723 = vmatpush.bf16.msrb.mxu0 %v6626_v38  ;;  %4736 = vmatpush.bf16.msrb.mxu1 %v6690_v41  ;;  %v4473_v34 = vpop.f32.mrf.mxu0  ;;  %v6658_v38 = vor.u32 %v7750_v50, %v6655_v26  ;;  %v7732_v41 = vld [vmem:[#allocation5 + $0xc14] sm:$0xf]  ;;  %v6706_v13 = vor.u32 %v7762_v16, %v6703_v1  ;;  %v6943_v50 = vld [vmem:[#allocation5 + $0xee8] sm:$0xf0]  ;;  %v7838_v26 = vld [vmem:[#allocation5 + $0xf64] sm:$0xf] }
 0x21e   : > { %4749 = vmatpush.bf16.msrb.mxu2 %v6754_v35  ;;  %4762 = vmatpush.bf16.msrb.mxu3 %v6818_v17  ;;  %v4497_v44 = vpop.f32.mrf.mxu2  ;;  %v4510_v33 = vpop.f32.mrf.mxu3  ;;  %v6722_v17 = vor.u32 %v7766_v53, %v6719_v19  ;;  %v6586_v31 = vor.u32 %v7732_v41, %v6583_v52  ;;  %v7007_v53 = vld [vmem:[#allocation5 + $0xf68] sm:$0xf0]  ;;  %v6935_v41 = vld [vmem:[#allocation5 + $0xed8] sm:$0xf0]  ;;  %v7836_v52 = vld [vmem:[#allocation5 + $0xf54] sm:$0xf] }
 0x21f   : > { %v4498_v62 = vadd.f32 %v4497_v44, %v4485_v29  ;;  %v4486_v35 = vpop.f32.mrf.mxu1  ;;  %v7854_v44 = vld [vmem:[#allocation5 + $0xfe4] sm:$0xf]  ;;  %v7071_v19 = vld [vmem:[#allocation5 + $0xfe8] sm:$0xf0]  ;;  %v7010_v34 = vor.u32 %v7838_v26, %v7007_v53 }
 0x220   : > { %v6999_v35 = vld [vmem:[#allocation5 + $0xf58] sm:$0xf0]  ;;  %v7846_v26 = vld [vmem:[#allocation5 + $0xfa4] sm:$0xf]  ;;  %v7039_v53 = vld [vmem:[#allocation5 + $0xfa8] sm:$0xf0] }
 0x221   : > { %4724 = vmatpush.bf16.msrb.mxu0 %v6618_v18  ;;  %4737 = vmatpush.bf16.msrb.mxu1 %v6682_v57  ;;  %v8737_v55 = vadd.f32 %v4510_v33, %v4498_v62  ;;  %v6775_v18 = vld [vmem:[#allocation5 + $0xd98] sm:$0xf0]  ;;  %v7730_v57 = vld [vmem:[#allocation5 + $0xc04] sm:$0xf]  ;;  %v7804_v62 = vld [vmem:[#allocation5 + $0xe54] sm:$0xf] }
 0x222   : > { %4750 = vmatpush.bf16.msrb.mxu2 %v6746_v46  ;;  %4763 = vmatpush.bf16.msrb.mxu3 %v6810_v60  ;;  %v6575_v46 = vld [vmem:[#allocation5 + $0xc08] sm:$0xf0]  ;;  %v7746_v60 = vld [vmem:[#allocation5 + $0xc84] sm:$0xf]  ;;  %v6778_v43 = vor.u32 %v7780_v28, %v6775_v18  ;;  %v6871_v33 = vld [vmem:[#allocation5 + $0xe58] sm:$0xf0] }
 0x223   : > { %v6642_v7 = vor.u32 %v7746_v60, %v6639_v40  ;;  %v6874_v11 = vor.u32 %v7804_v62, %v6871_v33  ;;  %v7802_v28 = vld [vmem:[#allocation5 + $0xe44] sm:$0xf]  ;;  %v6863_v18 = vld [vmem:[#allocation5 + $0xe48] sm:$0xf0]  ;;  %v7796_v62 = vld [vmem:[#allocation5 + $0xe14] sm:$0xf] }
 0x224   : > { %v7850_v60 = vld [vmem:[#allocation5 + $0xfc4] sm:$0xf]  ;;  %v7055_v40 = vld [vmem:[#allocation5 + $0xfc8] sm:$0xf0]  ;;  %v6866_v16 = vor.u32 %v7802_v28, %v6863_v18  ;;  %v6839_v33 = vld [vmem:[#allocation5 + $0xe18] sm:$0xf0] }
 0x225   : > { %4725 = vmatpush.bf16.msrb.mxu0 %v6610_v6  ;;  %4738 = vmatpush.bf16.msrb.mxu1 %v6674_v54  ;;  %v6767_v6 = vld [vmem:[#allocation5 + $0xd88] sm:$0xf0]  ;;  %v7808_v54 = vld [vmem:[#allocation5 + $0xe74] sm:$0xf]  ;;  %v7810_v18 = vld [vmem:[#allocation5 + $0xe84] sm:$0xf] }
 0x226   : > { %4751 = vmatpush.bf16.msrb.mxu2 %v6738_v5  ;;  %4764 = vmatpush.bf16.msrb.mxu3 %v6802_v0  ;;  %v4499_v2 = vpop.f32.mrf.mxu2  ;;  %v4512_v22 = vpop.f32.mrf.mxu3  ;;  %v7840_v5 = vld [vmem:[#allocation5 + $0xf74] sm:$0xf]  ;;  %v6578_v0 = vor.u32 %v7730_v57, %v6575_v46  ;;  %v6770_v48 = vor.u32 %v7778_v42, %v6767_v6  ;;  %v6890_v29 = vor.u32 %v7808_v54, %v6887_v21  ;;  %v6991_v46 = vld [vmem:[#allocation5 + $0xf48] sm:$0xf0]  ;;  %v6855_v6 = vld [vmem:[#allocation5 + $0xe38] sm:$0xf0] }
 0x227   : > { %v7018_v15 = vor.u32 %v7840_v5, %v7015_v3  ;;  %v7002_v57 = vor.u32 %v7836_v52, %v6999_v35  ;;  %v7800_v2 = vld [vmem:[#allocation5 + $0xe34] sm:$0xf]  ;;  %v7058_v21 = vor.u32 %v7850_v60, %v7055_v40  ;;  %v7047_v3 = vld [vmem:[#allocation5 + $0xfb8] sm:$0xf0]  ;;  %v6831_v28 = vld [vmem:[#allocation5 + $0xe08] sm:$0xf0] }
 0x228   : > { %v7816_v22 = vld [vmem:[#allocation5 + $0xeb4] sm:$0xf]  ;;  %v6903_v52 = vld [vmem:[#allocation5 + $0xe98] sm:$0xf0]  ;;  %v7023_v40 = vld [vmem:[#allocation5 + $0xf88] sm:$0xf0] }
 0x229   : > { %4726 = vmatpush.bf16.msrb.mxu0 %v6602_v47  ;;  %4739 = vmatpush.bf16.msrb.mxu1 %v6666_v25  ;;  %v6954_v47 = vor.u32 %v7824_v20, %v6951_v63  ;;  %v7806_v25 = vld [vmem:[#allocation5 + $0xe64] sm:$0xf]  ;;  %v6919_v20 = vld [vmem:[#allocation5 + $0xeb8] sm:$0xf0]  ;;  %v7832_v63 = vld [vmem:[#allocation5 + $0xf34] sm:$0xf] }
 0x22a   : > { %4752 = vmatpush.bf16.msrb.mxu2 %v6730_v30  ;;  %4765 = vmatpush.bf16.msrb.mxu3 %v6794_v37  ;;  %v7082_v30 = vor.u32 %v7856_v8, %v7079_v12  ;;  %v7822_v37 = vld [vmem:[#allocation5 + $0xee4] sm:$0xf]  ;;  %v6882_v23 = vor.u32 %v7806_v25, %v6879_v9  ;;  %v6858_v8 = vor.u32 %v7800_v2, %v6855_v6  ;;  %v6911_v9 = vld [vmem:[#allocation5 + $0xea8] sm:$0xf0]  ;;  %v7828_v35 = vld [vmem:[#allocation5 + $0xf14] sm:$0xf] }
 0x22b   : > { %v6946_v58 = vor.u32 %v7822_v37, %v6943_v50  ;;  %v7798_v12 = vld [vmem:[#allocation5 + $0xe24] sm:$0xf]  ;;  %v6975_v50 = vld [vmem:[#allocation5 + $0xf28] sm:$0xf0]  ;;  %v7904_v2 = vld [vmem:[#allocation5 + $0x1174] sm:$0xf] }
 0x22c   : > { %v7814_v25 = vld [vmem:[#allocation5 + $0xea4] sm:$0xf] }
 0x22d   : > { %4727 = vmatpush.bf16.msrb.mxu0 %v6594_v24  ;;  %4740 = vmatpush.bf16.msrb.mxu1 %v6658_v38  ;;  %v7074_v24 = vor.u32 %v7854_v44, %v7071_v19  ;;  %v7820_v38 = vld [vmem:[#allocation5 + $0xed4] sm:$0xf] }
 0x22e   : > { %4753 = vmatpush.bf16.msrb.mxu2 %v6722_v17  ;;  %4766 = vmatpush.bf16.msrb.mxu3 %v6786_v56  ;;  %v7852_v17 = vld [vmem:[#allocation5 + $0xfd4] sm:$0xf]  ;;  %v7063_v56 = vld [vmem:[#allocation5 + $0xfd8] sm:$0xf0]  ;;  %v6938_v49 = vor.u32 %v7820_v38, %v6935_v41  ;;  %v7042_v38 = vor.u32 %v7846_v26, %v7039_v53 }
 0x22f   : > { %v7812_v41 = vld [vmem:[#allocation5 + $0xe94] sm:$0xf] }
 0x231   : > { %4728 = vmatpush.bf16.msrb.mxu0 %v6586_v31  ;;  %4741 = vmatpush.bf16.msrb.mxu1 %v6650_v45  ;;  %v7066_v31 = vor.u32 %v7852_v17, %v7063_v56  ;;  %v6927_v45 = vld [vmem:[#allocation5 + $0xec8] sm:$0xf0]  ;;  %v6967_v17 = vld [vmem:[#allocation5 + $0xf18] sm:$0xf0]  ;;  %v7844_v56 = vld [vmem:[#allocation5 + $0xf94] sm:$0xf] }
 0x232   : > { %4754 = vmatpush.bf16.msrb.mxu2 %v6714_v4  ;;  %4767 = vmatpush.bf16.msrb.mxu3 %v6778_v43 }
 0x235   : > { %4729 = vmatpush.bf16.msrb.mxu0 %v6578_v0  ;;  %4742 = vmatpush.bf16.msrb.mxu1 %v6642_v7  ;;  %v4523_v4 = vpop.f32.mrf.mxu0  ;;  %v4536_v42 = vpop.f32.mrf.mxu1  ;;  %v6983_v0 = vld [vmem:[#allocation5 + $0xf38] sm:$0xf0]  ;;  %v7848_v7 = vld [vmem:[#allocation5 + $0xfb4] sm:$0xf] }
 0x236   : > { %4755 = vmatpush.bf16.msrb.mxu2 %v6706_v13  ;;  %4768 = vmatpush.bf16.msrb.mxu3 %v6770_v48  ;;  %v4524_v43 = vadd.f32 %v4523_v4, %v8737_v55  ;;  %v6922_v55 = vor.u32 %v7816_v22, %v6919_v20  ;;  %v6847_v13 = vld [vmem:[#allocation5 + $0xe28] sm:$0xf0]  ;;  %v6986_v48 = vor.u32 %v7832_v63, %v6983_v0  ;;  %v7872_v4 = vld [vmem:[#allocation5 + $0x1074] sm:$0xf]  ;;  %v7335_v20 = vld [vmem:[#allocation5 + $0x11f8] sm:$0xf0] }
 0x237   : > { %v7920_v22 = vld [vmem:[#allocation5 + $0x11f4] sm:$0xf] }
 0x238   : > { %4730 = vmatmul.bf16.vlgmr.msrb.gmra.mxu0 %v8630_v27  ;;  %4743 = vmatmul.bf16.vlgmr.msrb.gmra.mxu1 %v8825_v61  ;;  %v7818_v27 = vld [vmem:[#allocation5 + $0xec4] sm:$0xf]  ;;  %v4537_v5 = vadd.f32 %v4536_v42, %v4524_v43  ;;  %v7031_v61 = vld [vmem:[#allocation5 + $0xf98] sm:$0xf0] }
 0x239   : > { %4774 = vmatpush.bf16.msra.mxu0 %v6890_v29  ;;  %4787 = vmatpush.bf16.msra.mxu1 %v6954_v47  ;;  %v6930_v1 = vor.u32 %v7818_v27, %v6927_v45  ;;  %v7050_v29 = vor.u32 %v7848_v7, %v7047_v3  ;;  %v7034_v27 = vor.u32 %v7844_v56, %v7031_v61  ;;  %v7826_v45 = vld [vmem:[#allocation5 + $0xf04] sm:$0xf]  ;;  %v7143_v43 = vld [vmem:[#allocation5 + $0x1078] sm:$0xf0]  ;;  %v7119_v56 = vld [vmem:[#allocation5 + $0x1048] sm:$0xf0] }
 0x23a   : > { %4800 = vmatpush.bf16.msra.mxu2 %v7018_v15  ;;  %4813 = vmatpush.bf16.msra.mxu3 %v7082_v30  ;;  %v7830_v15 = vld [vmem:[#allocation5 + $0xf24] sm:$0xf]  ;;  %v7207_v42 = vld [vmem:[#allocation5 + $0x10f8] sm:$0xf0]  ;;  %v7146_v0 = vor.u32 %v7872_v4, %v7143_v43 }
 0x23b   : > { %4756 = vmatmul.bf16.vlgmr.msrb.gmra.mxu2 %v8634_v10  ;;  %4769 = vmatmul.bf16.vlgmr.msrb.gmra.mxu3 %v8826_v51  ;;  %v7834_v10 = vld [vmem:[#allocation5 + $0xf44] sm:$0xf] }
 0x23c   : > { %v6994_v54 = vor.u32 %v7834_v10, %v6991_v46  ;;  %v7794_v51 = vld [vmem:[#allocation5 + $0xe04] sm:$0xf]  ;;  %v6959_v10 = vld [vmem:[#allocation5 + $0xf08] sm:$0xf0] }
 0x23d   : > { %4775 = vmatpush.bf16.msra.mxu0 %v6882_v23  ;;  %4788 = vmatpush.bf16.msra.mxu1 %v6946_v58  ;;  %v4525_v44 = vpop.f32.mrf.mxu0  ;;  %v6850_v23 = vor.u32 %v7798_v12, %v6847_v13  ;;  %v6914_v58 = vor.u32 %v7814_v25, %v6911_v9  ;;  %v7842_v46 = vld [vmem:[#allocation5 + $0xf84] sm:$0xf]  ;;  %v6834_v6 = vor.u32 %v7794_v51, %v6831_v28  ;;  %v7327_v9 = vld [vmem:[#allocation5 + $0x11e8] sm:$0xf0] }
 0x23e   : > { %4801 = vmatpush.bf16.msra.mxu2 %v7010_v34  ;;  %4814 = vmatpush.bf16.msra.mxu3 %v7074_v24  ;;  %v4549_v47 = vpop.f32.mrf.mxu2  ;;  %v4562_v37 = vpop.f32.mrf.mxu3  ;;  %v6978_v24 = vor.u32 %v7830_v15, %v6975_v50  ;;  %v6962_v63 = vor.u32 %v7826_v45, %v6959_v10  ;;  %v7870_v3 = vld [vmem:[#allocation5 + $0x1064] sm:$0xf]  ;;  %v7338_v12 = vor.u32 %v7920_v22, %v7335_v20  ;;  %v7127_v50 = vld [vmem:[#allocation5 + $0x1058] sm:$0xf0]  ;;  %v7884_v44 = vld [vmem:[#allocation5 + $0x10d4] sm:$0xf] }
 0x23f   : > { %v4550_v30 = vadd.f32 %v4549_v47, %v4537_v5  ;;  %v4538_v34 = vpop.f32.mrf.mxu1  ;;  %v7026_v5 = vor.u32 %v7842_v46, %v7023_v40  ;;  %v7886_v13 = vld [vmem:[#allocation5 + $0x10e4] sm:$0xf]  ;;  %v7263_v47 = vld [vmem:[#allocation5 + $0x1168] sm:$0xf0]  ;;  %v7111_v40 = vld [vmem:[#allocation5 + $0x1038] sm:$0xf0] }
 0x240   : > { %v7918_v25 = vld [vmem:[#allocation5 + $0x11e4] sm:$0xf]  ;;  %v7916_v34 = vld [vmem:[#allocation5 + $0x11d4] sm:$0xf]  ;;  %v7247_v28 = vld [vmem:[#allocation5 + $0x1148] sm:$0xf0] }
 0x241   : > { %4776 = vmatpush.bf16.msra.mxu0 %v6874_v11  ;;  %4789 = vmatpush.bf16.msra.mxu1 %v6938_v49  ;;  %v8744_v19 = vadd.f32 %v4562_v37, %v4550_v30  ;;  %v6842_v11 = vor.u32 %v7796_v62, %v6839_v33  ;;  %v6906_v49 = vor.u32 %v7812_v41, %v6903_v52  ;;  %v7868_v37 = vld [vmem:[#allocation5 + $0x1054] sm:$0xf]  ;;  %v8827_v62 = vld [vmem:[#allocation14_spill] sm:$0xff]  ;;  %v7255_v33 = vld [vmem:[#allocation5 + $0x1158] sm:$0xf0] }
 0x242   : > { %4802 = vmatpush.bf16.msra.mxu2 %v7002_v57  ;;  %4815 = vmatpush.bf16.msra.mxu3 %v7066_v31  ;;  %v6895_v57 = vld [vmem:[#allocation5 + $0xe88] sm:$0xf0]  ;;  %v6970_v31 = vor.u32 %v7828_v35, %v6967_v17  ;;  %v7330_v53 = vor.u32 %v7918_v25, %v7327_v9  ;;  %v8829_v41 = vld [vmem:[#allocation16_spill] sm:$0xff]  ;;  %v7130_v52 = vor.u32 %v7868_v37, %v7127_v50  ;;  %v7866_v17 = vld [vmem:[#allocation5 + $0x1044] sm:$0xf] }
 0x243   : > { %v7122_v45 = vor.u32 %v7866_v17, %v7119_v56  ;;  %v7862_v20 = vld [vmem:[#allocation5 + $0x1024] sm:$0xf]  ;;  %v7860_v37 = vld [vmem:[#allocation5 + $0x1014] sm:$0xf]  ;;  %v7095_v50 = vld [vmem:[#allocation5 + $0x1018] sm:$0xf0] }
 0x245   : > { %4777 = vmatpush.bf16.msra.mxu0 %v6866_v16  ;;  %4790 = vmatpush.bf16.msra.mxu1 %v6930_v1  ;;  %v7888_v1 = vld [vmem:[#allocation5 + $0x10f4] sm:$0xf] }
 0x246   : > { %4803 = vmatpush.bf16.msra.mxu2 %v6994_v54  ;;  %4816 = vmatpush.bf16.msra.mxu3 %v7058_v21  ;;  %v4551_v60 = vpop.f32.mrf.mxu2  ;;  %v4564_v16 = vpop.f32.mrf.mxu3  ;;  %v6898_v54 = vor.u32 %v7810_v18, %v6895_v57  ;;  %v7271_v21 = vld [vmem:[#allocation5 + $0x1178] sm:$0xf0]  ;;  %v7210_v7 = vor.u32 %v7888_v1, %v7207_v42  ;;  %v7914_v18 = vld [vmem:[#allocation5 + $0x11c4] sm:$0xf]  ;;  %v7311_v57 = vld [vmem:[#allocation5 + $0x11c8] sm:$0xf0] }
 0x247   : > { %v7864_v60 = vld [vmem:[#allocation5 + $0x1034] sm:$0xf]  ;;  %v7314_v43 = vor.u32 %v7914_v18, %v7311_v57  ;;  %v7175_v1 = vld [vmem:[#allocation5 + $0x10b8] sm:$0xf0]  ;;  %v7279_v18 = vld [vmem:[#allocation5 + $0x1188] sm:$0xf0] }
 0x248   : > { %v7880_v16 = vld [vmem:[#allocation5 + $0x10b4] sm:$0xf]  ;;  %v7114_v22 = vor.u32 %v7864_v60, %v7111_v40 }
 0x249   : > { %4778 = vmatpush.bf16.msra.mxu0 %v6858_v8  ;;  %4791 = vmatpush.bf16.msra.mxu1 %v6922_v55  ;;  %v7135_v8 = vld [vmem:[#allocation5 + $0x1068] sm:$0xf0]  ;;  %v7274_v55 = vor.u32 %v7904_v2, %v7271_v21  ;;  %v7896_v42 = vld [vmem:[#allocation5 + $0x1134] sm:$0xf]  ;;  %v7303_v21 = vld [vmem:[#allocation5 + $0x11b8] sm:$0xf0] }
 0x24a   : > { %4804 = vmatpush.bf16.msra.mxu2 %v6986_v48  ;;  %4817 = vmatpush.bf16.msra.mxu3 %v7050_v29  ;;  %v7199_v48 = vld [vmem:[#allocation5 + $0x10e8] sm:$0xf0]  ;;  %v7902_v29 = vld [vmem:[#allocation5 + $0x1164] sm:$0xf]  ;;  %v7138_v15 = vor.u32 %v7870_v3, %v7135_v8 }
 0x24b   : > { %v7202_v30 = vor.u32 %v7886_v13, %v7199_v48  ;;  %v7266_v26 = vor.u32 %v7902_v29, %v7263_v47  ;;  %v7878_v3 = vld [vmem:[#allocation5 + $0x10a4] sm:$0xf]  ;;  %v7167_v8 = vld [vmem:[#allocation5 + $0x10a8] sm:$0xf0] }
 0x24c   : > { %v7231_v48 = vld [vmem:[#allocation5 + $0x1128] sm:$0xf0]  ;;  %v7910_v29 = vld [vmem:[#allocation5 + $0x11a4] sm:$0xf] }
 0x24d   : > { %4779 = vmatpush.bf16.msra.mxu0 %v6850_v23  ;;  %4792 = vmatpush.bf16.msra.mxu1 %v6914_v58  ;;  %v7191_v23 = vld [vmem:[#allocation5 + $0x10d8] sm:$0xf0]  ;;  %v7900_v58 = vld [vmem:[#allocation5 + $0x1154] sm:$0xf]  ;;  %v7295_v47 = vld [vmem:[#allocation5 + $0x11a8] sm:$0xf0] }
 0x24e   : > { %4805 = vmatpush.bf16.msra.mxu2 %v6978_v24  ;;  %4818 = vmatpush.bf16.msra.mxu3 %v7042_v38  ;;  %v7319_v24 = vld [vmem:[#allocation5 + $0x11d8] sm:$0xf0]  ;;  %v8828_v38 = vld [vmem:[#allocation15_spill] sm:$0xff]  ;;  %v7194_v35 = vor.u32 %v7884_v44, %v7191_v23  ;;  %v7258_v61 = vor.u32 %v7900_v58, %v7255_v33  ;;  %v7298_v44 = vor.u32 %v7910_v29, %v7295_v47  ;;  %v7876_v23 = vld [vmem:[#allocation5 + $0x1094] sm:$0xf] }
 0x24f   : > { %v7322_v51 = vor.u32 %v7916_v34, %v7319_v24  ;;  %v7159_v58 = vld [vmem:[#allocation5 + $0x1098] sm:$0xf0]  ;;  %v7908_v34 = vld [vmem:[#allocation5 + $0x1194] sm:$0xf] }
 0x250   : > { %v7223_v33 = vld [vmem:[#allocation5 + $0x1118] sm:$0xf0] }
 0x251   : > { %4780 = vmatpush.bf16.msra.mxu0 %v6842_v11  ;;  %4793 = vmatpush.bf16.msra.mxu1 %v6906_v49  ;;  %v7183_v11 = vld [vmem:[#allocation5 + $0x10c8] sm:$0xf0]  ;;  %v7898_v49 = vld [vmem:[#allocation5 + $0x1144] sm:$0xf]  ;;  %v7287_v24 = vld [vmem:[#allocation5 + $0x1198] sm:$0xf0] }
 0x252   : > { %4806 = vmatpush.bf16.msra.mxu2 %v6970_v31  ;;  %4819 = vmatpush.bf16.msra.mxu3 %v7034_v27  ;;  %v7250_v4 = vor.u32 %v7898_v49, %v7247_v28  ;;  %v7290_v56 = vor.u32 %v7908_v34, %v7287_v24  ;;  %v7215_v49 = vld [vmem:[#allocation5 + $0x1108] sm:$0xf0]  ;;  %v7906_v28 = vld [vmem:[#allocation5 + $0x1184] sm:$0xf] }
 0x255   : > { %4781 = vmatpush.bf16.msra.mxu0 %v6834_v6  ;;  %4794 = vmatpush.bf16.msra.mxu1 %v6898_v54  ;;  %v4575_v31 = vpop.f32.mrf.mxu0  ;;  %v4588_v46 = vpop.f32.mrf.mxu1  ;;  %v7239_v6 = vld [vmem:[#allocation5 + $0x1138] sm:$0xf0]  ;;  %v7912_v54 = vld [vmem:[#allocation5 + $0x11b4] sm:$0xf] }
 0x256   : > { %4807 = vmatpush.bf16.msra.mxu2 %v6962_v63  ;;  %4820 = vmatpush.bf16.msra.mxu3 %v7026_v5  ;;  %v4576_v27 = vadd.f32 %v4575_v31, %v8744_v19  ;;  %v7178_v19 = vor.u32 %v7880_v16, %v7175_v1  ;;  %v7103_v63 = vld [vmem:[#allocation5 + $0x1028] sm:$0xf0]  ;;  %v7242_v5 = vor.u32 %v7896_v42, %v7239_v6 }
 0x258   : > { %4782 = vmatmul.bf16.vlgmr.msra.gmra.mxu0 %v8662_v39  ;;  %4795 = vmatmul.bf16.vlgmr.msra.gmra.mxu1 %v8828_v38  ;;  %v7882_v39 = vld [vmem:[#allocation5 + $0x10c4] sm:$0xf]  ;;  %v4589_v2 = vadd.f32 %v4588_v46, %v4576_v27  ;;  %v7098_v38 = vor.u32 %v7860_v37, %v7095_v50  ;;  %v8830_v46 = vld [vmem:[#allocation17_spill] sm:$0xff] }
 0x259   : > { %4826 = vmatpush.bf16.msrb.mxu0 %v7146_v0  ;;  %4839 = vmatpush.bf16.msrb.mxu1 %v7210_v7  ;;  %v7186_v10 = vor.u32 %v7882_v39, %v7183_v11  ;;  %v7306_v0 = vor.u32 %v7912_v54, %v7303_v21  ;;  %v7890_v39 = vld [vmem:[#allocation5 + $0x1104] sm:$0xf] }
 0x25a   : > { %4852 = vmatpush.bf16.msrb.mxu2 %v7274_v55  ;;  %4865 = vmatpush.bf16.msrb.mxu3 %v7338_v12  ;;  %v7894_v55 = vld [vmem:[#allocation5 + $0x1124] sm:$0xf] }
 0x25b   : > { %4808 = vmatmul.bf16.vlgmr.msra.gmra.mxu2 %v8827_v62  ;;  %4821 = vmatmul.bf16.vlgmr.msra.gmra.mxu3 %v8829_v41  ;;  %v7892_v62 = vld [vmem:[#allocation5 + $0x1114] sm:$0xf]  ;;  %v7162_v41 = vor.u32 %v7876_v23, %v7159_v58 }
 0x25c   : > { %v7226_v17 = vor.u32 %v7892_v62, %v7223_v33 }
 0x25d   : > { %4827 = vmatpush.bf16.msrb.mxu0 %v7138_v15  ;;  %4840 = vmatpush.bf16.msrb.mxu1 %v7202_v30  ;;  %v4577_v25 = vpop.f32.mrf.mxu0  ;;  %v7106_v15 = vor.u32 %v7862_v20, %v7103_v63  ;;  %v7170_v30 = vor.u32 %v7878_v3, %v7167_v8 }
 0x25e   : > { %4853 = vmatpush.bf16.msrb.mxu2 %v7266_v26  ;;  %4866 = vmatpush.bf16.msrb.mxu3 %v7330_v53  ;;  %v4601_v7 = vpop.f32.mrf.mxu2  ;;  %v4614_v13 = vpop.f32.mrf.mxu3  ;;  %v7234_v53 = vor.u32 %v7894_v55, %v7231_v48 }
 0x25f   : > { %v4602_v12 = vadd.f32 %v4601_v7, %v4589_v2  ;;  %v4590_v26 = vpop.f32.mrf.mxu1 }
 0x261   : > { %4828 = vmatpush.bf16.msrb.mxu0 %v7130_v52  ;;  %4841 = vmatpush.bf16.msrb.mxu1 %v7194_v35  ;;  %v4615_v9 = vadd.f32 %v4614_v13, %v4602_v12  ;;  %v7858_v52 = vld [vmem:[#allocation5 + $0x1004] sm:$0xf]  ;;  %v7087_v35 = vld [vmem:[#allocation5 + $0x1008] sm:$0xf0] }
 0x262   : > { %4854 = vmatpush.bf16.msrb.mxu2 %v7258_v61  ;;  %4867 = vmatpush.bf16.msrb.mxu3 %v7322_v51  ;;  %v7874_v61 = vld [vmem:[#allocation5 + $0x1084] sm:$0xf]  ;;  %v7151_v51 = vld [vmem:[#allocation5 + $0x1088] sm:$0xf0]  ;;  %v7090_v31 = vor.u32 %v7858_v52, %v7087_v35 }
 0x263   : > { %v7154_v27 = vor.u32 %v7874_v61, %v7151_v51 }
 0x265   : > { %4829 = vmatpush.bf16.msrb.mxu0 %v7122_v45  ;;  %4842 = vmatpush.bf16.msrb.mxu1 %v7186_v10  ;;  %v7218_v45 = vor.u32 %v7890_v39, %v7215_v49  ;;  %v7282_v10 = vor.u32 %v7906_v28, %v7279_v18 }
 0x266   : > { %4855 = vmatpush.bf16.msrb.mxu2 %v7250_v4  ;;  %4868 = vmatpush.bf16.msrb.mxu3 %v7314_v43  ;;  %v4603_v11 = vpop.f32.mrf.mxu2  ;;  %v4616_v57 = vpop.f32.mrf.mxu3 }
 0x269   : > { %4830 = vmatpush.bf16.msrb.mxu0 %v7114_v22  ;;  %4843 = vmatpush.bf16.msrb.mxu1 %v7178_v19 }
 0x26a   : > { %4856 = vmatpush.bf16.msrb.mxu2 %v7242_v5  ;;  %4869 = vmatpush.bf16.msrb.mxu3 %v7306_v0 }
 0x26d   : > { %4831 = vmatpush.bf16.msrb.mxu0 %v7106_v15  ;;  %4844 = vmatpush.bf16.msrb.mxu1 %v7170_v30 }
 0x26e   : > { %4857 = vmatpush.bf16.msrb.mxu2 %v7234_v53  ;;  %4870 = vmatpush.bf16.msrb.mxu3 %v7298_v44 }
 0x271   : > { %4832 = vmatpush.bf16.msrb.mxu0 %v7098_v38  ;;  %4845 = vmatpush.bf16.msrb.mxu1 %v7162_v41 }
 0x272   : > { %4858 = vmatpush.bf16.msrb.mxu2 %v7226_v17  ;;  %4871 = vmatpush.bf16.msrb.mxu3 %v7290_v56 }
 0x275   : > { %4833 = vmatpush.bf16.msrb.mxu0 %v7090_v31  ;;  %4846 = vmatpush.bf16.msrb.mxu1 %v7154_v27  ;;  %v4627_v60 = vpop.f32.mrf.mxu0  ;;  %v4640_v4 = vpop.f32.mrf.mxu1  ;;  %v4880_v31 = vmul.f32 0.1, %v8724_v59 }
 0x276   : > { %4859 = vmatpush.bf16.msrb.mxu2 %v7218_v45  ;;  %4872 = vmatpush.bf16.msrb.mxu3 %v7282_v10  ;;  %v4628_v40 = vadd.f32 %v4627_v60, %v4615_v9 }
 0x278   : > { %4834 = vmatmul.bf16.vlgmr.msrb.gmra.mxu0 %v8683_v36  ;;  %4847 = vmatmul.bf16.vlgmr.msrb.gmra.mxu1 %v8687_v14  ;;  %v4641_v43 = vadd.f32 %v4640_v4, %v4628_v40  ;;  %v4882_v40 = vsel %vm4878_vm14, %v8724_v59, %v4880_v31 }
 0x279   : > { %4860 = vmatmul.bf16.vlgmr.msrb.gmra.mxu2 %v8685_v32  ;;  %4873 = vmatmul.bf16.vlgmr.msrb.gmra.mxu3 %v8830_v46 }
 0x27d   : > { %v4629_v2 = vpop.f32.mrf.mxu0  ;;  %v4642_v54 = vpop.f32.mrf.mxu1 }
 0x27e   : > { %v4653_v16 = vpop.f32.mrf.mxu2  ;;  %v4666_v42 = vpop.f32.mrf.mxu3 }
 0x27f   : > { %v4654_v1 = vadd.f32 %v4653_v16, %v4641_v43 }
 0x281   : > { %v4667_v6 = vadd.f32 %v4666_v42, %v4654_v1 }
 0x286   : > { %v4655_v21 = vpop.f32.mrf.mxu2  ;;  %v4668_v22 = vpop.f32.mrf.mxu3 }
 0x295   : > { %v4679_v19 = vpop.f32.mrf.mxu0  ;;  %v4692_v20 = vpop.f32.mrf.mxu1 }
 0x296   : > { %v4680_v36 = vadd.f32 %v4679_v19, %v4667_v6 }
 0x298   : > { %v4693_v14 = vadd.f32 %v4692_v20, %v4680_v36 }
 0x29d   : > { %v4681_v0 = vpop.f32.mrf.mxu0  ;;  %v4694_v3 = vpop.f32.mrf.mxu1 }
 0x29e   : > { %v4705_v63 = vpop.f32.mrf.mxu2  ;;  %v4718_v5 = vpop.f32.mrf.mxu3 }
 0x29f   : > { %v4706_v32 = vadd.f32 %v4705_v63, %v4693_v14 }
 0x2a1   : > { %v4719_v7 = vadd.f32 %v4718_v5, %v4706_v32 }
 0x2a6   : > { %v4707_v8 = vpop.f32.mrf.mxu2  ;;  %v4720_v55 = vpop.f32.mrf.mxu3 }
 0x2b5   : > { %v4731_v12 = vpop.f32.mrf.mxu0  ;;  %v4744_v13 = vpop.f32.mrf.mxu1 }
 0x2b6   : > { %v4732_v26 = vadd.f32 %v4731_v12, %v4719_v7 }
 0x2b8   : > { %v4745_v58 = vadd.f32 %v4744_v13, %v4732_v26 }
 0x2bd   : > { %v4733_v47 = vpop.f32.mrf.mxu0  ;;  %v4746_v25 = vpop.f32.mrf.mxu1 }
 0x2be   : > { %v4757_v48 = vpop.f32.mrf.mxu2  ;;  %v4770_v29 = vpop.f32.mrf.mxu3 }
 0x2bf   : > { %v4758_v62 = vadd.f32 %v4757_v48, %v4745_v58 }
 0x2c1   : > { %v4771_v24 = vadd.f32 %v4770_v29, %v4758_v62 }
 0x2c6   : > { %v4759_v9 = vpop.f32.mrf.mxu2  ;;  %v4772_v15 = vpop.f32.mrf.mxu3 }
 0x2d5   : > { %v4783_v30 = vpop.f32.mrf.mxu0  ;;  %v4796_v37 = vpop.f32.mrf.mxu1 }
 0x2d6   : > { %v4784_v38 = vadd.f32 %v4783_v30, %v4771_v24 }
 0x2d8   : > { %v4797_v41 = vadd.f32 %v4796_v37, %v4784_v38 }
 0x2dd   : > { %v4785_v44 = vpop.f32.mrf.mxu0  ;;  %v4798_v23 = vpop.f32.mrf.mxu1 }
 0x2de   : > { %v4809_v50 = vpop.f32.mrf.mxu2  ;;  %v4822_v53 = vpop.f32.mrf.mxu3 }
 0x2df   : > { %v4810_v52 = vadd.f32 %v4809_v50, %v4797_v41 }
 0x2e1   : > { %v4823_v35 = vadd.f32 %v4822_v53, %v4810_v52 }
 0x2e6   : > { %v4811_v33 = vpop.f32.mrf.mxu2  ;;  %v4824_v34 = vpop.f32.mrf.mxu3 }
 0x2f5   : > { %v4835_v17 = vpop.f32.mrf.mxu0  ;;  %v4848_v56 = vpop.f32.mrf.mxu1 }
 0x2f6   : > { %v4836_v61 = vadd.f32 %v4835_v17, %v4823_v35 }
 0x2f8   : > { %v4849_v51 = vadd.f32 %v4848_v56, %v4836_v61 }
 0x2fc   : > { %v4861_v39 = vpop.f32.mrf.mxu2  ;;  %v4874_v11 = vpop.f32.mrf.mxu3 }
 0x2fd   : > { %v4862_v49 = vadd.f32 %v4861_v39, %v4849_v51  ;;  %v4837_v28 = vpop.f32.mrf.mxu0  ;;  %v4850_v18 = vpop.f32.mrf.mxu1 }
 0x2ff   : > { %v4875_v57 = vadd.f32 %v4874_v11, %v4862_v49 }
 0x301   : > { %vm4879_vm13 = vcmp.ge.f32.partialorder %v4875_v57, 0.0  ;;  %v4881_v27 = vmul.f32 0.1, %v4875_v57 }
 0x303   : > { %v4883_v45 = vsel %vm4879_vm13, %v4875_v57, %v4881_v27 }
 0x304   : > { %v4886_v10 = vrot.slane %v4883_v45, 4  ;;  %v4863_v46 = vpop.f32.mrf.mxu2  ;;  %v4876_v60 = vpop.f32.mrf.mxu3 }
 0x306   : > { %v4887_v4 = vsel %vm258_vm3, %v4882_v40, %v4886_v10 }
 0x307   : > { %7339 = vst.sshfl [vmem:[%s235_s25] sm:$0xff pattern:$0x73625140] %v4887_v4 }
 0x308   : > { %8128 = shalt.err (!%p8125_p0)
}
 0x309   : > { %7933 = dma.vmem_to_hbm [thread:$0]  (%p8298_p7), %s4911_s30, 128, %s4913_s4, %s4895_s15  }
 0x30a PF: > { %s4924_s11 = sand.u32 1, %s8167_s12   ;;  %p7947_p3 = pnand %p5018_p11, %p8264_p6 }
 0x30b   : > { %s4925_s26 = scalar_lea.sflag [#allocation4], %s4924_s11 }
 0x30c   : > { %p7948_p5 = pneg %p7947_p3 }
 0x30e   : > { %8162 = dma.done.wait (%p7948_p5), %s4925_s26, 128  }
 0x30f   : > { %8164 = vsyncadd (%p7948_p5), %s4925_s26, 4294967168  ;;  %s20_s17 = sadd.s32 1, %s8187_s17   ;;  %s8831_s12 = smov %s8171_s13 }
 0x310   : > { %p17_p9 = scmp.ge.s32.totalorder %s20_s17, 4   ;;  %s8832_s13 = smov %s8175_s14 }
 0x311   : > { %s8833_s14 = smov %s8307_s29  ;;  %s8834_s15 = smov %s8183_s16 }
 0x312   : > { %s8835_s16 = smov %s8837_s10  ;;  %19 = sbr.rel (!%p17_p9) target bundleno = 9 (0x9), region = 100 }
 0x317   :  { %4931 = vsyncpa [#allocation3], 1 }
 0x318   :  { %4933 = vsyncpa [#allocation3 + $0x1], 1 }
 0x319   :  { %4934 = vsyncpa [#allocation6], 1 }
 0x31a   :  { %4935 = vsyncpa [#allocation4], 1 }
 0x31b   :  { %4937 = vsyncpa [#allocation4 + $0x1], 1 }

</bundles_post_ra>
